<compile_context>
chip_gen: v7x
topology: tpu7x:2x2x1
jax: 0.10.0
libtpu: 0.0.40
codegen_flags: <defaults>
</compile_context>

<pallas_src>
import functools

import jax
import jax.numpy as jnp
import numpy as np
from jax import lax
from jax.experimental import pallas as pl
from jax.experimental.pallas import tpu as pltpu

HIDDEN1_UNITS = 400
HIDDEN2_UNITS = 400
HIDDEN3_UNITS = 400


def _softplus(x):
    # Matches torch.nn.functional.softplus (beta=1, threshold=20).
    return jnp.where(x > 20.0, x, jnp.log1p(jnp.exp(jnp.minimum(x, 20.0))))


def _round_up(x, m):
    return ((x + m - 1) // m) * m


def penn_kernel(x_ref,
                w1_ref, b1_ref,
                w2_ref, s2_ref, b2_ref,
                w3_ref, s3_ref, b3_ref,
                w4_ref, b4_ref,
                maxlv_ref, minlv_ref,
                out_ref, *, num_nets, state_dim):
    """One grid step = one batch tile.  All ensemble members are computed inside
    (static unrolled loop) on weights that stay resident in VMEM across all steps."""
    x = x_ref[...].astype(jnp.bfloat16)                      # (TB, D_in)
    max_lv = maxlv_ref[...]                                   # (1, 2*S), zeros in mean cols
    min_lv = minlv_ref[...]
    col = lax.broadcasted_iota(jnp.int32, (x.shape[0], 2 * state_dim), 1)

    for n in range(num_nets):                                 # static unroll (num_nets is small)
        # Layer 1 (bf16 weights), f32 accumulation on the MXU.
        h = jnp.dot(x, w1_ref[n], preferred_element_type=jnp.float32) + b1_ref[n]
        h = jnp.maximum(h, 0.0).astype(jnp.bfloat16)
        # Layers 2/3: int8 weights -> bf16 on the VPU; per-output-channel scale folded
        # in AFTER the dot (mathematically identical to scaling the weight columns).
        h = jnp.dot(h, w2_ref[n].astype(jnp.bfloat16),
                    preferred_element_type=jnp.float32) * s2_ref[n] + b2_ref[n]
        h = jnp.maximum(h, 0.0).astype(jnp.bfloat16)
        h = jnp.dot(h, w3_ref[n].astype(jnp.bfloat16),
                    preferred_element_type=jnp.float32) * s3_ref[n] + b3_ref[n]
        h = jnp.maximum(h, 0.0).astype(jnp.bfloat16)
        # Layer 4 (bf16 weights) -> raw (TB, 2*S) output slab.
        o = jnp.dot(h, w4_ref[n], preferred_element_type=jnp.float32) + b4_ref[n]

        # Logvar soft-clamp on the full 2*S-wide slab; mean columns masked back to raw
        # (the padded bounds carry zeros there), matching PENN.get_output exactly.
        lv = max_lv - _softplus(max_lv - o)
        lv = min_lv + _softplus(lv - min_lv)
        out_ref[n] = jnp.where(col >= state_dim, lv, o)


def penn_forward(x, params, max_logvar, min_logvar, *, batch_tile=256):
    """x: (B, state_dim+action_dim) f32.  Returns stacked (mean, logvar),
    each of shape (num_nets, B, state_dim), in f32."""
    w1, b1 = params["w1"], params["b1"]
    w2q, s2, b2 = params["w2q"], params["s2"], params["b2"]
    w3q, s3, b3 = params["w3q"], params["s3"], params["b3"]
    w4, b4 = params["w4"], params["b4"]

    num_nets, D_in, _ = w1.shape
    S = max_logvar.shape[-1]
    B = x.shape[0]

    # Batch tiling: weights are fetched once and reused while all tiles are swept.
    TB = batch_tile if B >= batch_tile else _round_up(B, 8)
    B_pad = _round_up(B, TB)
    if B_pad != B:
        x = jnp.pad(x, ((0, B_pad - B), (0, 0)))
    num_tiles = B_pad // TB

    # Pad logvar bounds to the full 2*S lane width (mean columns zero, masked in-kernel).
    zeros = jnp.zeros((1, S), jnp.float32)
    maxlv2 = jnp.concatenate([zeros, max_logvar.astype(jnp.float32)], axis=-1)   # (1, 2*S)
    minlv2 = jnp.concatenate([zeros, min_logvar.astype(jnp.float32)], axis=-1)   # (1, 2*S)

    def resident(arr):
        # Whole-array block with a constant index map: DMA'd once, then reused by
        # every grid step (no re-fetch when the block index does not change).
        nd = arr.ndim
        return pl.BlockSpec(arr.shape, lambda b: (0,) * nd)

    in_specs = [
        pl.BlockSpec((TB, x.shape[1]), lambda b: (b, 0)),      # x: streamed per batch tile
        resident(w1), resident(b1),
        resident(w2q), resident(s2), resident(b2),
        resident(w3q), resident(s3), resident(b3),
        resident(w4), resident(b4),
        resident(maxlv2), resident(minlv2),
    ]
    out_specs = pl.BlockSpec((num_nets, TB, 2 * S), lambda b: (0, b, 0))

    out = pl.pallas_call(
        functools.partial(penn_kernel, num_nets=num_nets, state_dim=S),
        out_shape=jax.ShapeDtypeStruct((num_nets, B_pad, 2 * S), jnp.float32),
        grid=(num_tiles,),
        in_specs=in_specs,
        out_specs=out_specs,
        compiler_params=pltpu.CompilerParams(
            # Batch tiles are independent.  (On v7x, CORE_PARALLEL / pl.core_map over the
            # 2-TC mesh is the lever once num_tiles > 1; plain "parallel" is harmless.)
            dimension_semantics=("parallel",),
        ),
    )(x, w1, b1, w2q, s2, b2, w3q, s3, b3, w4, b4, maxlv2, minlv2)

    mean = out[:, :B, :S]
    logvar = out[:, :B, S:]
    return mean, logvar


def init_params(key, num_nets, state_dim, action_dim):
    """Deterministic synthetic init (uniform, PyTorch-Linear-style fan-in scaling).

    Layers 2/3 (400x400, ~98% of weight bytes) are stored int8 with per-output-channel
    f32 scales; layers 1/4 stay bf16; biases stay f32."""
    D_in = state_dim + action_dim
    sizes = [(D_in, HIDDEN1_UNITS), (HIDDEN1_UNITS, HIDDEN2_UNITS),
             (HIDDEN2_UNITS, HIDDEN3_UNITS), (HIDDEN3_UNITS, 2 * state_dim)]
    raw = []
    for fan_in, fan_out in sizes:
        key, kw, kb = jax.random.split(key, 3)
        bound = 1.0 / np.sqrt(fan_in)
        w = jax.random.uniform(kw, (num_nets, fan_in, fan_out), jnp.float32, -bound, bound)
        b = jax.random.uniform(kb, (num_nets, 1, fan_out), jnp.float32, -bound, bound)
        raw.append((w, b))

    def quant(w):
        # Symmetric per-(net, output-channel) int8 quantization.
        amax = jnp.max(jnp.abs(w), axis=1, keepdims=True)              # (N, 1, out)
        scale = jnp.maximum(amax, 1e-12) / 127.0
        wq = jnp.clip(jnp.round(w / scale), -127.0, 127.0).astype(jnp.int8)
        return wq, scale

    (w1, b1), (w2, b2), (w3, b3), (w4, b4) = raw
    w2q, s2 = quant(w2)
    w3q, s3 = quant(w3)
    return {
        "w1": w1.astype(jnp.bfloat16), "b1": b1,
        "w2q": w2q, "s2": s2, "b2": b2,
        "w3q": w3q, "s3": s3, "b3": b3,
        "w4": w4.astype(jnp.bfloat16), "b4": b4,
    }


def penn_reference(x, params, max_logvar, min_logvar):
    """Plain-JAX f32 reference matching the PyTorch module semantics, using the same
    quantized weights (so the only kernel-vs-reference delta is bf16 activations)."""
    num_nets = params["w1"].shape[0]
    S = max_logvar.shape[-1]
    means, logvars = [], []
    for n in range(num_nets):
        w1 = params["w1"][n].astype(jnp.float32)
        w2 = params["w2q"][n].astype(jnp.float32) * params["s2"][n]
        w3 = params["w3q"][n].astype(jnp.float32) * params["s3"][n]
        w4 = params["w4"][n].astype(jnp.float32)
        h = jnp.maximum(x @ w1 + params["b1"][n], 0.0)
        h = jnp.maximum(h @ w2 + params["b2"][n], 0.0)
        h = jnp.maximum(h @ w3 + params["b3"][n], 0.0)
        o = h @ w4 + params["b4"][n]
        mean, raw_v = o[:, :S], o[:, S:]
        lv = max_logvar - jax.nn.softplus(max_logvar - raw_v)
        lv = min_logvar + jax.nn.softplus(lv - min_logvar)
        means.append(mean)
        logvars.append(lv)
    return jnp.stack(means), jnp.stack(logvars)


if __name__ == "__main__":
    # TODO(synk): training utilities (Adam step, GaussianNLLLoss) from the module are
    # out of scope for this forward-pass kernel.
    num_nets = 3
    state_dim = 4
    action_dim = 4
    batch = 8

    key = jax.random.PRNGKey(0)
    kx, kp = jax.random.split(key)
    x = jax.random.normal(kx, (batch, state_dim + action_dim), jnp.float32)
    params = init_params(kp, num_nets, state_dim, action_dim)

    max_logvar = jnp.full((1, state_dim), -3.0, jnp.float32)
    min_logvar = jnp.full((1, state_dim), -7.0, jnp.float32)

    mean, logvar = penn_forward(x, params, max_logvar, min_logvar)
    jax.block_until_ready((mean, logvar))

    mean_ref, logvar_ref = penn_reference(x, params, max_logvar, min_logvar)
    # bf16 activations in the kernel vs f32 reference -> loose tolerance.
    np.testing.assert_allclose(np.asarray(mean), np.asarray(mean_ref), rtol=3e-2, atol=3e-2)
    np.testing.assert_allclose(np.asarray(logvar), np.asarray(logvar_ref), rtol=3e-2, atol=3e-2)

    print("KERNEL_OK")
</pallas_src>

<mosaic_0001>
module attributes {stable_mosaic.version = 11 : i64} {
  func.func @penn_kernel(%arg0: i32, %arg1: memref<8x8xf32, #tpu.memory_space<vmem>>, %arg2: memref<3x8x400xbf16, #tpu.memory_space<vmem>>, %arg3: memref<3x1x400xf32, #tpu.memory_space<vmem>>, %arg4: memref<3x400x400xi8, #tpu.memory_space<vmem>>, %arg5: memref<3x1x400xf32, #tpu.memory_space<vmem>>, %arg6: memref<3x1x400xf32, #tpu.memory_space<vmem>>, %arg7: memref<3x400x400xi8, #tpu.memory_space<vmem>>, %arg8: memref<3x1x400xf32, #tpu.memory_space<vmem>>, %arg9: memref<3x1x400xf32, #tpu.memory_space<vmem>>, %arg10: memref<3x400x8xbf16, #tpu.memory_space<vmem>>, %arg11: memref<3x1x8xf32, #tpu.memory_space<vmem>>, %arg12: memref<1x8xf32, #tpu.memory_space<vmem>>, %arg13: memref<1x8xf32, #tpu.memory_space<vmem>>, %arg14: memref<3x8x8xf32, #tpu.memory_space<vmem>>) attributes {dimension_semantics = [#tpu.dimension_semantics<parallel>], iteration_bounds = array<i64: 1>, scalar_prefetch = 0 : i64, scratch_operands = 0 : i64, tpu.core_type = #tpu.core_type<tc>, window_params = [{transform_indices = @transform_0, window_bounds = array<i64: 8, 8>}, {pipeline_mode = #tpu.pipeline_mode<synchronous>, transform_indices = @transform_1, window_bounds = array<i64: 3, 8, 400>}, {pipeline_mode = #tpu.pipeline_mode<synchronous>, transform_indices = @transform_2, window_bounds = array<i64: 3, 1, 400>}, {pipeline_mode = #tpu.pipeline_mode<synchronous>, transform_indices = @transform_3, window_bounds = array<i64: 3, 400, 400>}, {pipeline_mode = #tpu.pipeline_mode<synchronous>, transform_indices = @transform_4, window_bounds = array<i64: 3, 1, 400>}, {pipeline_mode = #tpu.pipeline_mode<synchronous>, transform_indices = @transform_5, window_bounds = array<i64: 3, 1, 400>}, {pipeline_mode = #tpu.pipeline_mode<synchronous>, transform_indices = @transform_6, window_bounds = array<i64: 3, 400, 400>}, {pipeline_mode = #tpu.pipeline_mode<synchronous>, transform_indices = @transform_7, window_bounds = array<i64: 3, 1, 400>}, {pipeline_mode = #tpu.pipeline_mode<synchronous>, transform_indices = @transform_8, window_bounds = array<i64: 3, 1, 400>}, {pipeline_mode = #tpu.pipeline_mode<synchronous>, transform_indices = @transform_9, window_bounds = array<i64: 3, 400, 8>}, {pipeline_mode = #tpu.pipeline_mode<synchronous>, transform_indices = @transform_10, window_bounds = array<i64: 3, 1, 8>}, {pipeline_mode = #tpu.pipeline_mode<synchronous>, transform_indices = @transform_11, window_bounds = array<i64: 1, 8>}, {pipeline_mode = #tpu.pipeline_mode<synchronous>, transform_indices = @transform_12, window_bounds = array<i64: 1, 8>}, {transform_indices = @transform_13, window_bounds = array<i64: 3, 8, 8>}]} {
    %c0 = arith.constant 0 : index
    %c0_0 = arith.constant 0 : index
    %0 = vector.load %arg1[%c0, %c0_0] : memref<8x8xf32, #tpu.memory_space<vmem>>, vector<8x8xf32>
    %1 = arith.truncf %0 : vector<8x8xf32> to vector<8x8xbf16>
    %c0_1 = arith.constant 0 : index
    %c0_2 = arith.constant 0 : index
    %2 = vector.load %arg12[%c0_1, %c0_2] : memref<1x8xf32, #tpu.memory_space<vmem>>, vector<1x8xf32>
    %c0_3 = arith.constant 0 : index
    %c0_4 = arith.constant 0 : index
    %3 = vector.load %arg13[%c0_3, %c0_4] : memref<1x8xf32, #tpu.memory_space<vmem>>, vector<1x8xf32>
    %4 = tpu.iota {dimensions = array<i32: 1>} : vector<8x8xi32>
    %c0_5 = arith.constant 0 : index
    %c0_6 = arith.constant 0 : index
    %c0_7 = arith.constant 0 : index
    %5 = vector.load %arg2[%c0_5, %c0_6, %c0_7] : memref<3x8x400xbf16, #tpu.memory_space<vmem>>, vector<1x8x400xbf16>
    %6 = vector.shape_cast %5 : vector<1x8x400xbf16> to vector<8x400xbf16>
    %cst = arith.constant dense<0.000000e+00> : vector<8x400xf32>
    %7 = tpu.matmul %1, %6, %cst {dimension_numbers = #tpu.dot_dimension_numbers<[1], [0], [0], [1], [0, 0, 1, 1], [], []>} : vector<8x8xbf16>, vector<8x400xbf16>, vector<8x400xf32> -> vector<8x400xf32>
    %c0_8 = arith.constant 0 : index
    %c0_9 = arith.constant 0 : index
    %c0_10 = arith.constant 0 : index
    %8 = vector.load %arg3[%c0_8, %c0_9, %c0_10] : memref<3x1x400xf32, #tpu.memory_space<vmem>>, vector<1x1x400xf32>
    %9 = vector.shape_cast %8 : vector<1x1x400xf32> to vector<1x400xf32>
    %10 = vector.broadcast %9 : vector<1x400xf32> to vector<8x400xf32>
    %11 = arith.addf %7, %10 : vector<8x400xf32>
    %cst_11 = arith.constant 0.000000e+00 : f32
    %12 = vector.broadcast %cst_11 : f32 to vector<8x400xf32>
    %13 = arith.maximumf %11, %12 : vector<8x400xf32>
    %14 = arith.truncf %13 : vector<8x400xf32> to vector<8x400xbf16>
    %c0_12 = arith.constant 0 : index
    %c0_13 = arith.constant 0 : index
    %c0_14 = arith.constant 0 : index
    %15 = vector.load %arg4[%c0_12, %c0_13, %c0_14] : memref<3x400x400xi8, #tpu.memory_space<vmem>>, vector<1x400x400xi8>
    %16 = vector.shape_cast %15 : vector<1x400x400xi8> to vector<400x400xi8>
    %17 = arith.sitofp %16 : vector<400x400xi8> to vector<400x400xbf16>
    %cst_15 = arith.constant dense<0.000000e+00> : vector<8x400xf32>
    %18 = tpu.matmul %14, %17, %cst_15 {dimension_numbers = #tpu.dot_dimension_numbers<[1], [0], [0], [1], [0, 0, 1, 1], [], []>} : vector<8x400xbf16>, vector<400x400xbf16>, vector<8x400xf32> -> vector<8x400xf32>
    %c0_16 = arith.constant 0 : index
    %c0_17 = arith.constant 0 : index
    %c0_18 = arith.constant 0 : index
    %19 = vector.load %arg5[%c0_16, %c0_17, %c0_18] : memref<3x1x400xf32, #tpu.memory_space<vmem>>, vector<1x1x400xf32>
    %20 = vector.shape_cast %19 : vector<1x1x400xf32> to vector<1x400xf32>
    %21 = vector.broadcast %20 : vector<1x400xf32> to vector<8x400xf32>
    %22 = arith.mulf %18, %21 : vector<8x400xf32>
    %c0_19 = arith.constant 0 : index
    %c0_20 = arith.constant 0 : index
    %c0_21 = arith.constant 0 : index
    %23 = vector.load %arg6[%c0_19, %c0_20, %c0_21] : memref<3x1x400xf32, #tpu.memory_space<vmem>>, vector<1x1x400xf32>
    %24 = vector.shape_cast %23 : vector<1x1x400xf32> to vector<1x400xf32>
    %25 = vector.broadcast %24 : vector<1x400xf32> to vector<8x400xf32>
    %26 = arith.addf %22, %25 : vector<8x400xf32>
    %cst_22 = arith.constant 0.000000e+00 : f32
    %27 = vector.broadcast %cst_22 : f32 to vector<8x400xf32>
    %28 = arith.maximumf %26, %27 : vector<8x400xf32>
    %29 = arith.truncf %28 : vector<8x400xf32> to vector<8x400xbf16>
    %c0_23 = arith.constant 0 : index
    %c0_24 = arith.constant 0 : index
    %c0_25 = arith.constant 0 : index
    %30 = vector.load %arg7[%c0_23, %c0_24, %c0_25] : memref<3x400x400xi8, #tpu.memory_space<vmem>>, vector<1x400x400xi8>
    %31 = vector.shape_cast %30 : vector<1x400x400xi8> to vector<400x400xi8>
    %32 = arith.sitofp %31 : vector<400x400xi8> to vector<400x400xbf16>
    %cst_26 = arith.constant dense<0.000000e+00> : vector<8x400xf32>
    %33 = tpu.matmul %29, %32, %cst_26 {dimension_numbers = #tpu.dot_dimension_numbers<[1], [0], [0], [1], [0, 0, 1, 1], [], []>} : vector<8x400xbf16>, vector<400x400xbf16>, vector<8x400xf32> -> vector<8x400xf32>
    %c0_27 = arith.constant 0 : index
    %c0_28 = arith.constant 0 : index
    %c0_29 = arith.constant 0 : index
    %34 = vector.load %arg8[%c0_27, %c0_28, %c0_29] : memref<3x1x400xf32, #tpu.memory_space<vmem>>, vector<1x1x400xf32>
    %35 = vector.shape_cast %34 : vector<1x1x400xf32> to vector<1x400xf32>
    %36 = vector.broadcast %35 : vector<1x400xf32> to vector<8x400xf32>
    %37 = arith.mulf %33, %36 : vector<8x400xf32>
    %c0_30 = arith.constant 0 : index
    %c0_31 = arith.constant 0 : index
    %c0_32 = arith.constant 0 : index
    %38 = vector.load %arg9[%c0_30, %c0_31, %c0_32] : memref<3x1x400xf32, #tpu.memory_space<vmem>>, vector<1x1x400xf32>
    %39 = vector.shape_cast %38 : vector<1x1x400xf32> to vector<1x400xf32>
    %40 = vector.broadcast %39 : vector<1x400xf32> to vector<8x400xf32>
    %41 = arith.addf %37, %40 : vector<8x400xf32>
    %cst_33 = arith.constant 0.000000e+00 : f32
    %42 = vector.broadcast %cst_33 : f32 to vector<8x400xf32>
    %43 = arith.maximumf %41, %42 : vector<8x400xf32>
    %44 = arith.truncf %43 : vector<8x400xf32> to vector<8x400xbf16>
    %c0_34 = arith.constant 0 : index
    %c0_35 = arith.constant 0 : index
    %c0_36 = arith.constant 0 : index
    %45 = vector.load %arg10[%c0_34, %c0_35, %c0_36] : memref<3x400x8xbf16, #tpu.memory_space<vmem>>, vector<1x400x8xbf16>
    %46 = vector.shape_cast %45 : vector<1x400x8xbf16> to vector<400x8xbf16>
    %cst_37 = arith.constant dense<0.000000e+00> : vector<8x8xf32>
    %47 = tpu.matmul %44, %46, %cst_37 {dimension_numbers = #tpu.dot_dimension_numbers<[1], [0], [0], [1], [0, 0, 1, 1], [], []>} : vector<8x400xbf16>, vector<400x8xbf16>, vector<8x8xf32> -> vector<8x8xf32>
    %c0_38 = arith.constant 0 : index
    %c0_39 = arith.constant 0 : index
    %c0_40 = arith.constant 0 : index
    %48 = vector.load %arg11[%c0_38, %c0_39, %c0_40] : memref<3x1x8xf32, #tpu.memory_space<vmem>>, vector<1x1x8xf32>
    %49 = vector.shape_cast %48 : vector<1x1x8xf32> to vector<1x8xf32>
    %50 = vector.broadcast %49 : vector<1x8xf32> to vector<8x8xf32>
    %51 = arith.addf %47, %50 : vector<8x8xf32>
    %52 = vector.broadcast %2 : vector<1x8xf32> to vector<8x8xf32>
    %53 = arith.subf %52, %51 : vector<8x8xf32>
    %cst_41 = arith.constant 2.000000e+01 : f32
    %54 = vector.broadcast %cst_41 : f32 to vector<8x8xf32>
    %55 = arith.cmpf ogt, %53, %54 : vector<8x8xf32>
    %cst_42 = arith.constant 2.000000e+01 : f32
    %56 = vector.broadcast %cst_42 : f32 to vector<8x8xf32>
    %57 = arith.minimumf %53, %56 : vector<8x8xf32>
    %58 = math.exp %57 : vector<8x8xf32>
    %59 = math.log1p %58 : vector<8x8xf32>
    %60 = arith.select %55, %53, %59 : vector<8x8xi1>, vector<8x8xf32>
    %61 = vector.broadcast %2 : vector<1x8xf32> to vector<8x8xf32>
    %62 = arith.subf %61, %60 : vector<8x8xf32>
    %63 = vector.broadcast %3 : vector<1x8xf32> to vector<8x8xf32>
    %64 = arith.subf %62, %63 : vector<8x8xf32>
    %cst_43 = arith.constant 2.000000e+01 : f32
    %65 = vector.broadcast %cst_43 : f32 to vector<8x8xf32>
    %66 = arith.cmpf ogt, %64, %65 : vector<8x8xf32>
    %cst_44 = arith.constant 2.000000e+01 : f32
    %67 = vector.broadcast %cst_44 : f32 to vector<8x8xf32>
    %68 = arith.minimumf %64, %67 : vector<8x8xf32>
    %69 = math.exp %68 : vector<8x8xf32>
    %70 = math.log1p %69 : vector<8x8xf32>
    %71 = arith.select %66, %64, %70 : vector<8x8xi1>, vector<8x8xf32>
    %72 = vector.broadcast %3 : vector<1x8xf32> to vector<8x8xf32>
    %73 = arith.addf %72, %71 : vector<8x8xf32>
    %c4_i32 = arith.constant 4 : i32
    %74 = vector.broadcast %c4_i32 : i32 to vector<8x8xi32>
    %75 = arith.cmpi sge, %4, %74 : vector<8x8xi32>
    %76 = arith.select %75, %73, %51 : vector<8x8xi1>, vector<8x8xf32>
    %c0_45 = arith.constant 0 : index
    %c0_46 = arith.constant 0 : index
    %c0_47 = arith.constant 0 : index
    %77 = vector.load %arg14[%c0_45, %c0_46, %c0_47] : memref<3x8x8xf32, #tpu.memory_space<vmem>>, vector<1x8x8xf32>
    %78 = vector.shape_cast %77 : vector<1x8x8xf32> to vector<8x8xf32>
    %79 = vector.shape_cast %76 : vector<8x8xf32> to vector<1x8x8xf32>
    tpu.vector_store %arg14[%c0_45, %c0_46, %c0_47], %79 {strides = array<i32>} : memref<3x8x8xf32, #tpu.memory_space<vmem>>, vector<1x8x8xf32>,
    %c1 = arith.constant 1 : index
    %c0_48 = arith.constant 0 : index
    %c0_49 = arith.constant 0 : index
    %80 = vector.load %arg2[%c1, %c0_48, %c0_49] : memref<3x8x400xbf16, #tpu.memory_space<vmem>>, vector<1x8x400xbf16>
    %81 = vector.shape_cast %80 : vector<1x8x400xbf16> to vector<8x400xbf16>
    %cst_50 = arith.constant dense<0.000000e+00> : vector<8x400xf32>
    %82 = tpu.matmul %1, %81, %cst_50 {dimension_numbers = #tpu.dot_dimension_numbers<[1], [0], [0], [1], [0, 0, 1, 1], [], []>} : vector<8x8xbf16>, vector<8x400xbf16>, vector<8x400xf32> -> vector<8x400xf32>
    %c1_51 = arith.constant 1 : index
    %c0_52 = arith.constant 0 : index
    %c0_53 = arith.constant 0 : index
    %83 = vector.load %arg3[%c1_51, %c0_52, %c0_53] : memref<3x1x400xf32, #tpu.memory_space<vmem>>, vector<1x1x400xf32>
    %84 = vector.shape_cast %83 : vector<1x1x400xf32> to vector<1x400xf32>
    %85 = vector.broadcast %84 : vector<1x400xf32> to vector<8x400xf32>
    %86 = arith.addf %82, %85 : vector<8x400xf32>
    %cst_54 = arith.constant 0.000000e+00 : f32
    %87 = vector.broadcast %cst_54 : f32 to vector<8x400xf32>
    %88 = arith.maximumf %86, %87 : vector<8x400xf32>
    %89 = arith.truncf %88 : vector<8x400xf32> to vector<8x400xbf16>
    %c1_55 = arith.constant 1 : index
    %c0_56 = arith.constant 0 : index
    %c0_57 = arith.constant 0 : index
    %90 = vector.load %arg4[%c1_55, %c0_56, %c0_57] : memref<3x400x400xi8, #tpu.memory_space<vmem>>, vector<1x400x400xi8>
    %91 = vector.shape_cast %90 : vector<1x400x400xi8> to vector<400x400xi8>
    %92 = arith.sitofp %91 : vector<400x400xi8> to vector<400x400xbf16>
    %cst_58 = arith.constant dense<0.000000e+00> : vector<8x400xf32>
    %93 = tpu.matmul %89, %92, %cst_58 {dimension_numbers = #tpu.dot_dimension_numbers<[1], [0], [0], [1], [0, 0, 1, 1], [], []>} : vector<8x400xbf16>, vector<400x400xbf16>, vector<8x400xf32> -> vector<8x400xf32>
    %c1_59 = arith.constant 1 : index
    %c0_60 = arith.constant 0 : index
    %c0_61 = arith.constant 0 : index
    %94 = vector.load %arg5[%c1_59, %c0_60, %c0_61] : memref<3x1x400xf32, #tpu.memory_space<vmem>>, vector<1x1x400xf32>
    %95 = vector.shape_cast %94 : vector<1x1x400xf32> to vector<1x400xf32>
    %96 = vector.broadcast %95 : vector<1x400xf32> to vector<8x400xf32>
    %97 = arith.mulf %93, %96 : vector<8x400xf32>
    %c1_62 = arith.constant 1 : index
    %c0_63 = arith.constant 0 : index
    %c0_64 = arith.constant 0 : index
    %98 = vector.load %arg6[%c1_62, %c0_63, %c0_64] : memref<3x1x400xf32, #tpu.memory_space<vmem>>, vector<1x1x400xf32>
    %99 = vector.shape_cast %98 : vector<1x1x400xf32> to vector<1x400xf32>
    %100 = vector.broadcast %99 : vector<1x400xf32> to vector<8x400xf32>
    %101 = arith.addf %97, %100 : vector<8x400xf32>
    %cst_65 = arith.constant 0.000000e+00 : f32
    %102 = vector.broadcast %cst_65 : f32 to vector<8x400xf32>
    %103 = arith.maximumf %101, %102 : vector<8x400xf32>
    %104 = arith.truncf %103 : vector<8x400xf32> to vector<8x400xbf16>
    %c1_66 = arith.constant 1 : index
    %c0_67 = arith.constant 0 : index
    %c0_68 = arith.constant 0 : index
    %105 = vector.load %arg7[%c1_66, %c0_67, %c0_68] : memref<3x400x400xi8, #tpu.memory_space<vmem>>, vector<1x400x400xi8>
    %106 = vector.shape_cast %105 : vector<1x400x400xi8> to vector<400x400xi8>
    %107 = arith.sitofp %106 : vector<400x400xi8> to vector<400x400xbf16>
    %cst_69 = arith.constant dense<0.000000e+00> : vector<8x400xf32>
    %108 = tpu.matmul %104, %107, %cst_69 {dimension_numbers = #tpu.dot_dimension_numbers<[1], [0], [0], [1], [0, 0, 1, 1], [], []>} : vector<8x400xbf16>, vector<400x400xbf16>, vector<8x400xf32> -> vector<8x400xf32>
    %c1_70 = arith.constant 1 : index
    %c0_71 = arith.constant 0 : index
    %c0_72 = arith.constant 0 : index
    %109 = vector.load %arg8[%c1_70, %c0_71, %c0_72] : memref<3x1x400xf32, #tpu.memory_space<vmem>>, vector<1x1x400xf32>
    %110 = vector.shape_cast %109 : vector<1x1x400xf32> to vector<1x400xf32>
    %111 = vector.broadcast %110 : vector<1x400xf32> to vector<8x400xf32>
    %112 = arith.mulf %108, %111 : vector<8x400xf32>
    %c1_73 = arith.constant 1 : index
    %c0_74 = arith.constant 0 : index
    %c0_75 = arith.constant 0 : index
    %113 = vector.load %arg9[%c1_73, %c0_74, %c0_75] : memref<3x1x400xf32, #tpu.memory_space<vmem>>, vector<1x1x400xf32>
    %114 = vector.shape_cast %113 : vector<1x1x400xf32> to vector<1x400xf32>
    %115 = vector.broadcast %114 : vector<1x400xf32> to vector<8x400xf32>
    %116 = arith.addf %112, %115 : vector<8x400xf32>
    %cst_76 = arith.constant 0.000000e+00 : f32
    %117 = vector.broadcast %cst_76 : f32 to vector<8x400xf32>
    %118 = arith.maximumf %116, %117 : vector<8x400xf32>
    %119 = arith.truncf %118 : vector<8x400xf32> to vector<8x400xbf16>
    %c1_77 = arith.constant 1 : index
    %c0_78 = arith.constant 0 : index
    %c0_79 = arith.constant 0 : index
    %120 = vector.load %arg10[%c1_77, %c0_78, %c0_79] : memref<3x400x8xbf16, #tpu.memory_space<vmem>>, vector<1x400x8xbf16>
    %121 = vector.shape_cast %120 : vector<1x400x8xbf16> to vector<400x8xbf16>
    %cst_80 = arith.constant dense<0.000000e+00> : vector<8x8xf32>
    %122 = tpu.matmul %119, %121, %cst_80 {dimension_numbers = #tpu.dot_dimension_numbers<[1], [0], [0], [1], [0, 0, 1, 1], [], []>} : vector<8x400xbf16>, vector<400x8xbf16>, vector<8x8xf32> -> vector<8x8xf32>
    %c1_81 = arith.constant 1 : index
    %c0_82 = arith.constant 0 : index
    %c0_83 = arith.constant 0 : index
    %123 = vector.load %arg11[%c1_81, %c0_82, %c0_83] : memref<3x1x8xf32, #tpu.memory_space<vmem>>, vector<1x1x8xf32>
    %124 = vector.shape_cast %123 : vector<1x1x8xf32> to vector<1x8xf32>
    %125 = vector.broadcast %124 : vector<1x8xf32> to vector<8x8xf32>
    %126 = arith.addf %122, %125 : vector<8x8xf32>
    %127 = vector.broadcast %2 : vector<1x8xf32> to vector<8x8xf32>
    %128 = arith.subf %127, %126 : vector<8x8xf32>
    %cst_84 = arith.constant 2.000000e+01 : f32
    %129 = vector.broadcast %cst_84 : f32 to vector<8x8xf32>
    %130 = arith.cmpf ogt, %128, %129 : vector<8x8xf32>
    %cst_85 = arith.constant 2.000000e+01 : f32
    %131 = vector.broadcast %cst_85 : f32 to vector<8x8xf32>
    %132 = arith.minimumf %128, %131 : vector<8x8xf32>
    %133 = math.exp %132 : vector<8x8xf32>
    %134 = math.log1p %133 : vector<8x8xf32>
    %135 = arith.select %130, %128, %134 : vector<8x8xi1>, vector<8x8xf32>
    %136 = vector.broadcast %2 : vector<1x8xf32> to vector<8x8xf32>
    %137 = arith.subf %136, %135 : vector<8x8xf32>
    %138 = vector.broadcast %3 : vector<1x8xf32> to vector<8x8xf32>
    %139 = arith.subf %137, %138 : vector<8x8xf32>
    %cst_86 = arith.constant 2.000000e+01 : f32
    %140 = vector.broadcast %cst_86 : f32 to vector<8x8xf32>
    %141 = arith.cmpf ogt, %139, %140 : vector<8x8xf32>
    %cst_87 = arith.constant 2.000000e+01 : f32
    %142 = vector.broadcast %cst_87 : f32 to vector<8x8xf32>
    %143 = arith.minimumf %139, %142 : vector<8x8xf32>
    %144 = math.exp %143 : vector<8x8xf32>
    %145 = math.log1p %144 : vector<8x8xf32>
    %146 = arith.select %141, %139, %145 : vector<8x8xi1>, vector<8x8xf32>
    %147 = vector.broadcast %3 : vector<1x8xf32> to vector<8x8xf32>
    %148 = arith.addf %147, %146 : vector<8x8xf32>
    %c4_i32_88 = arith.constant 4 : i32
    %149 = vector.broadcast %c4_i32_88 : i32 to vector<8x8xi32>
    %150 = arith.cmpi sge, %4, %149 : vector<8x8xi32>
    %151 = arith.select %150, %148, %126 : vector<8x8xi1>, vector<8x8xf32>
    %c1_89 = arith.constant 1 : index
    %c0_90 = arith.constant 0 : index
    %c0_91 = arith.constant 0 : index
    %152 = vector.load %arg14[%c1_89, %c0_90, %c0_91] : memref<3x8x8xf32, #tpu.memory_space<vmem>>, vector<1x8x8xf32>
    %153 = vector.shape_cast %152 : vector<1x8x8xf32> to vector<8x8xf32>
    %154 = vector.shape_cast %151 : vector<8x8xf32> to vector<1x8x8xf32>
    tpu.vector_store %arg14[%c1_89, %c0_90, %c0_91], %154 {strides = array<i32>} : memref<3x8x8xf32, #tpu.memory_space<vmem>>, vector<1x8x8xf32>,
    %c2 = arith.constant 2 : index
    %c0_92 = arith.constant 0 : index
    %c0_93 = arith.constant 0 : index
    %155 = vector.load %arg2[%c2, %c0_92, %c0_93] : memref<3x8x400xbf16, #tpu.memory_space<vmem>>, vector<1x8x400xbf16>
    %156 = vector.shape_cast %155 : vector<1x8x400xbf16> to vector<8x400xbf16>
    %cst_94 = arith.constant dense<0.000000e+00> : vector<8x400xf32>
    %157 = tpu.matmul %1, %156, %cst_94 {dimension_numbers = #tpu.dot_dimension_numbers<[1], [0], [0], [1], [0, 0, 1, 1], [], []>} : vector<8x8xbf16>, vector<8x400xbf16>, vector<8x400xf32> -> vector<8x400xf32>
    %c2_95 = arith.constant 2 : index
    %c0_96 = arith.constant 0 : index
    %c0_97 = arith.constant 0 : index
    %158 = vector.load %arg3[%c2_95, %c0_96, %c0_97] : memref<3x1x400xf32, #tpu.memory_space<vmem>>, vector<1x1x400xf32>
    %159 = vector.shape_cast %158 : vector<1x1x400xf32> to vector<1x400xf32>
    %160 = vector.broadcast %159 : vector<1x400xf32> to vector<8x400xf32>
    %161 = arith.addf %157, %160 : vector<8x400xf32>
    %cst_98 = arith.constant 0.000000e+00 : f32
    %162 = vector.broadcast %cst_98 : f32 to vector<8x400xf32>
    %163 = arith.maximumf %161, %162 : vector<8x400xf32>
    %164 = arith.truncf %163 : vector<8x400xf32> to vector<8x400xbf16>
    %c2_99 = arith.constant 2 : index
    %c0_100 = arith.constant 0 : index
    %c0_101 = arith.constant 0 : index
    %165 = vector.load %arg4[%c2_99, %c0_100, %c0_101] : memref<3x400x400xi8, #tpu.memory_space<vmem>>, vector<1x400x400xi8>
    %166 = vector.shape_cast %165 : vector<1x400x400xi8> to vector<400x400xi8>
    %167 = arith.sitofp %166 : vector<400x400xi8> to vector<400x400xbf16>
    %cst_102 = arith.constant dense<0.000000e+00> : vector<8x400xf32>
    %168 = tpu.matmul %164, %167, %cst_102 {dimension_numbers = #tpu.dot_dimension_numbers<[1], [0], [0], [1], [0, 0, 1, 1], [], []>} : vector<8x400xbf16>, vector<400x400xbf16>, vector<8x400xf32> -> vector<8x400xf32>
    %c2_103 = arith.constant 2 : index
    %c0_104 = arith.constant 0 : index
    %c0_105 = arith.constant 0 : index
    %169 = vector.load %arg5[%c2_103, %c0_104, %c0_105] : memref<3x1x400xf32, #tpu.memory_space<vmem>>, vector<1x1x400xf32>
    %170 = vector.shape_cast %169 : vector<1x1x400xf32> to vector<1x400xf32>
    %171 = vector.broadcast %170 : vector<1x400xf32> to vector<8x400xf32>
    %172 = arith.mulf %168, %171 : vector<8x400xf32>
    %c2_106 = arith.constant 2 : index
    %c0_107 = arith.constant 0 : index
    %c0_108 = arith.constant 0 : index
    %173 = vector.load %arg6[%c2_106, %c0_107, %c0_108] : memref<3x1x400xf32, #tpu.memory_space<vmem>>, vector<1x1x400xf32>
    %174 = vector.shape_cast %173 : vector<1x1x400xf32> to vector<1x400xf32>
    %175 = vector.broadcast %174 : vector<1x400xf32> to vector<8x400xf32>
    %176 = arith.addf %172, %175 : vector<8x400xf32>
    %cst_109 = arith.constant 0.000000e+00 : f32
    %177 = vector.broadcast %cst_109 : f32 to vector<8x400xf32>
    %178 = arith.maximumf %176, %177 : vector<8x400xf32>
    %179 = arith.truncf %178 : vector<8x400xf32> to vector<8x400xbf16>
    %c2_110 = arith.constant 2 : index
    %c0_111 = arith.constant 0 : index
    %c0_112 = arith.constant 0 : index
    %180 = vector.load %arg7[%c2_110, %c0_111, %c0_112] : memref<3x400x400xi8, #tpu.memory_space<vmem>>, vector<1x400x400xi8>
    %181 = vector.shape_cast %180 : vector<1x400x400xi8> to vector<400x400xi8>
    %182 = arith.sitofp %181 : vector<400x400xi8> to vector<400x400xbf16>
    %cst_113 = arith.constant dense<0.000000e+00> : vector<8x400xf32>
    %183 = tpu.matmul %179, %182, %cst_113 {dimension_numbers = #tpu.dot_dimension_numbers<[1], [0], [0], [1], [0, 0, 1, 1], [], []>} : vector<8x400xbf16>, vector<400x400xbf16>, vector<8x400xf32> -> vector<8x400xf32>
    %c2_114 = arith.constant 2 : index
    %c0_115 = arith.constant 0 : index
    %c0_116 = arith.constant 0 : index
    %184 = vector.load %arg8[%c2_114, %c0_115, %c0_116] : memref<3x1x400xf32, #tpu.memory_space<vmem>>, vector<1x1x400xf32>
    %185 = vector.shape_cast %184 : vector<1x1x400xf32> to vector<1x400xf32>
    %186 = vector.broadcast %185 : vector<1x400xf32> to vector<8x400xf32>
    %187 = arith.mulf %183, %186 : vector<8x400xf32>
    %c2_117 = arith.constant 2 : index
    %c0_118 = arith.constant 0 : index
    %c0_119 = arith.constant 0 : index
    %188 = vector.load %arg9[%c2_117, %c0_118, %c0_119] : memref<3x1x400xf32, #tpu.memory_space<vmem>>, vector<1x1x400xf32>
    %189 = vector.shape_cast %188 : vector<1x1x400xf32> to vector<1x400xf32>
    %190 = vector.broadcast %189 : vector<1x400xf32> to vector<8x400xf32>
    %191 = arith.addf %187, %190 : vector<8x400xf32>
    %cst_120 = arith.constant 0.000000e+00 : f32
    %192 = vector.broadcast %cst_120 : f32 to vector<8x400xf32>
    %193 = arith.maximumf %191, %192 : vector<8x400xf32>
    %194 = arith.truncf %193 : vector<8x400xf32> to vector<8x400xbf16>
    %c2_121 = arith.constant 2 : index
    %c0_122 = arith.constant 0 : index
    %c0_123 = arith.constant 0 : index
    %195 = vector.load %arg10[%c2_121, %c0_122, %c0_123] : memref<3x400x8xbf16, #tpu.memory_space<vmem>>, vector<1x400x8xbf16>
    %196 = vector.shape_cast %195 : vector<1x400x8xbf16> to vector<400x8xbf16>
    %cst_124 = arith.constant dense<0.000000e+00> : vector<8x8xf32>
    %197 = tpu.matmul %194, %196, %cst_124 {dimension_numbers = #tpu.dot_dimension_numbers<[1], [0], [0], [1], [0, 0, 1, 1], [], []>} : vector<8x400xbf16>, vector<400x8xbf16>, vector<8x8xf32> -> vector<8x8xf32>
    %c2_125 = arith.constant 2 : index
    %c0_126 = arith.constant 0 : index
    %c0_127 = arith.constant 0 : index
    %198 = vector.load %arg11[%c2_125, %c0_126, %c0_127] : memref<3x1x8xf32, #tpu.memory_space<vmem>>, vector<1x1x8xf32>
    %199 = vector.shape_cast %198 : vector<1x1x8xf32> to vector<1x8xf32>
    %200 = vector.broadcast %199 : vector<1x8xf32> to vector<8x8xf32>
    %201 = arith.addf %197, %200 : vector<8x8xf32>
    %202 = vector.broadcast %2 : vector<1x8xf32> to vector<8x8xf32>
    %203 = arith.subf %202, %201 : vector<8x8xf32>
    %cst_128 = arith.constant 2.000000e+01 : f32
    %204 = vector.broadcast %cst_128 : f32 to vector<8x8xf32>
    %205 = arith.cmpf ogt, %203, %204 : vector<8x8xf32>
    %cst_129 = arith.constant 2.000000e+01 : f32
    %206 = vector.broadcast %cst_129 : f32 to vector<8x8xf32>
    %207 = arith.minimumf %203, %206 : vector<8x8xf32>
    %208 = math.exp %207 : vector<8x8xf32>
    %209 = math.log1p %208 : vector<8x8xf32>
    %210 = arith.select %205, %203, %209 : vector<8x8xi1>, vector<8x8xf32>
    %211 = vector.broadcast %2 : vector<1x8xf32> to vector<8x8xf32>
    %212 = arith.subf %211, %210 : vector<8x8xf32>
    %213 = vector.broadcast %3 : vector<1x8xf32> to vector<8x8xf32>
    %214 = arith.subf %212, %213 : vector<8x8xf32>
    %cst_130 = arith.constant 2.000000e+01 : f32
    %215 = vector.broadcast %cst_130 : f32 to vector<8x8xf32>
    %216 = arith.cmpf ogt, %214, %215 : vector<8x8xf32>
    %cst_131 = arith.constant 2.000000e+01 : f32
    %217 = vector.broadcast %cst_131 : f32 to vector<8x8xf32>
    %218 = arith.minimumf %214, %217 : vector<8x8xf32>
    %219 = math.exp %218 : vector<8x8xf32>
    %220 = math.log1p %219 : vector<8x8xf32>
    %221 = arith.select %216, %214, %220 : vector<8x8xi1>, vector<8x8xf32>
    %222 = vector.broadcast %3 : vector<1x8xf32> to vector<8x8xf32>
    %223 = arith.addf %222, %221 : vector<8x8xf32>
    %c4_i32_132 = arith.constant 4 : i32
    %224 = vector.broadcast %c4_i32_132 : i32 to vector<8x8xi32>
    %225 = arith.cmpi sge, %4, %224 : vector<8x8xi32>
    %226 = arith.select %225, %223, %201 : vector<8x8xi1>, vector<8x8xf32>
    %c2_133 = arith.constant 2 : index
    %c0_134 = arith.constant 0 : index
    %c0_135 = arith.constant 0 : index
    %227 = vector.load %arg14[%c2_133, %c0_134, %c0_135] : memref<3x8x8xf32, #tpu.memory_space<vmem>>, vector<1x8x8xf32>
    %228 = vector.shape_cast %227 : vector<1x8x8xf32> to vector<8x8xf32>
    %229 = vector.shape_cast %226 : vector<8x8xf32> to vector<1x8x8xf32>
    tpu.vector_store %arg14[%c2_133, %c0_134, %c0_135], %229 {strides = array<i32>} : memref<3x8x8xf32, #tpu.memory_space<vmem>>, vector<1x8x8xf32>,
    return
  }
  func.func @transform_0(%arg0: i32) -> (i32, i32) {
    %c0_i32 = arith.constant 0 : i32
    %c0_i32_0 = arith.constant 0 : i32
    return %arg0, %c0_i32 : i32, i32
  }
  func.func @transform_1(%arg0: i32) -> (i32, i32, i32) {
    %c0_i32 = arith.constant 0 : i32
    %c0_i32_0 = arith.constant 0 : i32
    %c0_i32_1 = arith.constant 0 : i32
    %c0_i32_2 = arith.constant 0 : i32
    return %c0_i32, %c0_i32_0, %c0_i32_1 : i32, i32, i32
  }
  func.func @transform_2(%arg0: i32) -> (i32, i32, i32) {
    %c0_i32 = arith.constant 0 : i32
    %c0_i32_0 = arith.constant 0 : i32
    %c0_i32_1 = arith.constant 0 : i32
    %c0_i32_2 = arith.constant 0 : i32
    return %c0_i32, %c0_i32_0, %c0_i32_1 : i32, i32, i32
  }
  func.func @transform_3(%arg0: i32) -> (i32, i32, i32) {
    %c0_i32 = arith.constant 0 : i32
    %c0_i32_0 = arith.constant 0 : i32
    %c0_i32_1 = arith.constant 0 : i32
    %c0_i32_2 = arith.constant 0 : i32
    return %c0_i32, %c0_i32_0, %c0_i32_1 : i32, i32, i32
  }
  func.func @transform_4(%arg0: i32) -> (i32, i32, i32) {
    %c0_i32 = arith.constant 0 : i32
    %c0_i32_0 = arith.constant 0 : i32
    %c0_i32_1 = arith.constant 0 : i32
    %c0_i32_2 = arith.constant 0 : i32
    return %c0_i32, %c0_i32_0, %c0_i32_1 : i32, i32, i32
  }
  func.func @transform_5(%arg0: i32) -> (i32, i32, i32) {
    %c0_i32 = arith.constant 0 : i32
    %c0_i32_0 = arith.constant 0 : i32
    %c0_i32_1 = arith.constant 0 : i32
    %c0_i32_2 = arith.constant 0 : i32
    return %c0_i32, %c0_i32_0, %c0_i32_1 : i32, i32, i32
  }
  func.func @transform_6(%arg0: i32) -> (i32, i32, i32) {
    %c0_i32 = arith.constant 0 : i32
    %c0_i32_0 = arith.constant 0 : i32
    %c0_i32_1 = arith.constant 0 : i32
    %c0_i32_2 = arith.constant 0 : i32
    return %c0_i32, %c0_i32_0, %c0_i32_1 : i32, i32, i32
  }
  func.func @transform_7(%arg0: i32) -> (i32, i32, i32) {
    %c0_i32 = arith.constant 0 : i32
    %c0_i32_0 = arith.constant 0 : i32
    %c0_i32_1 = arith.constant 0 : i32
    %c0_i32_2 = arith.constant 0 : i32
    return %c0_i32, %c0_i32_0, %c0_i32_1 : i32, i32, i32
  }
  func.func @transform_8(%arg0: i32) -> (i32, i32, i32) {
    %c0_i32 = arith.constant 0 : i32
    %c0_i32_0 = arith.constant 0 : i32
    %c0_i32_1 = arith.constant 0 : i32
    %c0_i32_2 = arith.constant 0 : i32
    return %c0_i32, %c0_i32_0, %c0_i32_1 : i32, i32, i32
  }
  func.func @transform_9(%arg0: i32) -> (i32, i32, i32) {
    %c0_i32 = arith.constant 0 : i32
    %c0_i32_0 = arith.constant 0 : i32
    %c0_i32_1 = arith.constant 0 : i32
    %c0_i32_2 = arith.constant 0 : i32
    return %c0_i32, %c0_i32_0, %c0_i32_1 : i32, i32, i32
  }
  func.func @transform_10(%arg0: i32) -> (i32, i32, i32) {
    %c0_i32 = arith.constant 0 : i32
    %c0_i32_0 = arith.constant 0 : i32
    %c0_i32_1 = arith.constant 0 : i32
    %c0_i32_2 = arith.constant 0 : i32
    return %c0_i32, %c0_i32_0, %c0_i32_1 : i32, i32, i32
  }
  func.func @transform_11(%arg0: i32) -> (i32, i32) {
    %c0_i32 = arith.constant 0 : i32
    %c0_i32_0 = arith.constant 0 : i32
    %c0_i32_1 = arith.constant 0 : i32
    return %c0_i32, %c0_i32_0 : i32, i32
  }
  func.func @transform_12(%arg0: i32) -> (i32, i32) {
    %c0_i32 = arith.constant 0 : i32
    %c0_i32_0 = arith.constant 0 : i32
    %c0_i32_1 = arith.constant 0 : i32
    return %c0_i32, %c0_i32_0 : i32, i32
  }
  func.func @transform_13(%arg0: i32) -> (i32, i32, i32) {
    %c0_i32 = arith.constant 0 : i32
    %c0_i32_0 = arith.constant 0 : i32
    %c0_i32_1 = arith.constant 0 : i32
    return %c0_i32, %arg0, %c0_i32_0 : i32, i32, i32
  }
}

</mosaic_0001>

<bundles_post_ra>
// kernel: tpu_custom_call.1
= control target key start
LH: loop header
LB: loop body
LE: loop exit
PB: predicated region body
PF: predicated region fallthrough
CT: control target
= control target key end

     0   :  { %18 = vsyncpa [#allocation3], 0  ;;  %s8801_s0 = inlined_call_operand.vmem [shape: f32[8,8], index: 0, kind: input, shape index: {}]   ;;  %s8802_s1 = inlined_call_operand.vmem [shape: bf16[3,8,400], index: 1, kind: input, shape index: {}]   ;;  %s8803_s2 = inlined_call_operand.vmem [shape: f32[3,1,400], index: 2, kind: input, shape index: {}]   ;;  %s8804_s3 = inlined_call_operand.hbm [shape: s8[3,400,400], index: 3, kind: input, shape index: {}]   ;;  %s8805_s4 = inlined_call_operand.vmem [shape: f32[3,1,400], index: 4, kind: input, shape index: {}]   ;;  %s8806_s5 = inlined_call_operand.vmem [shape: f32[3,1,400], index: 5, kind: input, shape index: {}]   ;;  %s8807_s6 = inlined_call_operand.hbm [shape: s8[3,400,400], index: 6, kind: input, shape index: {}]   ;;  %s8808_s7 = inlined_call_operand.vmem [shape: f32[3,1,400], index: 7, kind: input, shape index: {}]   ;;  %s8809_s8 = inlined_call_operand.vmem [shape: f32[3,1,400], index: 8, kind: input, shape index: {}]   ;;  %s8810_s9 = inlined_call_operand.vmem [shape: bf16[3,400,8], index: 9, kind: input, shape index: {}]   ;;  %s8811_s10 = inlined_call_operand.vmem [shape: f32[3,1,8], index: 10, kind: input, shape index: {}]   ;;  %s8812_s11 = inlined_call_operand.vmem [shape: f32[1,8], index: 11, kind: input, shape index: {}]   ;;  %s8813_s12 = inlined_call_operand.vmem [shape: f32[1,8], index: 12, kind: input, shape index: {}]   ;;  %s8814_s13 = inlined_call_operand.hbm [shape: f32[3,8,8], index: 13, kind: output, shape index: {}]  }
   0x1   :  { %19 = vsyncpa [#allocation6], 0 }
   0x2   :  { %20 = vsyncpa [#allocation4], 0  ;;  %s7923_s25 = smov [#allocation2]   ;;  %s7851_s29 = scalar_lea.hbm %s8804_s3, 19200 }
   0x3   :  { %s32_s26 = sshll.u32 %s7923_s25, 4  ;;  %p7852_p0 = scmp.ne.s32.totalorder %s8804_s3, %s7851_s29  ;;  %s33_s26 = int_to_ptr.vmem [resolvable:$true] %s32_s26 }
   0x4   :  { %p7855_p1 = scmp.lt.u32.totalorder %s7851_s29, %s8804_s3 }
   0x6   :  { %p7857_p2 = pnand %p7855_p1, %p7852_p0 }
   0x8   :  { %7860 = shalt.err (!%p7857_p2)
}
   0x9   :  { %s7861_s17 = scalar_lea.vmem %s33_s26, 19200  ;;  %p7866_p4 = scmp.lt.s32.totalorder %s33_s26, %s33_s26 }
   0xa   :  { %p7862_p3 = scmp.ne.s32.totalorder %s33_s26, %s7861_s17  ;;  %p7867_p5 = scmp.lt.s32.totalorder %s7861_s17, %s7861_s17 }
   0xc   :  { %p7868_p6 = por %p7867_p5, %p7866_p4 }
   0xe   :  { %p7869_p7 = pnand %p7868_p6, %p7862_p3 }
  0x10   :  { %7872 = shalt.err (!%p7869_p7)
}
  0x11   :  { %s7924_s18 = smov 128   ;;  %s7925_s19 = smov 8  }
  0x12   :  { %38 = dma.hbm_to_vmem [thread:$0]  %s8804_s3, 19200, %s33_s26, [#allocation3], %s7924_s18, %s7924_s18, %s7925_s19  }
  0x13   :  { %s7926_s22 = smov [#allocation5]   ;;  %s7873_s27 = scalar_lea.hbm %s8807_s6, 19200 }
  0x14   :  { %s48_s23 = sshll.u32 %s7926_s22, 4  ;;  %p7874_p8 = scmp.ne.s32.totalorder %s8807_s6, %s7873_s27  ;;  %s49_s23 = int_to_ptr.vmem [resolvable:$true] %s48_s23 }
  0x15   :  { %p7877_p9 = scmp.lt.u32.totalorder %s7873_s27, %s8807_s6 }
  0x17   :  { %p7879_p10 = pnand %p7877_p9, %p7874_p8 }
  0x19   :  { %7882 = shalt.err (!%p7879_p10)
}
  0x1a   :  { %s7883_s15 = scalar_lea.vmem %s49_s23, 19200  ;;  %p7888_p12 = scmp.lt.s32.totalorder %s49_s23, %s49_s23 }
  0x1b   :  { %p7884_p11 = scmp.ne.s32.totalorder %s49_s23, %s7883_s15  ;;  %p7889_p13 = scmp.lt.s32.totalorder %s7883_s15, %s7883_s15 }
  0x1d   :  { %p7890_p0 = por %p7889_p13, %p7888_p12 }
  0x1f   :  { %p7891_p1 = pnand %p7890_p0, %p7884_p11 }
  0x21   :  { %7894 = shalt.err (!%p7891_p1)
}
  0x22   :  { %54 = dma.hbm_to_vmem [thread:$0]  %s8807_s6, 19200, %s49_s23, [#allocation6], %s7924_s18, %s7924_s18, %s7925_s19  }
  0x23   :  { %7917 = dma.done.wait [#allocation3], 19200  }
  0x24   :  { %7918 = vsyncadd [#allocation3], 4294948096 }
  0x25   :  { %7919 = dma.done.wait [#allocation6], 19200  }
  0x26   :  { %7920 = vsyncadd [#allocation6], 4294948096  ;;  %v7927_v0 = vmov 0   ;;  %v80_v1 = vld [vmem:[%s8802_s1] sm:$0xff]  ;;  %vm118_vm0 = vcmask 1043456   ;;  %v81_v3 = vld [vmem:[%s8802_s1 + $0x8] sm:$0xff] }
  0x27   :  { %163 = vmatprep.mubr.bf16.mxu1 %v7927_v0  ;;  %v74_v2 = vld [vmem:[%s8801_s0] sm:$0xff]  ;;  %v6782_v4 = vcombine.high %v80_v1, %v80_v1  ;;  %v6781_v5 = vcombine.low %v80_v1, %v80_v1  ;;  %v6784_v7 = vcombine.high %v81_v3, %v81_v3  ;;  %v222_v9 = vld [vmem:[#allocation2 + $0x8] sm:$0xff]  ;;  %v223_v10 = vld [vmem:[#allocation2 + $0x10] sm:$0xff]  ;;  %v6783_v11 = vcombine.low %v81_v3, %v81_v3  ;;  %s7928_s14 = smov [#allocation7]  }
  0x28   :  { %v8039_v6 = vpack.c.bf16 %v74_v2, %v74_v2  ;;  %v221_v8 = vld [vmem:[#allocation2] sm:$0xff]  ;;  %v273_v14 = vunpack.c.l.s8.bf16 %v222_v9  ;;  %v224_v15 = vld [vmem:[#allocation2 + $0x18] sm:$0xff]  ;;  %v274_v17 = vunpack.c.h.s8.bf16 %v222_v9  ;;  %v275_v18 = vunpack.c.l.s8.bf16 %v223_v10  ;;  %v226_v21 = vld [vmem:[#allocation2 + $0x28] sm:$0xff]  ;;  %s6768_s15 = sshll.u32 %s7928_s14, 4  ;;  %s6769_s15 = int_to_ptr.vmem [resolvable:$true] %s6768_s15 }
  0x29   :  { %v271_v12 = vunpack.c.l.s8.bf16 %v221_v8  ;;  %v272_v13 = vunpack.c.h.s8.bf16 %v221_v8  ;;  %6785 = vmatprep.subr.msk.bf16.mxu1 %vm118_vm0, %v6782_v4  ;;  %v120_v16 = vsel %vm118_vm0, %v6781_v5, 0  ;;  %v277_v19 = vunpack.c.l.s8.bf16 %v224_v15  ;;  %v225_v20 = vld [vmem:[#allocation2 + $0x20] sm:$0xff]  ;;  %v8045_v27 = vld [vmem:[#allocation2 + $0x30] sm:$0xff]  ;;  %v8047_v28 = vld [vmem:[#allocation2 + $0x38] sm:$0xff]  ;;  %p7900_p3 = scmp.lt.s32.totalorder %s6769_s15, %s6769_s15 }
  0x2a   :  { %132 = vmatpush1.bf16.msra.mxu1 %v120_v16  ;;  %vm114_vm1 = vcmask 64512   ;;  %v126_v24 = vsel %vm118_vm0, %v6783_v11, 0  ;;  %v279_v29 = vunpack.c.l.s8.bf16 %v225_v20  ;;  %v281_v30 = vunpack.c.l.s8.bf16 %v226_v21  ;;  %v8054_v37 = vld [vmem:[#allocation2 + $0x40] sm:$0xff]  ;;  %v230_v38 = vld [vmem:[#allocation2 + $0x48] sm:$0xff]  ;;  %v8056_v40 = vld [vmem:[#allocation2 + $0x50] sm:$0xff] }
  0x2b   :  { %v6790_v22 = vcombine.high %v271_v12, %v273_v14  ;;  %v6789_v23 = vcombine.low %v271_v12, %v273_v14  ;;  %6787 = vmatprep.subr.msk.bf16.mxu1 %vm118_vm0, %v6784_v7  ;;  %v6792_v25 = vcombine.high %v272_v13, %v274_v17  ;;  %v6794_v26 = vcombine.high %v275_v18, %v277_v19  ;;  %v8058_v41 = vld [vmem:[#allocation2 + $0x58] sm:$0xff]  ;;  %v8063_v50 = vld [vmem:[#allocation2 + $0x60] sm:$0xff]  ;;  %v8065_v51 = vld [vmem:[#allocation2 + $0x68] sm:$0xff] }
  0x2c   :  { %v6793_v31 = vcombine.low %v275_v18, %v277_v19  ;;  %v6798_v32 = vcombine.high %v279_v29, %v281_v30  ;;  %v283_v33 = vunpack.c.l.s8.bf16 %v8045_v27  ;;  %v285_v34 = vunpack.c.l.s8.bf16 %v8047_v28  ;;  %v8071_v60 = vld [vmem:[#allocation2 + $0x70] sm:$0xff]  ;;  %v8073_v61 = vld [vmem:[#allocation2 + $0x78] sm:$0xff]  ;;  %v8078_v8 = vld [vmem:[#allocation2 + $0x80] sm:$0xff] }
  0x2d   :  { %875 = vmatprep.subr.bf16.mxu0 %v6790_v22  ;;  %6786 = vmatmul.mubr.msk.bf16.vlgmr.msra.gmra.mrb[0].mxu1 %vm114_vm1, %v8039_v6  ;;  %v276_v35 = vunpack.c.h.s8.bf16 %v223_v10  ;;  %v278_v36 = vunpack.c.h.s8.bf16 %v224_v15  ;;  %v6797_v39 = vcombine.low %v279_v29, %v281_v30  ;;  %v6791_v42 = vcombine.low %v272_v13, %v274_v17  ;;  %v8080_v9 = vld [vmem:[#allocation2 + $0x88] sm:$0xff]  ;;  %v8086_v18 = vld [vmem:[#allocation2 + $0x90] sm:$0xff]  ;;  %v8088_v19 = vld [vmem:[#allocation2 + $0x98] sm:$0xff] }
  0x2e   :  { %876 = vmatpush1.bf16.msra.mxu0 %v6789_v23  ;;  %173 = vmatpush1.bf16.msra.mxu1 %v126_v24  ;;  %v6802_v43 = vcombine.high %v283_v33, %v285_v34  ;;  %v287_v44 = vunpack.c.l.s8.bf16 %v8054_v37  ;;  %v289_v45 = vunpack.c.l.s8.bf16 %v230_v38  ;;  %v280_v47 = vunpack.c.h.s8.bf16 %v225_v20  ;;  %v8096_v29 = vld [vmem:[#allocation2 + $0xa8] sm:$0xff] }
  0x2f   :  { %204 = vmatprep.mubr.bf16.mxu1 %v7927_v0  ;;  %957 = vmatprep.subr.bf16.mxu1 %v6792_v25  ;;  %v6796_v46 = vcombine.high %v276_v35, %v278_v36  ;;  %v282_v48 = vunpack.c.h.s8.bf16 %v226_v21  ;;  %v6801_v49 = vcombine.low %v283_v33, %v285_v34  ;;  %v6795_v52 = vcombine.low %v276_v35, %v278_v36 }
  0x30   :  { %877 = vmatprep.subr.bf16.mxu0 %v6794_v26  ;;  %v6806_v53 = vcombine.high %v287_v44, %v289_v45  ;;  %v291_v54 = vunpack.c.l.s8.bf16 %v8056_v40  ;;  %v293_v55 = vunpack.c.l.s8.bf16 %v8058_v41  ;;  %v284_v57 = vunpack.c.h.s8.bf16 %v8045_v27 }
  0x31   :  { %v6800_v56 = vcombine.high %v280_v47, %v282_v48  ;;  %v286_v58 = vunpack.c.h.s8.bf16 %v8047_v28  ;;  %v6805_v59 = vcombine.low %v287_v44, %v289_v45  ;;  %v6799_v62 = vcombine.low %v280_v47, %v282_v48  ;;  %v8094_v28 = vld [vmem:[#allocation2 + $0xa0] sm:$0xff] }
  0x32   :  { %878 = vmatpush1.bf16.msra.mxu0 %v6793_v31  ;;  %v6810_v63 = vcombine.high %v291_v54, %v293_v55  ;;  %v295_v1 = vunpack.c.l.s8.bf16 %v8063_v50  ;;  %v297_v2 = vunpack.c.l.s8.bf16 %v8065_v51  ;;  %v288_v4 = vunpack.c.h.s8.bf16 %v8054_v37  ;;  %v245_v48 = vld [vmem:[#allocation2 + $0xc0] sm:$0xff] }
  0x33   :  { %879 = vmatprep.subr.bf16.mxu0 %v6798_v32  ;;  %v6804_v3 = vcombine.high %v284_v57, %v286_v58  ;;  %v290_v5 = vunpack.c.h.s8.bf16 %v230_v38  ;;  %v6809_v7 = vcombine.low %v291_v54, %v293_v55  ;;  %v6803_v10 = vcombine.low %v284_v57, %v286_v58  ;;  %v8102_v38 = vld [vmem:[#allocation2 + $0xb0] sm:$0xff] }
  0x34   :  { %v6814_v11 = vcombine.high %v295_v1, %v297_v2  ;;  %v299_v12 = vunpack.c.l.s8.bf16 %v8071_v60  ;;  %v301_v13 = vunpack.c.l.s8.bf16 %v8073_v61  ;;  %v292_v15 = vunpack.c.h.s8.bf16 %v8056_v40  ;;  %v247_v58 = vld [vmem:[#allocation2 + $0xd0] sm:$0xff] }
  0x35   :  { %6788 = vmatmul.mubr.msk.bf16.vlgmr.msra.gmra.mrb[4].mxu1 %vm114_vm1, %v8039_v6  ;;  %v6808_v14 = vcombine.high %v288_v4, %v290_v5  ;;  %v294_v16 = vunpack.c.h.s8.bf16 %v8058_v41  ;;  %v6813_v17 = vcombine.low %v295_v1, %v297_v2  ;;  %v6807_v20 = vcombine.low %v288_v4, %v290_v5 }
  0x36   :  { %880 = vmatpush1.bf16.msra.mxu0 %v6797_v39  ;;  %958 = vmatpush1.bf16.msra.mxu1 %v6791_v42  ;;  %v6818_v21 = vcombine.high %v299_v12, %v301_v13  ;;  %v303_v22 = vunpack.c.l.s8.bf16 %v8078_v8  ;;  %v305_v23 = vunpack.c.l.s8.bf16 %v8080_v9  ;;  %v296_v25 = vunpack.c.h.s8.bf16 %v8063_v50  ;;  %v8104_v39 = vld [vmem:[#allocation2 + $0xb8] sm:$0xff] }
  0x37   :  { %881 = vmatprep.subr.bf16.mxu0 %v6802_v43  ;;  %959 = vmatprep.subr.bf16.mxu1 %v6796_v46  ;;  %v6812_v24 = vcombine.high %v292_v15, %v294_v16  ;;  %v298_v26 = vunpack.c.h.s8.bf16 %v8065_v51  ;;  %v6817_v27 = vcombine.low %v299_v12, %v301_v13  ;;  %v6811_v30 = vcombine.low %v292_v15, %v294_v16 }
  0x38   :  { %v6822_v31 = vcombine.high %v303_v22, %v305_v23  ;;  %v307_v32 = vunpack.c.l.s8.bf16 %v8086_v18  ;;  %v309_v33 = vunpack.c.l.s8.bf16 %v8088_v19  ;;  %v300_v35 = vunpack.c.h.s8.bf16 %v8071_v60 }
  0x39   :  { %v6816_v34 = vcombine.high %v296_v25, %v298_v26  ;;  %v302_v36 = vunpack.c.h.s8.bf16 %v8073_v61  ;;  %v6821_v37 = vcombine.low %v303_v22, %v305_v23  ;;  %v6815_v40 = vcombine.low %v296_v25, %v298_v26 }
  0x3a   :  { %882 = vmatpush1.bf16.msra.mxu0 %v6801_v49  ;;  %960 = vmatpush1.bf16.msra.mxu1 %v6795_v52  ;;  %v6826_v41 = vcombine.high %v307_v32, %v309_v33  ;;  %v311_v42 = vunpack.c.l.s8.bf16 %v8094_v28  ;;  %v313_v43 = vunpack.c.l.s8.bf16 %v8096_v29  ;;  %v304_v45 = vunpack.c.h.s8.bf16 %v8078_v8  ;;  %v246_v49 = vld [vmem:[#allocation2 + $0xc8] sm:$0xff] }
  0x3b   :  { %883 = vmatprep.subr.bf16.mxu0 %v6806_v53  ;;  %961 = vmatprep.subr.bf16.mxu1 %v6800_v56  ;;  %v6820_v44 = vcombine.high %v300_v35, %v302_v36  ;;  %v306_v46 = vunpack.c.h.s8.bf16 %v8080_v9  ;;  %v6825_v47 = vcombine.low %v307_v32, %v309_v33  ;;  %v6819_v50 = vcombine.low %v300_v35, %v302_v36 }
  0x3c   :  { %v6830_v51 = vcombine.high %v311_v42, %v313_v43  ;;  %v315_v52 = vunpack.c.l.s8.bf16 %v8102_v38  ;;  %v317_v53 = vunpack.c.l.s8.bf16 %v8104_v39  ;;  %v308_v55 = vunpack.c.h.s8.bf16 %v8086_v18 }
  0x3d   :  { %v6824_v54 = vcombine.high %v304_v45, %v306_v46  ;;  %v310_v56 = vunpack.c.h.s8.bf16 %v8088_v19  ;;  %v6829_v57 = vcombine.low %v311_v42, %v313_v43  ;;  %v6823_v60 = vcombine.low %v304_v45, %v306_v46 }
  0x3e   :  { %884 = vmatpush1.bf16.msra.mxu0 %v6805_v59  ;;  %962 = vmatpush1.bf16.msra.mxu1 %v6799_v62  ;;  %v248_v59 = vld [vmem:[#allocation2 + $0xd8] sm:$0xff]  ;;  %v6834_v61 = vcombine.high %v315_v52, %v317_v53  ;;  %v319_v62 = vunpack.c.l.s8.bf16 %v245_v48  ;;  %v312_v2 = vunpack.c.h.s8.bf16 %v8094_v28  ;;  %v6833_v4 = vcombine.low %v315_v52, %v317_v53  ;;  %v250_v28 = vld [vmem:[#allocation2 + $0xe8] sm:$0xff] }
  0x3f   :  { %885 = vmatprep.subr.bf16.mxu0 %v6810_v63  ;;  %963 = vmatprep.subr.bf16.mxu1 %v6804_v3  ;;  %v321_v63 = vunpack.c.l.s8.bf16 %v246_v49  ;;  %v6828_v1 = vcombine.high %v308_v55, %v310_v56  ;;  %v314_v3 = vunpack.c.h.s8.bf16 %v8096_v29  ;;  %v6827_v5 = vcombine.low %v308_v55, %v310_v56 }
  0x40   :  { %v323_v8 = vunpack.c.l.s8.bf16 %v247_v58  ;;  %v325_v9 = vunpack.c.l.s8.bf16 %v248_v59  ;;  %v318_v12 = vunpack.c.h.s8.bf16 %v8104_v39  ;;  %v322_v18 = vunpack.c.h.s8.bf16 %v246_v49 }
  0x41   :  { %v6837_v13 = vcombine.low %v319_v62, %v321_v63  ;;  %v324_v22 = vunpack.c.h.s8.bf16 %v247_v58  ;;  %v326_v23 = vunpack.c.h.s8.bf16 %v248_v59  ;;  %v330_v32 = vunpack.c.h.s8.bf16 %v250_v28 }
  0x42   :  { %886 = vmatpush1.bf16.msra.mxu0 %v6809_v7  ;;  %964 = vmatpush1.bf16.msra.mxu1 %v6803_v10  ;;  %v6838_v7 = vcombine.high %v319_v62, %v321_v63  ;;  %v6832_v10 = vcombine.high %v312_v2, %v314_v3  ;;  %v6842_v15 = vcombine.high %v323_v8, %v325_v9  ;;  %vm871_vm2 = vcmask 130048  }
  0x43   :  { %887 = vmatprep.subr.bf16.mxu0 %v6814_v11  ;;  %965 = vmatprep.subr.bf16.mxu1 %v6808_v14  ;;  %v316_v11 = vunpack.c.h.s8.bf16 %v8102_v38  ;;  %v6831_v14 = vcombine.low %v312_v2, %v314_v3  ;;  %v6841_v19 = vcombine.low %v323_v8, %v325_v9  ;;  %v6844_v25 = vcombine.high %v324_v22, %v326_v23  ;;  %v252_v38 = vld [vmem:[#allocation2 + $0xf8] sm:$0xff] }
  0x44   :  { %v6843_v26 = vcombine.low %v324_v22, %v326_v23  ;;  %v334_v42 = vunpack.c.h.s8.bf16 %v252_v38  ;;  %v256_v3 = vld [vmem:[#allocation2 + $0x118] sm:$0xff] }
  0x45   :  { %v6836_v16 = vcombine.high %v316_v11, %v318_v12 }
  0x46   :  { %888 = vmatpush1.bf16.msra.mxu0 %v6813_v17  ;;  %966 = vmatpush1.bf16.msra.mxu1 %v6807_v20  ;;  %v320_v17 = vunpack.c.h.s8.bf16 %v245_v48  ;;  %v6835_v20 = vcombine.low %v316_v11, %v318_v12  ;;  %v254_v48 = vld [vmem:[#allocation2 + $0x108] sm:$0xff] }
  0x47   :  { %889 = vmatprep.subr.bf16.mxu0 %v6818_v21  ;;  %967 = vmatprep.subr.bf16.mxu1 %v6812_v24  ;;  %v338_v52 = vunpack.c.h.s8.bf16 %v254_v48  ;;  %v258_v11 = vld [vmem:[#allocation2 + $0x128] sm:$0xff] }
  0x48   :  { %v6840_v21 = vcombine.high %v320_v17, %v322_v18  ;;  %v6839_v24 = vcombine.low %v320_v17, %v322_v18  ;;  %v342_v17 = vunpack.c.h.s8.bf16 %v256_v3  ;;  %v346_v23 = vunpack.c.h.s8.bf16 %v258_v11 }
  0x4a   :  { %890 = vmatpush1.bf16.msra.mxu0 %v6817_v27  ;;  %968 = vmatpush1.bf16.msra.mxu1 %v6811_v30  ;;  %v249_v27 = vld [vmem:[#allocation2 + $0xe0] sm:$0xff]  ;;  %v329_v30 = vunpack.c.l.s8.bf16 %v250_v28  ;;  %v259_v28 = vld [vmem:[#allocation2 + $0x130] sm:$0xff] }
  0x4b   :  { %891 = vmatprep.subr.bf16.mxu0 %v6822_v31  ;;  %969 = vmatprep.subr.bf16.mxu1 %v6816_v34  ;;  %v327_v29 = vunpack.c.l.s8.bf16 %v249_v27  ;;  %v328_v31 = vunpack.c.h.s8.bf16 %v249_v27 }
  0x4d   :  { %v6846_v33 = vcombine.high %v327_v29, %v329_v30  ;;  %v6848_v34 = vcombine.high %v328_v31, %v330_v32  ;;  %v6845_v35 = vcombine.low %v327_v29, %v329_v30  ;;  %v6847_v36 = vcombine.low %v328_v31, %v330_v32  ;;  %v260_v29 = vld [vmem:[#allocation2 + $0x138] sm:$0xff] }
  0x4e   :  { %892 = vmatpush1.bf16.msra.mxu0 %v6821_v37  ;;  %970 = vmatpush1.bf16.msra.mxu1 %v6815_v40  ;;  %v251_v37 = vld [vmem:[#allocation2 + $0xf0] sm:$0xff]  ;;  %v333_v40 = vunpack.c.l.s8.bf16 %v252_v38 }
  0x4f   :  { %893 = vmatprep.subr.bf16.mxu0 %v6826_v41  ;;  %971 = vmatprep.subr.bf16.mxu1 %v6820_v44  ;;  %v331_v39 = vunpack.c.l.s8.bf16 %v251_v37  ;;  %v332_v41 = vunpack.c.h.s8.bf16 %v251_v37 }
  0x51   :  { %v6850_v43 = vcombine.high %v331_v39, %v333_v40  ;;  %v6852_v44 = vcombine.high %v332_v41, %v334_v42  ;;  %v6849_v45 = vcombine.low %v331_v39, %v333_v40  ;;  %v6851_v46 = vcombine.low %v332_v41, %v334_v42 }
  0x52   :  { %894 = vmatpush1.bf16.msra.mxu0 %v6825_v47  ;;  %972 = vmatpush1.bf16.msra.mxu1 %v6819_v50  ;;  %v253_v47 = vld [vmem:[#allocation2 + $0x100] sm:$0xff]  ;;  %v337_v50 = vunpack.c.l.s8.bf16 %v254_v48  ;;  %v347_v39 = vunpack.c.l.s8.bf16 %v259_v28  ;;  %v349_v40 = vunpack.c.l.s8.bf16 %v260_v29  ;;  %v348_v41 = vunpack.c.h.s8.bf16 %v259_v28 }
  0x53   :  { %895 = vmatprep.subr.bf16.mxu0 %v6830_v51  ;;  %973 = vmatprep.subr.bf16.mxu1 %v6824_v54  ;;  %v335_v49 = vunpack.c.l.s8.bf16 %v253_v47  ;;  %v336_v51 = vunpack.c.h.s8.bf16 %v253_v47  ;;  %v350_v42 = vunpack.c.h.s8.bf16 %v260_v29 }
  0x55   :  { %v6854_v53 = vcombine.high %v335_v49, %v337_v50  ;;  %v6856_v54 = vcombine.high %v336_v51, %v338_v52  ;;  %v6853_v55 = vcombine.low %v335_v49, %v337_v50  ;;  %v6855_v56 = vcombine.low %v336_v51, %v338_v52 }
  0x56   :  { %896 = vmatpush1.bf16.msra.mxu0 %v6829_v57  ;;  %974 = vmatpush1.bf16.msra.mxu1 %v6823_v60  ;;  %v78_v57 = vlaneseq  ;;  %v8127_v60 = vld [vmem:[%s8803_s2] sm:$0xf] }
  0x57   :  { %897 = vmatprep.subr.bf16.mxu0 %v6834_v61  ;;  %975 = vmatprep.subr.bf16.mxu1 %v6828_v1  ;;  %v255_v1 = vld [vmem:[#allocation2 + $0x110] sm:$0xff] }
  0x58   :  { %v8119_v58 = vshrl.u32 %v78_v57, 7  ;;  %v339_v9 = vunpack.c.l.s8.bf16 %v255_v1 }
  0x5a   :  { %898 = vmatpush1.bf16.msra.mxu0 %v6833_v4  ;;  %976 = vmatpush1.bf16.msra.mxu1 %v6827_v5  ;;  %v8122_v59 = vsub.s32 0, %v8119_v58  ;;  %v8130_v61 = vsub.s32 1, %v8119_v58  ;;  %v8137_v12 = vsub.s32 3, %v8119_v58 }
  0x5b   :  { %899 = vmatprep.subr.bf16.mxu0 %v6838_v7  ;;  %977 = vmatprep.subr.bf16.mxu1 %v6832_v10  ;;  %v257_v10 = vld [vmem:[#allocation2 + $0x120] sm:$0xff] }
  0x5c   :  { %v87_v62 = vrot.slane %v8127_v60, %v8122_v59  ;;  %v91_v63 = vrot.slane %v8127_v60, %v8130_v61  ;;  %v344_v22 = vunpack.c.h.s8.bf16 %v257_v10 }
  0x5e   :  { %900 = vmatpush1.bf16.msra.mxu0 %v6837_v13  ;;  %978 = vmatpush1.bf16.msra.mxu1 %v6831_v14  ;;  %v6863_v47 = vcombine.low %v344_v22, %v346_v23 }
  0x5f   :  { %901 = vmatprep.subr.bf16.mxu0 %v6842_v15  ;;  %979 = vmatprep.subr.bf16.mxu1 %v6836_v16  ;;  %v341_v15 = vunpack.c.l.s8.bf16 %v256_v3  ;;  %v340_v16 = vunpack.c.h.s8.bf16 %v255_v1 }
  0x61   :  { %v6860_v27 = vcombine.high %v340_v16, %v342_v17  ;;  %v6857_v31 = vcombine.low %v339_v9, %v341_v15  ;;  %v6859_v32 = vcombine.low %v340_v16, %v342_v17 }
  0x62   :  { %902 = vmatpush1.bf16.msra.mxu0 %v6841_v19  ;;  %980 = vmatpush1.bf16.msra.mxu1 %v6835_v20  ;;  %v343_v19 = vunpack.c.l.s8.bf16 %v257_v10  ;;  %v345_v20 = vunpack.c.l.s8.bf16 %v258_v11 }
  0x63   :  { %981 = vmatprep.subr.bf16.mxu1 %v6840_v21  ;;  %903 = vmatprep.subr.bf16.mxu0 %v6846_v33 }
  0x66   :  { %982 = vmatpush1.bf16.msra.mxu1 %v6839_v24  ;;  %904 = vmatpush1.bf16.msra.mxu0 %v6845_v35  ;;  %v99_v24 = vrot.slane %v8127_v60, %v8137_v12  ;;  %v6864_v35 = vcombine.high %v344_v22, %v346_v23  ;;  %v8146_v23 = vsub.s32 2, %v8119_v58 }
  0x67   :  { %983 = vmatprep.subr.bf16.mxu1 %v6844_v25  ;;  %905 = vmatprep.subr.bf16.mxu0 %v6850_v43  ;;  %v262_v43 = vld [vmem:[#allocation2 + $0x148] sm:$0xff] }
  0x68   :  { %v353_v49 = vunpack.c.l.s8.bf16 %v262_v43  ;;  %v354_v51 = vunpack.c.h.s8.bf16 %v262_v43  ;;  %v95_v58 = vrot.slane %v8127_v60, %v8146_v23 }
  0x6a   :  { %984 = vmatpush1.bf16.msra.mxu1 %v6843_v26  ;;  %906 = vmatpush1.bf16.msra.mxu0 %v6849_v45  ;;  %v6858_v26 = vcombine.high %v339_v9, %v341_v15  ;;  %v266_v9 = vld [vmem:[#allocation2 + $0x168] sm:$0xff] }
  0x6b   :  { %985 = vmatprep.subr.bf16.mxu1 %v6848_v34  ;;  %916 = vmatprep.subr.bf16.mxu0 %v6854_v53  ;;  %v6862_v34 = vcombine.high %v343_v19, %v345_v20  ;;  %v6866_v53 = vcombine.high %v347_v39, %v349_v40  ;;  %v362_v16 = vunpack.c.h.s8.bf16 %v266_v9 }
  0x6e   :  { %986 = vmatpush1.bf16.msra.mxu1 %v6847_v36  ;;  %v261_v36 = vld [vmem:[#allocation2 + $0x140] sm:$0xff] }
  0x6f   :  { %987 = vmatprep.subr.bf16.mxu1 %v6852_v44  ;;  %v351_v48 = vunpack.c.l.s8.bf16 %v261_v36  ;;  %v352_v50 = vunpack.c.h.s8.bf16 %v261_v36 }
  0x71   :  { %v6870_v1 = vcombine.high %v351_v48, %v353_v49  ;;  %v6869_v10 = vcombine.low %v351_v48, %v353_v49  ;;  %v6871_v11 = vcombine.low %v352_v50, %v354_v51 }
  0x72   :  { %988 = vmatpush1.bf16.msra.mxu1 %v6851_v46  ;;  %v6861_v46 = vcombine.low %v343_v19, %v345_v20  ;;  %v267_v19 = vld [vmem:[#allocation2 + $0x170] sm:$0xff]  ;;  %v268_v20 = vld [vmem:[#allocation2 + $0x178] sm:$0xff] }
  0x73   :  { %998 = vmatprep.subr.bf16.mxu1 %v6856_v54  ;;  %v6868_v54 = vcombine.high %v348_v41, %v350_v42  ;;  %v364_v28 = vunpack.c.h.s8.bf16 %v267_v19  ;;  %v366_v29 = vunpack.c.h.s8.bf16 %v268_v20 }
 0x100   :  { %v165_v2 = vpop.f32.mrb[0].mxu1 }
 0x101   :  { %v166_v4 = vadd.f32 %v165_v2, %v87_v62  ;;  %v167_v5 = vpop.f32.mrb[1].mxu1  ;;  %v6865_v62 = vcombine.low %v347_v39, %v349_v40  ;;  %v6872_v2 = vcombine.high %v352_v50, %v354_v51  ;;  %v6884_v40 = vcombine.high %v364_v28, %v366_v29  ;;  %v1101_v51 = vld [vmem:[#allocation5 + $0x10] sm:$0xff] }
 0x102   :  { %v168_v7 = vadd.f32 %v167_v5, %v91_v63  ;;  %v169_v8 = vpop.f32.mrb[2].mxu1  ;;  %v6867_v63 = vcombine.low %v348_v41, %v350_v42  ;;  %v1099_v41 = vld [vmem:[#allocation5] sm:$0xff]  ;;  %v1100_v42 = vld [vmem:[#allocation5 + $0x8] sm:$0xff] }
 0x103   :  { %v213_v13 = vmax.f32 %v166_v4, 0.0  ;;  %v170_v14 = vpop.f32.mrb[3].mxu1  ;;  %v265_v8 = vld [vmem:[#allocation2 + $0x160] sm:$0xff]  ;;  %v1151_v49 = vunpack.c.l.s8.bf16 %v1100_v42  ;;  %v1150_v50 = vunpack.c.h.s8.bf16 %v1099_v41  ;;  %v1152_v60 = vunpack.c.h.s8.bf16 %v1100_v42 }
 0x104   :  { %v214_v18 = vmax.f32 %v168_v7, 0.0  ;;  %v361_v14 = vunpack.c.l.s8.bf16 %v266_v9  ;;  %v360_v15 = vunpack.c.h.s8.bf16 %v265_v8 }
 0x105   :  { %v217_v25 = vpack.c.bf16 %v213_v13, %v213_v13  ;;  %v359_v13 = vunpack.c.l.s8.bf16 %v265_v8 }
 0x106   :  { %v218_v21 = vpack.c.bf16 %v214_v18, %v214_v18 }
 0x108   :  { %907 = vmatprep.mubr.bf16.mxu0 %v218_v21  ;;  %989 = vmatprep.mubr.bf16.mxu1 %v218_v21  ;;  %v8141_v30 = vpop.f32.mrb[4].mxu1 }
 0x109   :  { %908 = vmatmul.mubr.bf16.vlgmr.msra.gmra.mrb[0].mxu0 %v217_v25  ;;  %990 = vmatmul.mubr.bf16.vlgmr.msra.gmra.mrb[8].mxu1 %v217_v25  ;;  %v208_v33 = vpop.f32.mrb[5].mxu1  ;;  %v6880_v25 = vcombine.high %v360_v15, %v362_v16  ;;  %v207_v48 = vadd.f32 %v8141_v30, %v95_v58  ;;  %v1110_v58 = vld [vmem:[#allocation5 + $0x58] sm:$0xff] }
 0x10a   :  { %917 = vmatpush1.bf16.msra.mxu0 %v6853_v55  ;;  %999 = vmatpush1.bf16.msra.mxu1 %v6855_v56  ;;  %v209_v37 = vadd.f32 %v208_v33, %v99_v24  ;;  %v210_v38 = vpop.f32.mrb[6].mxu1  ;;  %v263_v55 = vld [vmem:[#allocation2 + $0x150] sm:$0xff]  ;;  %v264_v56 = vld [vmem:[#allocation2 + $0x158] sm:$0xff]  ;;  %v6878_v24 = vcombine.high %v359_v13, %v361_v14  ;;  %v6877_v33 = vcombine.low %v359_v13, %v361_v14 }
 0x10b   :  { %918 = vmatprep.subr.bf16.mxu0 %v6858_v26  ;;  %1000 = vmatprep.subr.bf16.mxu1 %v6860_v27  ;;  %v211_v44 = vpop.f32.mrb[7].mxu1  ;;  %v355_v3 = vunpack.c.l.s8.bf16 %v263_v55  ;;  %v357_v4 = vunpack.c.l.s8.bf16 %v264_v56  ;;  %v356_v5 = vunpack.c.h.s8.bf16 %v263_v55  ;;  %v358_v7 = vunpack.c.h.s8.bf16 %v264_v56 }
 0x10c   :  { %v216_v45 = vmax.f32 %v209_v37, 0.0  ;;  %v363_v26 = vunpack.c.l.s8.bf16 %v267_v19  ;;  %v365_v27 = vunpack.c.l.s8.bf16 %v268_v20  ;;  %v6883_v44 = vcombine.low %v364_v28, %v366_v29  ;;  %v1108_v28 = vld [vmem:[#allocation5 + $0x48] sm:$0xff] }
 0x10d   :  { %v6874_v17 = vcombine.high %v355_v3, %v357_v4  ;;  %v6876_v18 = vcombine.high %v356_v5, %v358_v7  ;;  %v6873_v21 = vcombine.low %v355_v3, %v357_v4  ;;  %v6875_v22 = vcombine.low %v356_v5, %v358_v7  ;;  %v1103_v3 = vld [vmem:[#allocation5 + $0x20] sm:$0xff]  ;;  %v1104_v4 = vld [vmem:[#allocation5 + $0x28] sm:$0xff] }
 0x10e   :  { %919 = vmatpush1.bf16.msra.mxu0 %v6857_v31  ;;  %1001 = vmatpush1.bf16.msra.mxu1 %v6859_v32  ;;  %v220_v52 = vpack.c.bf16 %v216_v45, %v216_v45  ;;  %v269_v31 = vld [vmem:[#allocation2 + $0x180] sm:$0xff]  ;;  %v270_v32 = vld [vmem:[#allocation2 + $0x188] sm:$0xff]  ;;  %v6882_v39 = vcombine.high %v363_v26, %v365_v27  ;;  %v6881_v43 = vcombine.low %v363_v26, %v365_v27  ;;  %v1153_v55 = vunpack.c.l.s8.bf16 %v1101_v51  ;;  %v1107_v27 = vld [vmem:[#allocation5 + $0x40] sm:$0xff] }
 0x10f   :  { %920 = vmatprep.subr.bf16.mxu0 %v6862_v34  ;;  %1002 = vmatprep.subr.bf16.mxu1 %v6864_v35  ;;  %v6879_v34 = vcombine.low %v360_v15, %v362_v16  ;;  %v367_v35 = vunpack.c.l.s8.bf16 %v269_v31  ;;  %v369_v36 = vunpack.c.l.s8.bf16 %v270_v32  ;;  %v368_v37 = vunpack.c.h.s8.bf16 %v269_v31  ;;  %v1105_v16 = vld [vmem:[#allocation5 + $0x30] sm:$0xff] }
 0x110   :  { %6889 = vmatprep.mubr.msk.bf16.mxu0 %vm871_vm2, %v220_v52  ;;  %6890 = vmatprep.mubr.msk.bf16.mxu1 %vm871_vm2, %v220_v52  ;;  %v370_v38 = vunpack.c.h.s8.bf16 %v270_v32  ;;  %v1102_v52 = vld [vmem:[#allocation5 + $0x18] sm:$0xff]  ;;  %v6893_v7 = vcombine.low %v1150_v50, %v1152_v60  ;;  %v1157_v8 = vunpack.c.l.s8.bf16 %v1103_v3  ;;  %v1159_v9 = vunpack.c.l.s8.bf16 %v1104_v4 }
 0x111   :  { %v6886_v45 = vcombine.high %v367_v35, %v369_v36  ;;  %v1155_v56 = vunpack.c.l.s8.bf16 %v1102_v52  ;;  %v1156_v30 = vunpack.c.h.s8.bf16 %v1102_v52  ;;  %v1165_v32 = vunpack.c.l.s8.bf16 %v1107_v27 }
 0x112   :  { %921 = vmatpush1.bf16.msra.mxu0 %v6861_v46  ;;  %1003 = vmatpush1.bf16.msra.mxu1 %v6863_v47  ;;  %v6888_v46 = vcombine.high %v368_v37, %v370_v38  ;;  %v1149_v47 = vunpack.c.l.s8.bf16 %v1099_v41  ;;  %v6900_v20 = vcombine.high %v1157_v8, %v1159_v9  ;;  %v6899_v29 = vcombine.low %v1157_v8, %v1159_v9  ;;  %v1115_v8 = vld [vmem:[#allocation5 + $0x80] sm:$0xff]  ;;  %v1116_v9 = vld [vmem:[#allocation5 + $0x88] sm:$0xff] }
 0x113   :  { %922 = vmatprep.subr.bf16.mxu0 %v6866_v53  ;;  %1004 = vmatprep.subr.bf16.mxu1 %v6868_v54  ;;  %v6885_v53 = vcombine.low %v367_v35, %v369_v36  ;;  %v6887_v54 = vcombine.low %v368_v37, %v370_v38  ;;  %v6896_v14 = vcombine.high %v1153_v55, %v1155_v56  ;;  %v1168_v35 = vunpack.c.h.s8.bf16 %v1108_v28  ;;  %v1109_v38 = vld [vmem:[#allocation5 + $0x50] sm:$0xff] }
 0x114   :  { %v6891_v5 = vcombine.low %v1149_v47, %v1151_v49 }
 0x116   :  { %923 = vmatpush1.bf16.msra.mxu0 %v6865_v62  ;;  %1005 = vmatpush1.bf16.msra.mxu1 %v6867_v63  ;;  %v1154_v62 = vunpack.c.h.s8.bf16 %v1101_v51  ;;  %v215_v63 = vmax.f32 %v207_v48, 0.0  ;;  %v1112_v48 = vld [vmem:[#allocation5 + $0x68] sm:$0xff] }
 0x117   :  { %924 = vmatprep.subr.bf16.mxu0 %v6870_v1  ;;  %1006 = vmatprep.subr.bf16.mxu1 %v6872_v2  ;;  %v6892_v1 = vcombine.high %v1149_v47, %v1151_v49  ;;  %v6894_v2 = vcombine.high %v1150_v50, %v1152_v60  ;;  %v1111_v47 = vld [vmem:[#allocation5 + $0x60] sm:$0xff]  ;;  %v1175_v51 = vunpack.c.l.s8.bf16 %v1112_v48 }
 0x118   :  { %v219_v13 = vpack.c.bf16 %v215_v63, %v215_v63  ;;  %v6898_v15 = vcombine.high %v1154_v62, %v1156_v30  ;;  %v6897_v19 = vcombine.low %v1154_v62, %v1156_v30  ;;  %v1173_v60 = vunpack.c.l.s8.bf16 %v1111_v47  ;;  %v1114_v62 = vld [vmem:[#allocation5 + $0x78] sm:$0xff] }
 0x119   :  { %v1174_v52 = vunpack.c.h.s8.bf16 %v1111_v47 }
 0x11a   :  { %925 = vmatpush1.bf16.msra.mxu0 %v6869_v10  ;;  %1007 = vmatpush1.bf16.msra.mxu1 %v6871_v11  ;;  %v1158_v10 = vunpack.c.h.s8.bf16 %v1103_v3  ;;  %v1160_v11 = vunpack.c.h.s8.bf16 %v1104_v4  ;;  %v1179_v4 = vunpack.c.l.s8.bf16 %v1114_v62 }
 0x11b   :  { %926 = vmatprep.subr.bf16.mxu0 %v6874_v17  ;;  %1008 = vmatprep.subr.bf16.mxu1 %v6876_v18  ;;  %v1106_v17 = vld [vmem:[#allocation5 + $0x38] sm:$0xff]  ;;  %v6895_v18 = vcombine.low %v1153_v55, %v1155_v56  ;;  %v1113_v56 = vld [vmem:[#allocation5 + $0x70] sm:$0xff] }
 0x11c   :  { %v1164_v26 = vunpack.c.h.s8.bf16 %v1106_v17  ;;  %v6901_v31 = vcombine.low %v1158_v10, %v1160_v11  ;;  %v1177_v3 = vunpack.c.l.s8.bf16 %v1113_v56 }
 0x11e   :  { %927 = vmatpush1.bf16.msra.mxu0 %v6873_v21  ;;  %1009 = vmatpush1.bf16.msra.mxu1 %v6875_v22  ;;  %v6902_v21 = vcombine.high %v1158_v10, %v1160_v11  ;;  %v1161_v22 = vunpack.c.l.s8.bf16 %v1105_v16  ;;  %v6915_v10 = vcombine.low %v1173_v60, %v1175_v51 }
 0x11f   :  { %928 = vmatprep.subr.bf16.mxu0 %v6878_v24  ;;  %1010 = vmatprep.subr.bf16.mxu1 %v6880_v25  ;;  %v1163_v24 = vunpack.c.l.s8.bf16 %v1106_v17  ;;  %v1162_v25 = vunpack.c.h.s8.bf16 %v1105_v16  ;;  %v1184_v16 = vunpack.c.h.s8.bf16 %v1116_v9  ;;  %v6920_v17 = vcombine.high %v1177_v3, %v1179_v4 }
 0x121   :  { %v6904_v36 = vcombine.high %v1161_v22, %v1163_v24  ;;  %v6906_v37 = vcombine.high %v1162_v25, %v1164_v26 }
 0x122   :  { %929 = vmatpush1.bf16.msra.mxu0 %v6877_v33  ;;  %1011 = vmatpush1.bf16.msra.mxu1 %v6879_v34  ;;  %v1167_v33 = vunpack.c.l.s8.bf16 %v1108_v28  ;;  %v1166_v34 = vunpack.c.h.s8.bf16 %v1107_v27 }
 0x123   :  { %930 = vmatprep.subr.bf16.mxu0 %v6882_v39  ;;  %1012 = vmatprep.subr.bf16.mxu1 %v6884_v40  ;;  %v6903_v39 = vcombine.low %v1161_v22, %v1163_v24  ;;  %v6905_v40 = vcombine.low %v1162_v25, %v1164_v26 }
 0x124   :  { %v6908_v41 = vcombine.high %v1165_v32, %v1167_v33  ;;  %v6910_v42 = vcombine.high %v1166_v34, %v1168_v35  ;;  %v6907_v49 = vcombine.low %v1165_v32, %v1167_v33  ;;  %v6909_v50 = vcombine.low %v1166_v34, %v1168_v35  ;;  %v1120_v32 = vld [vmem:[#allocation5 + $0xa8] sm:$0xff] }
 0x126   :  { %931 = vmatpush1.bf16.msra.mxu0 %v6881_v43  ;;  %1013 = vmatpush1.bf16.msra.mxu1 %v6883_v44  ;;  %v1169_v43 = vunpack.c.l.s8.bf16 %v1109_v38  ;;  %v1171_v44 = vunpack.c.l.s8.bf16 %v1110_v58 }
 0x127   :  { %932 = vmatprep.subr.bf16.mxu0 %v6886_v45  ;;  %1014 = vmatprep.subr.bf16.mxu1 %v6888_v46  ;;  %v1170_v45 = vunpack.c.h.s8.bf16 %v1109_v38  ;;  %v1172_v46 = vunpack.c.h.s8.bf16 %v1110_v58  ;;  %v1192_v38 = vunpack.c.h.s8.bf16 %v1120_v32 }
 0x128   :  { %v6911_v63 = vcombine.low %v1169_v43, %v1171_v44 }
 0x129   :  { %v6914_v55 = vcombine.high %v1170_v45, %v1172_v46 }
 0x12a   :  { %933 = vmatpush1.bf16.msra.mxu0 %v6885_v53  ;;  %1015 = vmatpush1.bf16.msra.mxu1 %v6887_v54  ;;  %v1176_v53 = vunpack.c.h.s8.bf16 %v1112_v48  ;;  %v6912_v54 = vcombine.high %v1169_v43, %v1171_v44 }
 0x12b   :  { %1752 = vmatprep.subr.bf16.mxu0 %v6892_v1  ;;  %1834 = vmatprep.subr.bf16.mxu1 %v6894_v2  ;;  %v6913_v1 = vcombine.low %v1170_v45, %v1172_v46  ;;  %v6916_v2 = vcombine.high %v1173_v60, %v1175_v51  ;;  %v1124_v60 = vld [vmem:[#allocation5 + $0xc8] sm:$0xff] }
 0x12c   :  { %v6918_v30 = vcombine.high %v1174_v52, %v1176_v53  ;;  %v6917_v11 = vcombine.low %v1174_v52, %v1176_v53 }
 0x12d   :  { %949 = vmatmul.mubr.bf16.vlgmr.msra.gmra.mrb[0].mxu0 %v219_v13  ;;  %1031 = vmatmul.mubr.bf16.vlgmr.msra.gmra.mrb[8].mxu1 %v219_v13  ;;  %v1181_v13 = vunpack.c.l.s8.bf16 %v1115_v8 }
 0x12e   :  { %1753 = vmatpush1.bf16.msra.mxu0 %v6891_v5  ;;  %1835 = vmatpush1.bf16.msra.mxu1 %v6893_v7  ;;  %v1178_v5 = vunpack.c.h.s8.bf16 %v1113_v56  ;;  %v1180_v7 = vunpack.c.h.s8.bf16 %v1114_v62  ;;  %v1200_v56 = vunpack.c.h.s8.bf16 %v1124_v60 }
 0x12f   :  { %1754 = vmatprep.subr.bf16.mxu0 %v6896_v14  ;;  %1836 = vmatprep.subr.bf16.mxu1 %v6898_v15  ;;  %v1183_v14 = vunpack.c.l.s8.bf16 %v1116_v9  ;;  %v1182_v15 = vunpack.c.h.s8.bf16 %v1115_v8 }
 0x130   :  { %v6921_v22 = vcombine.low %v1178_v5, %v1180_v7 }
 0x131   :  { %v6924_v24 = vcombine.high %v1181_v13, %v1183_v14  ;;  %v6926_v25 = vcombine.high %v1182_v15, %v1184_v16  ;;  %v6923_v33 = vcombine.low %v1181_v13, %v1183_v14  ;;  %v6925_v34 = vcombine.low %v1182_v15, %v1184_v16 }
 0x132   :  { %1755 = vmatpush1.bf16.msra.mxu0 %v6895_v18  ;;  %1837 = vmatpush1.bf16.msra.mxu1 %v6897_v19  ;;  %v6922_v18 = vcombine.high %v1178_v5, %v1180_v7  ;;  %v1117_v19 = vld [vmem:[#allocation5 + $0x90] sm:$0xff] }
 0x133   :  { %1756 = vmatprep.subr.bf16.mxu0 %v6900_v20  ;;  %1838 = vmatprep.subr.bf16.mxu1 %v6902_v21  ;;  %v1118_v20 = vld [vmem:[#allocation5 + $0x98] sm:$0xff]  ;;  %v6919_v21 = vcombine.low %v1177_v3, %v1179_v4  ;;  %v1185_v26 = vunpack.c.l.s8.bf16 %v1117_v19  ;;  %v1186_v28 = vunpack.c.h.s8.bf16 %v1117_v19  ;;  %v1128_v19 = vld [vmem:[#allocation5 + $0xe8] sm:$0xff] }
 0x134   :  { %v1187_v27 = vunpack.c.l.s8.bf16 %v1118_v20 }
 0x136   :  { %1757 = vmatpush1.bf16.msra.mxu0 %v6899_v29  ;;  %1839 = vmatpush1.bf16.msra.mxu1 %v6901_v31  ;;  %v1188_v29 = vunpack.c.h.s8.bf16 %v1118_v20  ;;  %v1119_v31 = vld [vmem:[#allocation5 + $0xa0] sm:$0xff]  ;;  %v6928_v58 = vcombine.high %v1185_v26, %v1187_v27 }
 0x137   :  { %1758 = vmatprep.subr.bf16.mxu0 %v6904_v36  ;;  %1840 = vmatprep.subr.bf16.mxu1 %v6906_v37  ;;  %v1189_v35 = vunpack.c.l.s8.bf16 %v1119_v31  ;;  %v1191_v36 = vunpack.c.l.s8.bf16 %v1120_v32  ;;  %v1190_v37 = vunpack.c.h.s8.bf16 %v1119_v31  ;;  %v1130_v31 = vld [vmem:[#allocation5 + $0xf8] sm:$0xff] }
 0x138   :  { %v6929_v43 = vcombine.low %v1186_v28, %v1188_v29 }
 0x139   :  { %v6932_v44 = vcombine.high %v1189_v35, %v1191_v36  ;;  %v6934_v45 = vcombine.high %v1190_v37, %v1192_v38  ;;  %v6931_v51 = vcombine.low %v1189_v35, %v1191_v36  ;;  %v6933_v52 = vcombine.low %v1190_v37, %v1192_v38 }
 0x13a   :  { %1759 = vmatpush1.bf16.msra.mxu0 %v6903_v39  ;;  %1841 = vmatpush1.bf16.msra.mxu1 %v6905_v40  ;;  %v6930_v39 = vcombine.high %v1186_v28, %v1188_v29  ;;  %v1121_v40 = vld [vmem:[#allocation5 + $0xb0] sm:$0xff]  ;;  %v1212_v35 = vunpack.c.h.s8.bf16 %v1130_v31 }
 0x13b   :  { %1760 = vmatprep.subr.bf16.mxu0 %v6908_v41  ;;  %1842 = vmatprep.subr.bf16.mxu1 %v6910_v42  ;;  %v1122_v41 = vld [vmem:[#allocation5 + $0xb8] sm:$0xff]  ;;  %v6927_v42 = vcombine.low %v1185_v26, %v1187_v27  ;;  %v1193_v46 = vunpack.c.l.s8.bf16 %v1121_v40  ;;  %v1194_v48 = vunpack.c.h.s8.bf16 %v1121_v40  ;;  %v1129_v29 = vld [vmem:[#allocation5 + $0xf0] sm:$0xff]  ;;  %v1132_v40 = vld [vmem:[#allocation5 + $0x108] sm:$0xff] }
 0x13c   :  { %v1195_v47 = vunpack.c.l.s8.bf16 %v1122_v41  ;;  %v1209_v32 = vunpack.c.l.s8.bf16 %v1129_v29 }
 0x13e   :  { %1761 = vmatpush1.bf16.msra.mxu0 %v6907_v49  ;;  %1843 = vmatpush1.bf16.msra.mxu1 %v6909_v50  ;;  %v1196_v49 = vunpack.c.h.s8.bf16 %v1122_v41  ;;  %v1123_v50 = vld [vmem:[#allocation5 + $0xc0] sm:$0xff]  ;;  %v6936_v62 = vcombine.high %v1193_v46, %v1195_v47 }
 0x13f   :  { %1762 = vmatprep.subr.bf16.mxu0 %v6912_v54  ;;  %1844 = vmatprep.subr.bf16.mxu1 %v6914_v55  ;;  %v1197_v53 = vunpack.c.l.s8.bf16 %v1123_v50  ;;  %v1199_v54 = vunpack.c.l.s8.bf16 %v1124_v60  ;;  %v1198_v55 = vunpack.c.h.s8.bf16 %v1123_v50  ;;  %v8159_v50 = vld [vmem:[%s8806_s5] sm:$0xf] }
 0x140   :  { %v6937_v3 = vcombine.low %v1194_v48, %v1196_v49 }
 0x141   :  { %v6940_v4 = vcombine.high %v1197_v53, %v1199_v54  ;;  %v6942_v5 = vcombine.high %v1198_v55, %v1200_v56  ;;  %v6941_v13 = vcombine.low %v1198_v55, %v1200_v56  ;;  %v1074_v56 = vrot.slane %v8159_v50, %v8130_v61 }
 0x142   :  { %1763 = vmatpush1.bf16.msra.mxu0 %v6911_v63  ;;  %1845 = vmatpush1.bf16.msra.mxu1 %v6913_v1  ;;  %v6938_v63 = vcombine.high %v1194_v48, %v1196_v49  ;;  %v1125_v1 = vld [vmem:[#allocation5 + $0xd0] sm:$0xff] }
 0x143   :  { %1764 = vmatprep.subr.bf16.mxu0 %v6916_v2  ;;  %1846 = vmatprep.subr.bf16.mxu1 %v6918_v30  ;;  %v1126_v2 = vld [vmem:[#allocation5 + $0xd8] sm:$0xff]  ;;  %v6935_v30 = vcombine.low %v1193_v46, %v1195_v47  ;;  %v1201_v7 = vunpack.c.l.s8.bf16 %v1125_v1  ;;  %v1202_v9 = vunpack.c.h.s8.bf16 %v1125_v1  ;;  %v8154_v49 = vld [vmem:[%s8805_s4] sm:$0xf] }
 0x144   :  { %v1203_v8 = vunpack.c.l.s8.bf16 %v1126_v2  ;;  %v1044_v60 = vrot.slane %v8154_v49, %v8122_v59 }
 0x146   :  { %1765 = vmatpush1.bf16.msra.mxu0 %v6915_v10  ;;  %1847 = vmatpush1.bf16.msra.mxu1 %v6917_v11  ;;  %v1204_v10 = vunpack.c.h.s8.bf16 %v1126_v2  ;;  %v6939_v11 = vcombine.low %v1197_v53, %v1199_v54  ;;  %v6944_v14 = vcombine.high %v1201_v7, %v1203_v8  ;;  %v6943_v16 = vcombine.low %v1201_v7, %v1203_v8  ;;  %v1133_v7 = vld [vmem:[#allocation5 + $0x110] sm:$0xff] }
 0x147   :  { %1766 = vmatprep.subr.bf16.mxu0 %v6920_v17  ;;  %1848 = vmatprep.subr.bf16.mxu1 %v6922_v18  ;;  %v1127_v18 = vld [vmem:[#allocation5 + $0xe0] sm:$0xff]  ;;  %v1070_v53 = vrot.slane %v8159_v50, %v8122_v59 }
 0x148   :  { %v6946_v15 = vcombine.high %v1202_v9, %v1204_v10  ;;  %v6945_v17 = vcombine.low %v1202_v9, %v1204_v10  ;;  %v1205_v20 = vunpack.c.l.s8.bf16 %v1127_v18 }
 0x14a   :  { %1767 = vmatpush1.bf16.msra.mxu0 %v6919_v21  ;;  %1849 = vmatpush1.bf16.msra.mxu1 %v6921_v22  ;;  %v1207_v21 = vunpack.c.l.s8.bf16 %v1128_v19  ;;  %v1206_v22 = vunpack.c.h.s8.bf16 %v1127_v18 }
 0x14b   :  { %1768 = vmatprep.subr.bf16.mxu0 %v6924_v24  ;;  %1850 = vmatprep.subr.bf16.mxu1 %v6926_v25  ;;  %v1208_v24 = vunpack.c.h.s8.bf16 %v1128_v19 }
 0x14c   :  { %v6948_v25 = vcombine.high %v1205_v20, %v1207_v21  ;;  %v6947_v27 = vcombine.low %v1205_v20, %v1207_v21  ;;  %v1218_v20 = vunpack.c.h.s8.bf16 %v1133_v7 }
 0x14d   :  { %v6950_v26 = vcombine.high %v1206_v22, %v1208_v24  ;;  %v6949_v28 = vcombine.low %v1206_v22, %v1208_v24  ;;  %v1136_v22 = vld [vmem:[#allocation5 + $0x128] sm:$0xff] }
 0x14e   :  { %1769 = vmatpush1.bf16.msra.mxu0 %v6923_v33  ;;  %1851 = vmatpush1.bf16.msra.mxu1 %v6925_v34  ;;  %v1211_v33 = vunpack.c.l.s8.bf16 %v1130_v31  ;;  %v1210_v34 = vunpack.c.h.s8.bf16 %v1129_v29  ;;  %v1224_v31 = vunpack.c.h.s8.bf16 %v1136_v22 }
 0x14f   :  { %1770 = vmatprep.subr.bf16.mxu0 %v6928_v58  ;;  %1852 = vmatprep.subr.bf16.mxu1 %v6930_v39  ;;  %v1131_v39 = vld [vmem:[#allocation5 + $0x100] sm:$0xff] }
 0x150   :  { %v6952_v36 = vcombine.high %v1209_v32, %v1211_v33  ;;  %v6954_v37 = vcombine.high %v1210_v34, %v1212_v35  ;;  %v6951_v38 = vcombine.low %v1209_v32, %v1211_v33  ;;  %v6953_v58 = vcombine.low %v1210_v34, %v1212_v35  ;;  %v1137_v32 = vld [vmem:[#allocation5 + $0x130] sm:$0xff]  ;;  %v1138_v33 = vld [vmem:[#allocation5 + $0x138] sm:$0xff] }
 0x151   :  { %v1213_v41 = vunpack.c.l.s8.bf16 %v1131_v39 }
 0x152   :  { %1771 = vmatpush1.bf16.msra.mxu0 %v6927_v42  ;;  %1853 = vmatpush1.bf16.msra.mxu1 %v6929_v43  ;;  %v1215_v42 = vunpack.c.l.s8.bf16 %v1132_v40  ;;  %v1214_v43 = vunpack.c.h.s8.bf16 %v1131_v39  ;;  %v1227_v39 = vunpack.c.l.s8.bf16 %v1138_v33 }
 0x153   :  { %1772 = vmatprep.subr.bf16.mxu0 %v6932_v44  ;;  %1854 = vmatprep.subr.bf16.mxu1 %v6934_v45  ;;  %v1216_v44 = vunpack.c.h.s8.bf16 %v1132_v40  ;;  %v1226_v40 = vunpack.c.h.s8.bf16 %v1137_v32 }
 0x154   :  { %v6956_v45 = vcombine.high %v1213_v41, %v1215_v42  ;;  %v6955_v47 = vcombine.low %v1213_v41, %v1215_v42  ;;  %v1228_v41 = vunpack.c.h.s8.bf16 %v1138_v33  ;;  %v1148_v33 = vld [vmem:[#allocation5 + $0x188] sm:$0xff] }
 0x155   :  { %v6958_v46 = vcombine.high %v1214_v43, %v1216_v44  ;;  %v6957_v48 = vcombine.low %v1214_v43, %v1216_v44  ;;  %v1139_v44 = vld [vmem:[#allocation5 + $0x140] sm:$0xff] }
 0x156   :  { %1773 = vmatpush1.bf16.msra.mxu0 %v6931_v51  ;;  %1855 = vmatpush1.bf16.msra.mxu1 %v6933_v52  ;;  %v1048_v51 = vrot.slane %v8154_v49, %v8130_v61  ;;  %v1056_v52 = vrot.slane %v8154_v49, %v8137_v12 }
 0x157   :  { %1774 = vmatprep.subr.bf16.mxu0 %v6936_v62  ;;  %1856 = vmatprep.subr.bf16.mxu1 %v6938_v63  ;;  %v1082_v62 = vrot.slane %v8159_v50, %v8137_v12 }
 0x15a   :  { %1775 = vmatpush1.bf16.msra.mxu0 %v6935_v30  ;;  %1857 = vmatpush1.bf16.msra.mxu1 %v6937_v3 }
 0x15b   :  { %1776 = vmatprep.subr.bf16.mxu0 %v6940_v4  ;;  %1858 = vmatprep.subr.bf16.mxu1 %v6942_v5 }
 0x15e   :  { %1777 = vmatpush1.bf16.msra.mxu0 %v6939_v11  ;;  %1859 = vmatpush1.bf16.msra.mxu1 %v6941_v13  ;;  %v1134_v11 = vld [vmem:[#allocation5 + $0x118] sm:$0xff] }
 0x15f   :  { %1778 = vmatprep.subr.bf16.mxu0 %v6944_v14  ;;  %1860 = vmatprep.subr.bf16.mxu1 %v6946_v15  ;;  %v1219_v19 = vunpack.c.l.s8.bf16 %v1134_v11  ;;  %v1220_v21 = vunpack.c.h.s8.bf16 %v1134_v11 }
 0x161   :  { %v6962_v35 = vcombine.high %v1218_v20, %v1220_v21 }
 0x162   :  { %1779 = vmatpush1.bf16.msra.mxu0 %v6943_v16  ;;  %1861 = vmatpush1.bf16.msra.mxu1 %v6945_v17  ;;  %v1217_v16 = vunpack.c.l.s8.bf16 %v1133_v7  ;;  %v1135_v17 = vld [vmem:[#allocation5 + $0x120] sm:$0xff] }
 0x163   :  { %1780 = vmatprep.subr.bf16.mxu0 %v6948_v25  ;;  %1862 = vmatprep.subr.bf16.mxu1 %v6950_v26  ;;  %v1221_v26 = vunpack.c.l.s8.bf16 %v1135_v17  ;;  %v1222_v29 = vunpack.c.h.s8.bf16 %v1135_v17 }
 0x164   :  { %v6960_v34 = vcombine.high %v1217_v16, %v1219_v19 }
 0x165   :  { %v6966_v43 = vcombine.high %v1222_v29, %v1224_v31 }
 0x166   :  { %1781 = vmatpush1.bf16.msra.mxu0 %v6947_v27  ;;  %1863 = vmatpush1.bf16.msra.mxu1 %v6949_v28  ;;  %v1223_v28 = vunpack.c.l.s8.bf16 %v1136_v22 }
 0x167   :  { %1782 = vmatprep.subr.bf16.mxu0 %v6952_v36  ;;  %1864 = vmatprep.subr.bf16.mxu1 %v6954_v37  ;;  %v6959_v37 = vcombine.low %v1217_v16, %v1219_v19  ;;  %v1145_v19 = vld [vmem:[#allocation5 + $0x170] sm:$0xff] }
 0x168   :  { %v6964_v42 = vcombine.high %v1221_v26, %v1223_v28 }
 0x16a   :  { %1783 = vmatpush1.bf16.msra.mxu0 %v6951_v38  ;;  %1865 = vmatpush1.bf16.msra.mxu1 %v6953_v58  ;;  %v6961_v38 = vcombine.low %v1218_v20, %v1220_v21  ;;  %v1225_v58 = vunpack.c.l.s8.bf16 %v1137_v32  ;;  %v1146_v20 = vld [vmem:[#allocation5 + $0x178] sm:$0xff]  ;;  %v1147_v32 = vld [vmem:[#allocation5 + $0x180] sm:$0xff] }
 0x16b   :  { %1793 = vmatprep.subr.bf16.mxu0 %v6956_v45  ;;  %1875 = vmatprep.subr.bf16.mxu1 %v6958_v46  ;;  %v1140_v45 = vld [vmem:[#allocation5 + $0x148] sm:$0xff]  ;;  %v6963_v46 = vcombine.low %v1221_v26, %v1223_v28  ;;  %v1242_v26 = vunpack.c.h.s8.bf16 %v1145_v19  ;;  %v1052_v28 = vrot.slane %v8154_v49, %v8146_v23  ;;  %v1247_v49 = vunpack.c.l.s8.bf16 %v1148_v33 }
 0x200   :  { %v950_v54 = vpop.f32.mrb[0].mxu0  ;;  %v8169_v55 = vpop.f32.mrb[8].mxu1 }
 0x201   :  { %v1061_v63 = vmul.f32 %v1044_v60, %v950_v54  ;;  %v952_v1 = vpop.f32.mrb[1].mxu0  ;;  %v1034_v2 = vpop.f32.mrb[9].mxu1  ;;  %v6965_v60 = vcombine.low %v1222_v29, %v1224_v31  ;;  %v1232_v54 = vunpack.c.h.s8.bf16 %v1140_v45 }
 0x202   :  { %v1062_v30 = vmul.f32 %v1048_v51, %v952_v1  ;;  %v1064_v3 = vmul.f32 %v1056_v52, %v1034_v2  ;;  %v954_v4 = vpop.f32.mrb[2].mxu0  ;;  %v1036_v5 = vpop.f32.mrb[10].mxu1  ;;  %v1229_v51 = vunpack.c.l.s8.bf16 %v1139_v44  ;;  %v1231_v52 = vunpack.c.l.s8.bf16 %v1140_v45 }
 0x203   :  { %v1087_v8 = vadd.f32 %v1070_v53, %v1061_v63  ;;  %v955_v9 = vpop.f32.mrb[3].mxu0  ;;  %v1037_v10 = vpop.f32.mrb[11].mxu1  ;;  %v1230_v53 = vunpack.c.h.s8.bf16 %v1139_v44  ;;  %v6967_v63 = vcombine.low %v1225_v58, %v1227_v39  ;;  %v6969_v1 = vcombine.low %v1226_v40, %v1228_v41 }
 0x204   :  { %v1088_v13 = vadd.f32 %v1074_v56, %v1062_v30  ;;  %v1090_v14 = vadd.f32 %v1082_v62, %v1064_v3  ;;  %v1141_v56 = vld [vmem:[#allocation5 + $0x150] sm:$0xff]  ;;  %v1142_v62 = vld [vmem:[#allocation5 + $0x158] sm:$0xff]  ;;  %v6972_v5 = vcombine.high %v1229_v51, %v1231_v52  ;;  %v1144_v9 = vld [vmem:[#allocation5 + $0x168] sm:$0xff]  ;;  %v6971_v10 = vcombine.low %v1229_v51, %v1231_v52 }
 0x205   :  { %v1091_v15 = vmax.f32 %v1087_v8, 0.0  ;;  %v1233_v2 = vunpack.c.l.s8.bf16 %v1141_v56  ;;  %v1235_v30 = vunpack.c.l.s8.bf16 %v1142_v62  ;;  %v1234_v3 = vunpack.c.h.s8.bf16 %v1141_v56  ;;  %v1143_v8 = vld [vmem:[#allocation5 + $0x160] sm:$0xff]  ;;  %v7742_v51 = vld [vmem:[%s8810_s9] sm:$0xff]   ;;  %v7745_v56 = vld [vmem:[%s8810_s9 + $0x8] sm:$0xff]  }
 0x206   :  { %v1092_v18 = vmax.f32 %v1088_v13, 0.0  ;;  %v1094_v24 = vmax.f32 %v1090_v14, 0.0  ;;  %v1236_v4 = vunpack.c.h.s8.bf16 %v1142_v62  ;;  %v6974_v7 = vcombine.high %v1230_v53, %v1232_v54  ;;  %v7747_v62 = vld [vmem:[%s8810_s9 + $0x50] sm:$0xff]  }
 0x207   :  { %v1095_v27 = vpack.c.bf16 %v1091_v15, %v1091_v15  ;;  %v6973_v11 = vcombine.low %v1230_v53, %v1232_v54  ;;  %v6976_v13 = vcombine.high %v1233_v2, %v1235_v30  ;;  %v1237_v15 = vunpack.c.l.s8.bf16 %v1143_v8  ;;  %v7744_v53 = vld [vmem:[%s8810_s9 + $0x48] sm:$0xff]  }
 0x208   :  { %v1096_v25 = vpack.c.bf16 %v1092_v18, %v1092_v18  ;;  %v1098_v36 = vpack.c.bf16 %v1094_v24, %v1094_v24  ;;  %v6978_v14 = vcombine.high %v1234_v3, %v1236_v4  ;;  %v1239_v16 = vunpack.c.l.s8.bf16 %v1144_v9  ;;  %v7743_v54 = vld [vmem:[%s8810_s9 + $0x88] sm:$0xff]  }
 0x209   :  { %v1238_v17 = vunpack.c.h.s8.bf16 %v1143_v8  ;;  %v1240_v18 = vunpack.c.h.s8.bf16 %v1144_v9  ;;  %v6975_v21 = vcombine.low %v1233_v2, %v1235_v30  ;;  %v6977_v22 = vcombine.low %v1234_v3, %v1236_v4  ;;  %v7750_v2 = vld [vmem:[%s8810_s9 + $0x58] sm:$0xff]   ;;  %v7753_v4 = vld [vmem:[%s8810_s9 + $0x60] sm:$0xff]   ;;  %v7756_v8 = vld [vmem:[%s8810_s9 + $0x68] sm:$0xff]  }
 0x20a   :  { %1784 = vmatprep.mubr.bf16.mxu0 %v1096_v25  ;;  %1866 = vmatprep.mubr.bf16.mxu1 %v1096_v25  ;;  %v1241_v24 = vunpack.c.l.s8.bf16 %v1145_v19  ;;  %v1243_v25 = vunpack.c.l.s8.bf16 %v1146_v20  ;;  %v6980_v29 = vcombine.high %v1237_v15, %v1239_v16  ;;  %v7749_v30 = vld [vmem:[%s8810_s9 + $0x98] sm:$0xff]   ;;  %v7755_v9 = vld [vmem:[%s8810_s9 + $0xa8] sm:$0xff]   ;;  %v7022_v19 = vld [vmem:[%s8802_s1 + $0x10] sm:$0xff] }
 0x20b   :  { %1785 = vmatmul.mubr.bf16.vlgmr.msra.gmra.mrb[4].mxu0 %v1095_v27  ;;  %1867 = vmatmul.mubr.bf16.vlgmr.msra.gmra.mrb[12].mxu1 %v1095_v27  ;;  %v1244_v27 = vunpack.c.h.s8.bf16 %v1146_v20  ;;  %v6982_v31 = vcombine.high %v1238_v17, %v1240_v18  ;;  %v7751_v3 = vld [vmem:[%s8810_s9 + $0x18] sm:$0xff]   ;;  %v7026_v20 = vcombine.high %v7022_v19, %v7022_v19 }
 0x20c   :  { %1794 = vmatpush1.bf16.msra.mxu0 %v6955_v47  ;;  %1876 = vmatpush1.bf16.msra.mxu1 %v6957_v48  ;;  %v6968_v47 = vcombine.high %v1225_v58, %v1227_v39  ;;  %v6970_v48 = vcombine.high %v1226_v40, %v1228_v41  ;;  %v1245_v58 = vunpack.c.l.s8.bf16 %v1147_v32  ;;  %v1063_v39 = vmul.f32 %v1052_v28, %v8169_v55  ;;  %v7741_v55 = vld [vmem:[%s8810_s9 + $0x40] sm:$0xff]  }
 0x20d   :  { %6991 = vmatprep.mubr.msk.bf16.mxu0 %vm871_vm2, %v1098_v36  ;;  %6992 = vmatprep.mubr.msk.bf16.mxu1 %vm871_vm2, %v1098_v36  ;;  %v6981_v36 = vcombine.low %v1238_v17, %v1240_v18  ;;  %v1246_v40 = vunpack.c.h.s8.bf16 %v1147_v32  ;;  %v1248_v41 = vunpack.c.h.s8.bf16 %v1148_v33  ;;  %v7763_v17 = vld [vmem:[%s8810_s9 + $0x38] sm:$0xff]   ;;  %v7764_v18 = vld [vmem:[%s8810_s9 + $0xc0] sm:$0xff]  }
 0x20e   :  { %1795 = vmatprep.subr.bf16.mxu0 %v6960_v34  ;;  %1877 = vmatprep.subr.bf16.mxu1 %v6962_v35  ;;  %v1078_v34 = vrot.slane %v8159_v50, %v8146_v23  ;;  %v6979_v35 = vcombine.low %v1237_v15, %v1239_v16  ;;  %v6988_v50 = vcombine.high %v1245_v58, %v1247_v49  ;;  %v7761_v15 = vld [vmem:[%s8810_s9 + $0xb8] sm:$0xff]  }
 0x20f   :  { %v6990_v45 = vcombine.high %v1246_v40, %v1248_v41  ;;  %v7762_v16 = vld [vmem:[%s8810_s9 + $0x78] sm:$0xff]  }
 0x210   :  { %1796 = vmatpush1.bf16.msra.mxu0 %v6959_v37  ;;  %1878 = vmatpush1.bf16.msra.mxu1 %v6961_v38  ;;  %v6984_v37 = vcombine.high %v1241_v24, %v1243_v25  ;;  %v6986_v38 = vcombine.high %v1242_v26, %v1244_v27  ;;  %v1089_v44 = vadd.f32 %v1078_v34, %v1063_v39 }
 0x211   :  { %1797 = vmatprep.subr.bf16.mxu0 %v6964_v42  ;;  %1879 = vmatprep.subr.bf16.mxu1 %v6966_v43  ;;  %v6983_v42 = vcombine.low %v1241_v24, %v1243_v25  ;;  %v6985_v43 = vcombine.low %v1242_v26, %v1244_v27  ;;  %v1916_v24 = vld [vmem:[%s8808_s7] sm:$0xf] }
 0x212   :  { %v1942_v25 = vld [vmem:[%s8809_s8] sm:$0xf]  ;;  %v1921_v26 = vrot.slane %v1916_v24, %v8122_v59  ;;  %v1929_v27 = vrot.slane %v1916_v24, %v8146_v23  ;;  %v1925_v28 = vrot.slane %v1916_v24, %v8130_v61 }
 0x213   :  { %v1955_v32 = vrot.slane %v1942_v25, %v8146_v23 }
 0x214   :  { %1798 = vmatpush1.bf16.msra.mxu0 %v6963_v46  ;;  %1880 = vmatpush1.bf16.msra.mxu1 %v6965_v60  ;;  %v6987_v46 = vcombine.low %v1245_v58, %v1247_v49  ;;  %v6989_v60 = vcombine.low %v1246_v40, %v1248_v41 }
 0x215   :  { %1799 = vmatprep.subr.bf16.mxu0 %v6968_v47  ;;  %1881 = vmatprep.subr.bf16.mxu1 %v6970_v48  ;;  %v1093_v47 = vmax.f32 %v1089_v44, 0.0  ;;  %v7740_v48 = vld [vmem:[%s8810_s9 + $0x80] sm:$0xff]   ;;  %v2453_v44 = vld [vmem:[#allocation2 + $0x198] sm:$0xff] }
 0x217   :  { %v1097_v52 = vpack.c.bf16 %v1093_v47, %v1093_v47 }
 0x218   :  { %1800 = vmatpush1.bf16.msra.mxu0 %v6967_v63  ;;  %1882 = vmatpush1.bf16.msra.mxu1 %v6969_v1  ;;  %v7746_v63 = vld [vmem:[%s8810_s9 + $0x90] sm:$0xff]  }
 0x219   :  { %1801 = vmatprep.subr.bf16.mxu0 %v6972_v5  ;;  %1883 = vmatprep.subr.bf16.mxu1 %v6974_v7  ;;  %v7748_v1 = vld [vmem:[%s8810_s9 + $0x10] sm:$0xff]   ;;  %v7752_v5 = vld [vmem:[%s8810_s9 + $0xa0] sm:$0xff]  }
 0x21a   :  { %v7754_v7 = vld [vmem:[%s8810_s9 + $0x20] sm:$0xff]  }
 0x21c   :  { %1802 = vmatpush1.bf16.msra.mxu0 %v6971_v10  ;;  %1884 = vmatpush1.bf16.msra.mxu1 %v6973_v11  ;;  %v7757_v10 = vld [vmem:[%s8810_s9 + $0x28] sm:$0xff]   ;;  %v7758_v11 = vld [vmem:[%s8810_s9 + $0xb0] sm:$0xff]  }
 0x21d   :  { %1803 = vmatprep.subr.bf16.mxu0 %v6976_v13  ;;  %1885 = vmatprep.subr.bf16.mxu1 %v6978_v14  ;;  %v7759_v13 = vld [vmem:[%s8810_s9 + $0x70] sm:$0xff]  }
 0x21e   :  { %v7760_v14 = vld [vmem:[%s8810_s9 + $0x30] sm:$0xff]  }
 0x220   :  { %1804 = vmatpush1.bf16.msra.mxu0 %v6975_v21  ;;  %1886 = vmatpush1.bf16.msra.mxu1 %v6977_v22  ;;  %v7023_v21 = vld [vmem:[%s8802_s1 + $0x18] sm:$0xff] }
 0x221   :  { %1805 = vmatprep.subr.bf16.mxu0 %v6980_v29  ;;  %1887 = vmatprep.subr.bf16.mxu1 %v6982_v31  ;;  %v7028_v22 = vcombine.high %v7023_v21, %v7023_v21  ;;  %v1933_v29 = vrot.slane %v1916_v24, %v8137_v12  ;;  %v1947_v31 = vrot.slane %v1942_v25, %v8122_v59 }
 0x224   :  { %1806 = vmatpush1.bf16.msra.mxu0 %v6979_v35  ;;  %1888 = vmatpush1.bf16.msra.mxu1 %v6981_v36  ;;  %v1951_v35 = vrot.slane %v1942_v25, %v8130_v61  ;;  %v1959_v36 = vrot.slane %v1942_v25, %v8137_v12 }
 0x225   :  { %1807 = vmatprep.subr.bf16.mxu0 %v6984_v37  ;;  %1889 = vmatprep.subr.bf16.mxu1 %v6986_v38 }
 0x228   :  { %1808 = vmatpush1.bf16.msra.mxu0 %v6983_v42  ;;  %1890 = vmatpush1.bf16.msra.mxu1 %v6985_v43  ;;  %v2452_v43 = vld [vmem:[#allocation2 + $0x190] sm:$0xff] }
 0x229   :  { %1809 = vmatprep.subr.bf16.mxu0 %v6988_v50  ;;  %1891 = vmatprep.subr.bf16.mxu1 %v6990_v45 }
 0x22c   :  { %1810 = vmatpush1.bf16.msra.mxu0 %v6987_v46  ;;  %1892 = vmatpush1.bf16.msra.mxu1 %v6989_v60 }
 0x22d   :  { %2226 = vmatprep.subr.bf16.mxu1 %v7927_v0  ;;  %7616 = vmatprep.subr.bf16.mxu0 %v7741_v55 }
 0x22f   :  { %1826 = vmatmul.mubr.bf16.vlgmr.msra.gmra.mrb[4].mxu0 %v1097_v52  ;;  %1908 = vmatmul.mubr.bf16.vlgmr.msra.gmra.mrb[12].mxu1 %v1097_v52 }
 0x230   :  { %2227 = vmatpush1.bf16.msra.mxu1 %v7740_v48  ;;  %7617 = vmatpush3.bf16.msra.mxu0 %v7742_v51  ;;  %v7025_v48 = vcombine.low %v7022_v19, %v7022_v19  ;;  %v7027_v51 = vcombine.low %v7023_v21, %v7023_v21  ;;  %v2457_v19 = vld [vmem:[#allocation2 + $0x1b8] sm:$0xff] }
 0x231   :  { %2228 = vmatprep.subr.bf16.mxu1 %v7927_v0  ;;  %7618 = vmatprep.subr.bf16.mxu0 %v7744_v53  ;;  %v2512_v24 = vunpack.c.l.s8.bf16 %v2457_v19 }
 0x234   :  { %2229 = vmatpush1.bf16.msra.mxu1 %v7743_v54  ;;  %7619 = vmatpush3.bf16.msra.mxu0 %v7745_v56  ;;  %v2502_v54 = vunpack.c.l.s8.bf16 %v2452_v43  ;;  %v2504_v56 = vunpack.c.l.s8.bf16 %v2453_v44 }
 0x235   :  { %2230 = vmatprep.subr.bf16.mxu1 %v7927_v0  ;;  %7620 = vmatprep.subr.bf16.mxu0 %v7747_v62 }
 0x238   :  { %2231 = vmatpush1.bf16.msra.mxu1 %v7746_v63  ;;  %7621 = vmatpush3.bf16.msra.mxu0 %v7748_v1  ;;  %v2503_v1 = vunpack.c.h.s8.bf16 %v2452_v43 }
 0x239   :  { %2232 = vmatprep.subr.bf16.mxu1 %v7927_v0  ;;  %7622 = vmatprep.subr.bf16.mxu0 %v7750_v2  ;;  %v2505_v2 = vunpack.c.h.s8.bf16 %v2453_v44 }
 0x23b   :  { %v7035_v21 = vcombine.low %v2503_v1, %v2505_v2 }
 0x23c   :  { %2233 = vmatpush1.bf16.msra.mxu1 %v7749_v30  ;;  %7623 = vmatpush3.bf16.msra.mxu0 %v7751_v3 }
 0x23d   :  { %2234 = vmatprep.subr.bf16.mxu1 %v7927_v0  ;;  %7624 = vmatprep.subr.bf16.mxu0 %v7753_v4 }
 0x240   :  { %2235 = vmatpush1.bf16.msra.mxu1 %v7752_v5  ;;  %7625 = vmatpush3.bf16.msra.mxu0 %v7754_v7  ;;  %v2350_v7 = vsel %vm118_vm0, %v7025_v48, 0 }
 0x241   :  { %2236 = vmatprep.subr.bf16.mxu1 %v7927_v0  ;;  %7626 = vmatprep.subr.bf16.mxu0 %v7756_v8  ;;  %v2356_v8 = vsel %vm118_vm0, %v7027_v51, 0 }
 0x244   :  { %2237 = vmatpush1.bf16.msra.mxu1 %v7755_v9  ;;  %7627 = vmatpush3.bf16.msra.mxu0 %v7757_v10  ;;  %v7034_v9 = vcombine.high %v2502_v54, %v2504_v56  ;;  %v7036_v10 = vcombine.high %v2503_v1, %v2505_v2  ;;  %v2465_v1 = vld [vmem:[#allocation2 + $0x1f8] sm:$0xff] }
 0x245   :  { %2238 = vmatprep.subr.bf16.mxu1 %v7927_v0  ;;  %7628 = vmatprep.subr.bf16.mxu0 %v7759_v13  ;;  %v2455_v13 = vld [vmem:[#allocation2 + $0x1a8] sm:$0xff] }
 0x248   :  { %2239 = vmatpush1.bf16.msra.mxu1 %v7758_v11  ;;  %7629 = vmatpush3.bf16.msra.mxu0 %v7760_v14  ;;  %v2454_v11 = vld [vmem:[#allocation2 + $0x1a0] sm:$0xff] }
 0x249   :  { %2240 = vmatprep.subr.bf16.mxu1 %v7927_v0  ;;  %7630 = vmatprep.subr.bf16.mxu0 %v7762_v16  ;;  %v2506_v14 = vunpack.c.l.s8.bf16 %v2454_v11  ;;  %v2507_v16 = vunpack.c.h.s8.bf16 %v2454_v11  ;;  %v2467_v11 = vld [vmem:[#allocation2 + $0x208] sm:$0xff] }
 0x24c   :  { %2241 = vmatpush1.bf16.msra.mxu1 %v7761_v15  ;;  %7631 = vmatpush3.bf16.msra.mxu0 %v7763_v17  ;;  %v2508_v15 = vunpack.c.l.s8.bf16 %v2455_v13  ;;  %v2509_v17 = vunpack.c.h.s8.bf16 %v2455_v13 }
 0x24d   :  { %2242 = vmatprep.subr.bf16.mxu1 %v7927_v0  ;;  %7029 = vmatprep.subr.msk.bf16.mxu0 %vm118_vm0, %v7026_v20  ;;  %v7033_v20 = vcombine.low %v2502_v54, %v2504_v56 }
 0x250   :  { %2243 = vmatpush1.bf16.msra.mxu1 %v7764_v18  ;;  %v2456_v18 = vld [vmem:[#allocation2 + $0x1b0] sm:$0xff] }
 0x251   :  { %7031 = vmatprep.subr.msk.bf16.mxu1 %vm118_vm0, %v7028_v22  ;;  %v2510_v22 = vunpack.c.l.s8.bf16 %v2456_v18  ;;  %v2511_v25 = vunpack.c.h.s8.bf16 %v2456_v18  ;;  %v2532_v18 = vunpack.c.l.s8.bf16 %v2467_v11 }
 0x302   :  { %v1827_v33 = vpop.f32.mrb[4].mxu0  ;;  %v1909_v34 = vpop.f32.mrb[12].mxu1 }
 0x303   :  { %v1938_v37 = vmul.f32 %v1921_v26, %v1827_v33  ;;  %v1940_v38 = vmul.f32 %v1929_v27, %v1909_v34  ;;  %v1829_v58 = vpop.f32.mrb[5].mxu0  ;;  %v1911_v39 = vpop.f32.mrb[13].mxu1  ;;  %v2513_v26 = vunpack.c.h.s8.bf16 %v2457_v19  ;;  %v7038_v27 = vcombine.high %v2506_v14, %v2508_v15 }
 0x304   :  { %v1939_v49 = vmul.f32 %v1925_v28, %v1829_v58  ;;  %v1941_v40 = vmul.f32 %v1933_v29, %v1911_v39  ;;  %v1831_v41 = vpop.f32.mrb[6].mxu0  ;;  %v1913_v42 = vpop.f32.mrb[14].mxu1  ;;  %v7040_v28 = vcombine.high %v2507_v16, %v2509_v17  ;;  %v2458_v29 = vld [vmem:[#allocation2 + $0x1c0] sm:$0xff]  ;;  %v7039_v33 = vcombine.low %v2507_v16, %v2509_v17  ;;  %v2460_v39 = vld [vmem:[#allocation2 + $0x1d0] sm:$0xff] }
 0x305   :  { %v1964_v50 = vadd.f32 %v1947_v31, %v1938_v37  ;;  %v1966_v45 = vadd.f32 %v1955_v32, %v1940_v38  ;;  %v1832_v46 = vpop.f32.mrb[7].mxu0  ;;  %v1914_v60 = vpop.f32.mrb[15].mxu1  ;;  %v2459_v31 = vld [vmem:[#allocation2 + $0x1c8] sm:$0xff]  ;;  %v7037_v32 = vcombine.low %v2506_v14, %v2508_v15  ;;  %v7042_v34 = vcombine.high %v2510_v22, %v2512_v24 }
 0x306   :  { %v1965_v47 = vadd.f32 %v1951_v35, %v1939_v49  ;;  %v1967_v55 = vadd.f32 %v1959_v36, %v1941_v40  ;;  %v7044_v35 = vcombine.high %v2511_v25, %v2513_v26  ;;  %v2514_v36 = vunpack.c.l.s8.bf16 %v2458_v29  ;;  %v2461_v49 = vld [vmem:[#allocation2 + $0x1d8] sm:$0xff]  ;;  %v2462_v60 = vld [vmem:[#allocation2 + $0x1e0] sm:$0xff] }
 0x307   :  { %v1968_v52 = vmax.f32 %v1964_v50, 0.0  ;;  %v1970_v53 = vmax.f32 %v1966_v45, 0.0  ;;  %v2516_v37 = vunpack.c.l.s8.bf16 %v2459_v31  ;;  %v2515_v38 = vunpack.c.h.s8.bf16 %v2458_v29 }
 0x308   :  { %v1969_v62 = vmax.f32 %v1965_v47, 0.0  ;;  %v1971_v63 = vmax.f32 %v1967_v55, 0.0  ;;  %v2517_v58 = vunpack.c.h.s8.bf16 %v2459_v31  ;;  %v7041_v40 = vcombine.low %v2510_v22, %v2512_v24  ;;  %v2463_v47 = vld [vmem:[#allocation2 + $0x1e8] sm:$0xff]  ;;  %v2469_v22 = vld [vmem:[#allocation2 + $0x218] sm:$0xff] }
 0x309   :  { %v1972_v4 = vpack.c.bf16 %v1968_v52, %v1968_v52  ;;  %v1974_v5 = vpack.c.bf16 %v1970_v53, %v1970_v53  ;;  %v7043_v41 = vcombine.low %v2511_v25, %v2513_v26  ;;  %v2518_v42 = vunpack.c.l.s8.bf16 %v2460_v39 }
 0x30a   :  { %v1973_v30 = vpack.c.bf16 %v1969_v62, %v1969_v62  ;;  %v1975_v3 = vpack.c.bf16 %v1971_v63, %v1971_v63  ;;  %v2520_v43 = vunpack.c.l.s8.bf16 %v2461_v49  ;;  %v2519_v44 = vunpack.c.h.s8.bf16 %v2460_v39  ;;  %v2464_v63 = vld [vmem:[#allocation2 + $0x1f0] sm:$0xff] }
 0x30b   :  { %v2521_v50 = vunpack.c.h.s8.bf16 %v2461_v49  ;;  %v7046_v45 = vcombine.high %v2514_v36, %v2516_v37  ;;  %v7048_v46 = vcombine.high %v2515_v38, %v2517_v58  ;;  %v7045_v55 = vcombine.low %v2514_v36, %v2516_v37 }
 0x30c   :  { %2218 = vmatprep.mubr.bf16.mxu0 %v1973_v30  ;;  %7019 = vmatprep.mubr.msk.bf16.mxu1 %vm871_vm2, %v1975_v3  ;;  %v7047_v48 = vcombine.low %v2515_v38, %v2517_v58  ;;  %v7050_v51 = vcombine.high %v2518_v42, %v2520_v43  ;;  %v2522_v53 = vunpack.c.l.s8.bf16 %v2462_v60  ;;  %v2524_v54 = vunpack.c.l.s8.bf16 %v2463_v47 }
 0x30d   :  { %2219 = vmatmul.mubr.bf16.vlgmr.msra.gmra.mrb[8].mxu0 %v1972_v4  ;;  %2259 = vmatmul.mubr.bf16.vlgmr.msra.gmra.mrb[16].mxu1 %v1974_v5  ;;  %v7052_v52 = vcombine.high %v2519_v44, %v2521_v50  ;;  %v2523_v56 = vunpack.c.h.s8.bf16 %v2462_v60  ;;  %v2525_v62 = vunpack.c.h.s8.bf16 %v2463_v47  ;;  %v7049_v2 = vcombine.low %v2518_v42, %v2520_v43  ;;  %v2473_v42 = vld [vmem:[#allocation2 + $0x238] sm:$0xff] }
 0x30e   :  { %2362 = vmatpush1.bf16.msra.mxu0 %v2350_v7  ;;  %2393 = vmatprep.mubr.bf16.mxu0 %v7927_v0  ;;  %v7051_v30 = vcombine.low %v2519_v44, %v2521_v50  ;;  %v2526_v3 = vunpack.c.l.s8.bf16 %v2464_v63  ;;  %v2528_v4 = vunpack.c.l.s8.bf16 %v2465_v1  ;;  %v2527_v5 = vunpack.c.h.s8.bf16 %v2464_v63 }
 0x30f   :  { %2403 = vmatpush1.bf16.msra.mxu1 %v2356_v8  ;;  %2434 = vmatprep.mubr.bf16.mxu1 %v7927_v0  ;;  %v2529_v7 = vunpack.c.h.s8.bf16 %v2465_v1  ;;  %v7054_v8 = vcombine.high %v2522_v53, %v2524_v54  ;;  %v7053_v13 = vcombine.low %v2522_v53, %v2524_v54  ;;  %v7055_v14 = vcombine.low %v2523_v56, %v2525_v62 }
 0x310   :  { %3105 = vmatprep.subr.bf16.mxu0 %v7034_v9  ;;  %3187 = vmatprep.subr.bf16.mxu1 %v7036_v10  ;;  %v7056_v9 = vcombine.high %v2523_v56, %v2525_v62  ;;  %v2466_v10 = vld [vmem:[#allocation2 + $0x200] sm:$0xff]  ;;  %v7058_v15 = vcombine.high %v2526_v3, %v2528_v4  ;;  %v7057_v24 = vcombine.low %v2526_v3, %v2528_v4  ;;  %v2537_v29 = vunpack.c.h.s8.bf16 %v2469_v22 }
 0x311   :  { %v7060_v16 = vcombine.high %v2527_v5, %v2529_v7  ;;  %v2530_v17 = vunpack.c.l.s8.bf16 %v2466_v10  ;;  %v2531_v19 = vunpack.c.h.s8.bf16 %v2466_v10  ;;  %v7059_v25 = vcombine.low %v2527_v5, %v2529_v7  ;;  %v2477_v10 = vld [vmem:[#allocation2 + $0x258] sm:$0xff] }
 0x312   :  { %v2545_v60 = vunpack.c.h.s8.bf16 %v2473_v42 }
 0x313   :  { %v7062_v31 = vcombine.high %v2530_v17, %v2532_v18 }
 0x315   :  { %7030 = vmatmul.mubr.msk.bf16.vlgmr.msra.gmra.mrb[12].mxu0 %vm114_vm1, %v8039_v6  ;;  %7032 = vmatmul.mubr.msk.bf16.vlgmr.msra.gmra.mrb[20].mxu1 %vm114_vm1, %v8039_v6 }
 0x316   :  { %3106 = vmatpush1.bf16.msra.mxu0 %v7033_v20  ;;  %3188 = vmatpush1.bf16.msra.mxu1 %v7035_v21  ;;  %v2533_v20 = vunpack.c.h.s8.bf16 %v2467_v11  ;;  %v2468_v21 = vld [vmem:[#allocation2 + $0x210] sm:$0xff] }
 0x317   :  { %3107 = vmatprep.subr.bf16.mxu0 %v7038_v27  ;;  %3189 = vmatprep.subr.bf16.mxu1 %v7040_v28  ;;  %v2534_v26 = vunpack.c.l.s8.bf16 %v2468_v21  ;;  %v2536_v27 = vunpack.c.l.s8.bf16 %v2469_v22  ;;  %v2535_v28 = vunpack.c.h.s8.bf16 %v2468_v21  ;;  %v2479_v21 = vld [vmem:[#allocation2 + $0x268] sm:$0xff] }
 0x318   :  { %v7063_v36 = vcombine.low %v2531_v19, %v2533_v20 }
 0x319   :  { %v7066_v37 = vcombine.high %v2534_v26, %v2536_v27  ;;  %v7068_v38 = vcombine.high %v2535_v28, %v2537_v29  ;;  %v7065_v43 = vcombine.low %v2534_v26, %v2536_v27  ;;  %v7067_v44 = vcombine.low %v2535_v28, %v2537_v29 }
 0x31a   :  { %3108 = vmatpush1.bf16.msra.mxu0 %v7037_v32  ;;  %3190 = vmatpush1.bf16.msra.mxu1 %v7039_v33  ;;  %v7064_v32 = vcombine.high %v2531_v19, %v2533_v20  ;;  %v2470_v33 = vld [vmem:[#allocation2 + $0x220] sm:$0xff]  ;;  %v2557_v26 = vunpack.c.h.s8.bf16 %v2479_v21 }
 0x31b   :  { %3109 = vmatprep.subr.bf16.mxu0 %v7042_v34  ;;  %3191 = vmatprep.subr.bf16.mxu1 %v7044_v35  ;;  %v2471_v34 = vld [vmem:[#allocation2 + $0x228] sm:$0xff]  ;;  %v7061_v35 = vcombine.low %v2530_v17, %v2532_v18  ;;  %v2538_v58 = vunpack.c.l.s8.bf16 %v2470_v33  ;;  %v2539_v49 = vunpack.c.h.s8.bf16 %v2470_v33  ;;  %v2478_v20 = vld [vmem:[#allocation2 + $0x260] sm:$0xff]  ;;  %v2481_v33 = vld [vmem:[#allocation2 + $0x278] sm:$0xff] }
 0x31c   :  { %v2540_v39 = vunpack.c.l.s8.bf16 %v2471_v34  ;;  %v2554_v22 = vunpack.c.l.s8.bf16 %v2478_v20 }
 0x31e   :  { %3110 = vmatpush1.bf16.msra.mxu0 %v7041_v40  ;;  %3192 = vmatpush1.bf16.msra.mxu1 %v7043_v41  ;;  %v2541_v40 = vunpack.c.h.s8.bf16 %v2471_v34  ;;  %v2472_v41 = vld [vmem:[#allocation2 + $0x230] sm:$0xff]  ;;  %v7070_v47 = vcombine.high %v2538_v58, %v2540_v39 }
 0x31f   :  { %3111 = vmatprep.subr.bf16.mxu0 %v7046_v45  ;;  %3193 = vmatprep.subr.bf16.mxu1 %v7048_v46  ;;  %v2542_v50 = vunpack.c.l.s8.bf16 %v2472_v41  ;;  %v2544_v45 = vunpack.c.l.s8.bf16 %v2473_v42  ;;  %v2543_v46 = vunpack.c.h.s8.bf16 %v2472_v41  ;;  %v2483_v41 = vld [vmem:[#allocation2 + $0x288] sm:$0xff] }
 0x320   :  { %v7071_v53 = vcombine.low %v2539_v49, %v2541_v40 }
 0x321   :  { %v7074_v54 = vcombine.high %v2542_v50, %v2544_v45  ;;  %v7076_v56 = vcombine.high %v2543_v46, %v2545_v60  ;;  %v7075_v3 = vcombine.low %v2543_v46, %v2545_v60 }
 0x322   :  { %3112 = vmatpush1.bf16.msra.mxu0 %v7045_v55  ;;  %3194 = vmatpush1.bf16.msra.mxu1 %v7047_v48  ;;  %v7072_v55 = vcombine.high %v2539_v49, %v2541_v40  ;;  %v2474_v48 = vld [vmem:[#allocation2 + $0x240] sm:$0xff] }
 0x323   :  { %3113 = vmatprep.subr.bf16.mxu0 %v7050_v51  ;;  %3195 = vmatprep.subr.bf16.mxu1 %v7052_v52  ;;  %v2475_v51 = vld [vmem:[#allocation2 + $0x248] sm:$0xff]  ;;  %v7069_v52 = vcombine.low %v2538_v58, %v2540_v39  ;;  %v2546_v62 = vunpack.c.l.s8.bf16 %v2474_v48  ;;  %v2547_v1 = vunpack.c.h.s8.bf16 %v2474_v48  ;;  %v2482_v40 = vld [vmem:[#allocation2 + $0x280] sm:$0xff]  ;;  %v2485_v48 = vld [vmem:[#allocation2 + $0x298] sm:$0xff] }
 0x324   :  { %v2548_v63 = vunpack.c.l.s8.bf16 %v2475_v51  ;;  %v2562_v42 = vunpack.c.l.s8.bf16 %v2482_v40 }
 0x326   :  { %3114 = vmatpush1.bf16.msra.mxu0 %v7049_v2  ;;  %3196 = vmatpush1.bf16.msra.mxu1 %v7051_v30  ;;  %v2549_v2 = vunpack.c.h.s8.bf16 %v2475_v51  ;;  %v7073_v30 = vcombine.low %v2542_v50, %v2544_v45  ;;  %v7078_v4 = vcombine.high %v2546_v62, %v2548_v63  ;;  %v7077_v7 = vcombine.low %v2546_v62, %v2548_v63 }
 0x327   :  { %3115 = vmatprep.subr.bf16.mxu0 %v7054_v8  ;;  %3197 = vmatprep.subr.bf16.mxu1 %v7056_v9  ;;  %v2476_v9 = vld [vmem:[#allocation2 + $0x250] sm:$0xff]  ;;  %v2565_v50 = vunpack.c.h.s8.bf16 %v2483_v41 }
 0x328   :  { %v7080_v5 = vcombine.high %v2547_v1, %v2549_v2  ;;  %v7079_v8 = vcombine.low %v2547_v1, %v2549_v2  ;;  %v2550_v11 = vunpack.c.l.s8.bf16 %v2476_v9 }
 0x32a   :  { %3116 = vmatpush1.bf16.msra.mxu0 %v7053_v13  ;;  %3198 = vmatpush1.bf16.msra.mxu1 %v7055_v14  ;;  %v2552_v13 = vunpack.c.l.s8.bf16 %v2477_v10  ;;  %v2551_v14 = vunpack.c.h.s8.bf16 %v2476_v9 }
 0x32b   :  { %3117 = vmatprep.subr.bf16.mxu0 %v7058_v15  ;;  %3199 = vmatprep.subr.bf16.mxu1 %v7060_v16  ;;  %v2553_v15 = vunpack.c.h.s8.bf16 %v2477_v10  ;;  %v8305_v10 = vld [vmem:[%s8803_s2 + $0x4] sm:$0xf] }
 0x32c   :  { %v7082_v16 = vcombine.high %v2550_v11, %v2552_v13  ;;  %v7081_v18 = vcombine.low %v2550_v11, %v2552_v13 }
 0x32d   :  { %v7084_v17 = vcombine.high %v2551_v14, %v2553_v15  ;;  %v7083_v19 = vcombine.low %v2551_v14, %v2553_v15  ;;  %v8310_v15 = vld [vmem:[%s8812_s11] ss:$0 sm:$0xff] }
 0x32e   :  { %3118 = vmatpush1.bf16.msra.mxu0 %v7057_v24  ;;  %3200 = vmatpush1.bf16.msra.mxu1 %v7059_v25  ;;  %v2556_v24 = vunpack.c.l.s8.bf16 %v2479_v21  ;;  %v2555_v25 = vunpack.c.h.s8.bf16 %v2478_v20  ;;  %v2486_v20 = vld [vmem:[#allocation2 + $0x2a0] sm:$0xff] }
 0x32f   :  { %3119 = vmatprep.subr.bf16.mxu0 %v7062_v31  ;;  %3201 = vmatprep.subr.bf16.mxu1 %v7064_v32  ;;  %v2480_v32 = vld [vmem:[#allocation2 + $0x270] sm:$0xff] }
 0x330   :  { %v7086_v27 = vcombine.high %v2554_v22, %v2556_v24  ;;  %v7088_v28 = vcombine.high %v2555_v25, %v2557_v26  ;;  %v7085_v29 = vcombine.low %v2554_v22, %v2556_v24  ;;  %v7087_v31 = vcombine.low %v2555_v25, %v2557_v26  ;;  %v2487_v24 = vld [vmem:[#allocation2 + $0x2a8] sm:$0xff] }
 0x331   :  { %v2558_v34 = vunpack.c.l.s8.bf16 %v2480_v32 }
 0x332   :  { %3120 = vmatpush1.bf16.msra.mxu0 %v7061_v35  ;;  %3202 = vmatpush1.bf16.msra.mxu1 %v7063_v36  ;;  %v2560_v35 = vunpack.c.l.s8.bf16 %v2481_v33  ;;  %v2559_v36 = vunpack.c.h.s8.bf16 %v2480_v32 }
 0x333   :  { %3121 = vmatprep.subr.bf16.mxu0 %v7066_v37  ;;  %3203 = vmatprep.subr.bf16.mxu1 %v7068_v38  ;;  %v2561_v37 = vunpack.c.h.s8.bf16 %v2481_v33  ;;  %v2570_v33 = vunpack.c.l.s8.bf16 %v2486_v20 }
 0x334   :  { %v7090_v38 = vcombine.high %v2558_v34, %v2560_v35  ;;  %v7089_v39 = vcombine.low %v2558_v34, %v2560_v35  ;;  %v2488_v34 = vld [vmem:[#allocation2 + $0x2b0] sm:$0xff]  ;;  %v2489_v35 = vld [vmem:[#allocation2 + $0x2b8] sm:$0xff] }
 0x335   :  { %v7092_v58 = vcombine.high %v2559_v36, %v2561_v37  ;;  %v7091_v49 = vcombine.low %v2559_v36, %v2561_v37 }
 0x336   :  { %3122 = vmatpush1.bf16.msra.mxu0 %v7065_v43  ;;  %3204 = vmatpush1.bf16.msra.mxu1 %v7067_v44  ;;  %v2564_v43 = vunpack.c.l.s8.bf16 %v2483_v41  ;;  %v2563_v44 = vunpack.c.h.s8.bf16 %v2482_v40  ;;  %v2573_v40 = vunpack.c.h.s8.bf16 %v2487_v24 }
 0x337   :  { %3123 = vmatprep.subr.bf16.mxu0 %v7070_v47  ;;  %3205 = vmatprep.subr.bf16.mxu1 %v7072_v55  ;;  %v2484_v55 = vld [vmem:[#allocation2 + $0x290] sm:$0xff] }
 0x338   :  { %v7094_v45 = vcombine.high %v2562_v42, %v2564_v43  ;;  %v7096_v46 = vcombine.high %v2563_v44, %v2565_v50  ;;  %v7093_v60 = vcombine.low %v2562_v42, %v2564_v43  ;;  %v7095_v47 = vcombine.low %v2563_v44, %v2565_v50 }
 0x339   :  { %v2566_v51 = vunpack.c.l.s8.bf16 %v2484_v55  ;;  %v2574_v50 = vunpack.c.l.s8.bf16 %v2488_v34 }
 0x33a   :  { %3124 = vmatpush1.bf16.msra.mxu0 %v7069_v52  ;;  %3206 = vmatpush1.bf16.msra.mxu1 %v7071_v53  ;;  %v2568_v52 = vunpack.c.l.s8.bf16 %v2485_v48  ;;  %v2567_v53 = vunpack.c.h.s8.bf16 %v2484_v55 }
 0x33b   :  { %3125 = vmatprep.subr.bf16.mxu0 %v7074_v54  ;;  %3207 = vmatprep.subr.bf16.mxu1 %v7076_v56  ;;  %v2569_v54 = vunpack.c.h.s8.bf16 %v2485_v48 }
 0x33c   :  { %v7098_v56 = vcombine.high %v2566_v51, %v2568_v52  ;;  %v8297_v63 = vcombine.low %v2566_v51, %v2568_v52  ;;  %v2490_v52 = vld [vmem:[#allocation2 + $0x2c0] sm:$0xff] }
 0x33d   :  { %v7100_v62 = vcombine.high %v2567_v53, %v2569_v54  ;;  %v7099_v1 = vcombine.low %v2567_v53, %v2569_v54  ;;  %v2491_v53 = vld [vmem:[#allocation2 + $0x2c8] sm:$0xff] }
 0x33e   :  { %3126 = vmatpush1.bf16.msra.mxu0 %v7073_v30  ;;  %3208 = vmatpush1.bf16.msra.mxu1 %v7075_v3  ;;  %v6993_v3 = vld [vmem:[%s8811_s10] ss:$0 sm:$0xff] }
 0x33f   :  { %3127 = vmatprep.subr.bf16.mxu0 %v7078_v4  ;;  %3209 = vmatprep.subr.bf16.mxu1 %v7080_v5 }
 0x342   :  { %3128 = vmatpush1.bf16.msra.mxu0 %v7077_v7  ;;  %3210 = vmatpush1.bf16.msra.mxu1 %v7079_v8 }
 0x343   :  { %3129 = vmatprep.subr.bf16.mxu0 %v7082_v16  ;;  %3211 = vmatprep.subr.bf16.mxu1 %v7084_v17  ;;  %v2322_v16 = vrot.slane %v8305_v10, %v8122_v59 }
 0x346   :  { %3130 = vmatpush1.bf16.msra.mxu0 %v7081_v18  ;;  %3212 = vmatpush1.bf16.msra.mxu1 %v7083_v19  ;;  %v2326_v18 = vrot.slane %v8305_v10, %v8130_v61  ;;  %v2334_v19 = vrot.slane %v8305_v10, %v8137_v12 }
 0x347   :  { %3131 = vmatprep.subr.bf16.mxu0 %v7086_v27  ;;  %3213 = vmatprep.subr.bf16.mxu1 %v7088_v28 }
 0x34a   :  { %3132 = vmatpush1.bf16.msra.mxu0 %v7085_v29  ;;  %3214 = vmatpush1.bf16.msra.mxu1 %v7087_v31 }
 0x34b   :  { %3133 = vmatprep.subr.bf16.mxu0 %v7090_v38  ;;  %3215 = vmatprep.subr.bf16.mxu1 %v7092_v58 }
 0x34e   :  { %3134 = vmatpush1.bf16.msra.mxu0 %v7089_v39  ;;  %3216 = vmatpush1.bf16.msra.mxu1 %v7091_v49  ;;  %v2572_v39 = vunpack.c.l.s8.bf16 %v2487_v24  ;;  %v2571_v49 = vunpack.c.h.s8.bf16 %v2486_v20  ;;  %v2494_v20 = vld [vmem:[#allocation2 + $0x2e0] sm:$0xff]  ;;  %v2495_v24 = vld [vmem:[#allocation2 + $0x2e8] sm:$0xff] }
 0x34f   :  { %3135 = vmatprep.subr.bf16.mxu0 %v7094_v45  ;;  %3217 = vmatprep.subr.bf16.mxu1 %v7096_v46  ;;  %v2576_v45 = vunpack.c.l.s8.bf16 %v2489_v35 }
 0x350   :  { %v7102_v48 = vcombine.high %v2570_v33, %v2572_v39  ;;  %v7104_v51 = vcombine.high %v2571_v49, %v2573_v40 }
 0x352   :  { %3136 = vmatpush1.bf16.msra.mxu0 %v7093_v60  ;;  %3218 = vmatpush1.bf16.msra.mxu1 %v7095_v47  ;;  %v2575_v60 = vunpack.c.h.s8.bf16 %v2488_v34  ;;  %v2577_v47 = vunpack.c.h.s8.bf16 %v2489_v35  ;;  %v2588_v34 = vunpack.c.l.s8.bf16 %v2495_v24  ;;  %v2587_v35 = vunpack.c.h.s8.bf16 %v2494_v20 }
 0x353   :  { %3146 = vmatprep.subr.bf16.mxu0 %v7098_v56  ;;  %3228 = vmatprep.subr.bf16.mxu1 %v7100_v62  ;;  %v7101_v56 = vcombine.low %v2570_v33, %v2572_v39  ;;  %v7103_v62 = vcombine.low %v2571_v49, %v2573_v40  ;;  %v2496_v33 = vld [vmem:[#allocation2 + $0x2f0] sm:$0xff] }
 0x354   :  { %v2590_v39 = vunpack.c.l.s8.bf16 %v2496_v33 }
 0x3e0   :  { %v7632_v2 = vpop.f32.mrb[8].mxu0  ;;  %v2260_v30 = vpop.f32.mrb[16].mxu1 }
 0x3e1   :  { %v7633_v4 = vpop.f32.mrb[9].mxu0  ;;  %v2262_v5 = vpop.f32.mrb[17].mxu1 }
 0x3e2   :  { %v7634_v7 = vadd.f32 %v7633_v4, %v7632_v2  ;;  %v7635_v8 = vpop.f32.mrb[10].mxu0  ;;  %v2263_v9 = vpop.f32.mrb[18].mxu1  ;;  %v7106_v2 = vcombine.high %v2574_v50, %v2576_v45  ;;  %v2580_v4 = vunpack.c.l.s8.bf16 %v2491_v53  ;;  %v2579_v5 = vunpack.c.h.s8.bf16 %v2490_v52 }
 0x3e3   :  { %v7636_v11 = vpop.f32.mrb[11].mxu0  ;;  %v2264_v13 = vpop.f32.mrb[19].mxu1  ;;  %v2492_v8 = vld [vmem:[#allocation2 + $0x2d0] sm:$0xff]  ;;  %v2493_v9 = vld [vmem:[#allocation2 + $0x2d8] sm:$0xff] }
 0x3e4   :  { %v2221_v14 = vadd.f32 %v7634_v7, %v6993_v3  ;;  %v2578_v3 = vunpack.c.l.s8.bf16 %v2490_v52  ;;  %v2581_v7 = vunpack.c.h.s8.bf16 %v2491_v53  ;;  %v7105_v11 = vcombine.low %v2574_v50, %v2576_v45  ;;  %v2498_v50 = vld [vmem:[#allocation2 + $0x300] sm:$0xff]  ;;  %v2499_v45 = vld [vmem:[#allocation2 + $0x308] sm:$0xff]  ;;  %v2500_v52 = vld [vmem:[#allocation2 + $0x310] sm:$0xff] }
 0x3e5   :  { %v7107_v13 = vcombine.low %v2575_v60, %v2577_v47  ;;  %v2501_v53 = vld [vmem:[#allocation2 + $0x318] sm:$0xff] }
 0x3e6   :  { %v8314_v17 = vadd.f32 %v2260_v30, %v2221_v14  ;;  %v7108_v30 = vcombine.high %v2575_v60, %v2577_v47  ;;  %v2583_v14 = vunpack.c.h.s8.bf16 %v2492_v8 }
 0x3e8   :  { %v8322_v21 = vsub.f32 %v8310_v15, %v8314_v17  ;;  %v2395_v22 = vpop.f32.mrb[12].mxu0  ;;  %v8324_v25 = vpop.f32.mrb[20].mxu1 }
 0x3e9   :  { %v2396_v26 = vadd.f32 %v2395_v22, %v2322_v16  ;;  %v2397_v27 = vpop.f32.mrb[13].mxu0  ;;  %v2438_v28 = vpop.f32.mrb[21].mxu1  ;;  %v2585_v16 = vunpack.c.h.s8.bf16 %v2493_v9 }
 0x3ea   :  { %v2274_v29 = vmin.f32 %v8322_v21, 20.0  ;;  %v2398_v31 = vadd.f32 %v2397_v27, %v2326_v18  ;;  %v2399_v32 = vpop.f32.mrb[14].mxu0  ;;  %v2439_v36 = vadd.f32 %v2438_v28, %v2334_v19  ;;  %v2440_v37 = vpop.f32.mrb[22].mxu1  ;;  %v7110_v18 = vcombine.high %v2578_v3, %v2580_v4 }
 0x3eb   :  { %v2443_v38 = vmax.f32 %v2396_v26, 0.0  ;;  %v2400_v58 = vpop.f32.mrb[15].mxu0  ;;  %v2441_v41 = vpop.f32.mrb[23].mxu1  ;;  %v7112_v19 = vcombine.high %v2579_v5, %v2581_v7  ;;  %v7109_v27 = vcombine.low %v2578_v3, %v2580_v4  ;;  %v7111_v28 = vcombine.low %v2579_v5, %v2581_v7  ;;  %v2497_v37 = vld [vmem:[#allocation2 + $0x2f8] sm:$0xff] }
 0x3ec   :  { %v2275_v42 = vmul.f32 1.442695, %v2274_v29  ;;  %v2444_v43 = vmax.f32 %v2398_v31, 0.0  ;;  %v2446_v44 = vmax.f32 %v2439_v36, 0.0  ;;  %v7116_v31 = vcombine.high %v2583_v14, %v2585_v16 }
 0x3ed   :  { %v2447_v55 = vpack.c.bf16 %v2443_v38, %v2443_v38  ;;  %v2586_v32 = vunpack.c.l.s8.bf16 %v2494_v20  ;;  %v2589_v36 = vunpack.c.h.s8.bf16 %v2495_v24  ;;  %v7115_v58 = vcombine.low %v2583_v14, %v2585_v16  ;;  %v3332_v16 = vld [vmem:[#allocation5 + $0x190] sm:$0xff] }
 0x3ee   :  { %7823 = vpow2.f32 %v2275_v42  ;;  %v2448_v46 = vpack.c.bf16 %v2444_v43, %v2444_v43  ;;  %v2450_v54 = vpack.c.bf16 %v2446_v44, %v2446_v44  ;;  %v2592_v40 = vunpack.c.l.s8.bf16 %v2497_v37  ;;  %v8336_v20 = vld [vmem:[%s8813_s12] ss:$0 sm:$0xff] }
 0x3ef   :  { %v2591_v41 = vunpack.c.h.s8.bf16 %v2496_v33  ;;  %v2593_v42 = vunpack.c.h.s8.bf16 %v2497_v37  ;;  %v7118_v43 = vcombine.high %v2586_v32, %v2588_v34  ;;  %v7120_v44 = vcombine.high %v2587_v35, %v2589_v36 }
 0x3f0   :  { %3137 = vmatprep.mubr.bf16.mxu0 %v2448_v46  ;;  %3219 = vmatprep.mubr.bf16.mxu1 %v2448_v46  ;;  %v7117_v46 = vcombine.low %v2586_v32, %v2588_v34  ;;  %v7119_v60 = vcombine.low %v2587_v35, %v2589_v36  ;;  %v7121_v3 = vcombine.low %v2590_v39, %v2592_v40  ;;  %v2598_v5 = vunpack.c.l.s8.bf16 %v2500_v52  ;;  %v3334_v35 = vld [vmem:[#allocation5 + $0x1a0] sm:$0xff]  ;;  %v3335_v36 = vld [vmem:[#allocation5 + $0x1a8] sm:$0xff] }
 0x3f1   :  { %3138 = vmatmul.mubr.bf16.vlgmr.msra.gmra.mrb[16].mxu0 %v2447_v55  ;;  %3220 = vmatmul.mubr.bf16.vlgmr.msra.gmra.mrb[24].mxu1 %v2447_v55  ;;  %v7122_v55 = vcombine.high %v2590_v39, %v2592_v40  ;;  %v7123_v4 = vcombine.low %v2591_v41, %v2593_v42  ;;  %v2600_v7 = vunpack.c.l.s8.bf16 %v2501_v53  ;;  %vm2273_vm4 = vcmp.gt.f32.partialorder %v8322_v21, 20.0 }
 0x3f2   :  { %3147 = vmatpush1.bf16.msra.mxu0 %v8297_v63  ;;  %3229 = vmatpush1.bf16.msra.mxu1 %v7099_v1  ;;  %v2582_v63 = vunpack.c.l.s8.bf16 %v2492_v8  ;;  %v2584_v1 = vunpack.c.l.s8.bf16 %v2493_v9  ;;  %v3383_v33 = vunpack.c.h.s8.bf16 %v3332_v16  ;;  %v3388_v39 = vunpack.c.l.s8.bf16 %v3335_v36 }
 0x3f3   :  { %3148 = vmatprep.subr.bf16.mxu0 %v7102_v48  ;;  %3230 = vmatprep.subr.bf16.mxu1 %v7104_v51  ;;  %v7124_v48 = vcombine.high %v2591_v41, %v2593_v42  ;;  %v2594_v51 = vunpack.c.l.s8.bf16 %v2498_v50  ;;  %v7129_v37 = vcombine.low %v2598_v5, %v2600_v7 }
 0x3f4   :  { %7133 = vmatprep.mubr.msk.bf16.mxu0 %vm871_vm2, %v2450_v54  ;;  %7134 = vmatprep.mubr.msk.bf16.mxu1 %vm871_vm2, %v2450_v54  ;;  %v7114_v29 = vcombine.high %v2582_v63, %v2584_v1  ;;  %v7113_v38 = vcombine.low %v2582_v63, %v2584_v1  ;;  %v2330_v63 = vrot.slane %v8305_v10, %v8146_v23 }
 0x3f6   :  { %3149 = vmatpush1.bf16.msra.mxu0 %v7101_v56  ;;  %3231 = vmatpush1.bf16.msra.mxu1 %v7103_v62  ;;  %v2596_v56 = vunpack.c.l.s8.bf16 %v2499_v45  ;;  %v2595_v62 = vunpack.c.h.s8.bf16 %v2498_v50 }
 0x3f7   :  { %3150 = vmatprep.subr.bf16.mxu0 %v7106_v2  ;;  %3232 = vmatprep.subr.bf16.mxu1 %v7108_v30  ;;  %v2597_v2 = vunpack.c.h.s8.bf16 %v2499_v45 }
 0x3f8   :  { %v7824_v22 = vpop.eup %7823  ;;  %v7126_v1 = vcombine.high %v2594_v51, %v2596_v56  ;;  %v7125_v24 = vcombine.low %v2594_v51, %v2596_v56  ;;  %v3339_v56 = vld [vmem:[#allocation5 + $0x1c8] sm:$0xff] }
 0x3f9   :  { %v2277_v26 = vadd.f32 1.0, %v7824_v22  ;;  %v2280_v49 = vmul.f32 -0.5, %v7824_v22  ;;  %v2283_v54 = vand.u32 2147483647, %v7824_v22  ;;  %v7128_v14 = vcombine.high %v2595_v62, %v2597_v2 }
 0x3fa   :  { %3151 = vmatpush1.bf16.msra.mxu0 %v7105_v11  ;;  %3233 = vmatpush1.bf16.msra.mxu1 %v7107_v13  ;;  %v2599_v11 = vunpack.c.h.s8.bf16 %v2500_v52  ;;  %v2601_v13 = vunpack.c.h.s8.bf16 %v2501_v53 }
 0x3fb   :  { %7825 = vlog2.f32 %v2277_v26  ;;  %3152 = vmatprep.subr.bf16.mxu0 %v7110_v18  ;;  %3234 = vmatprep.subr.bf16.mxu1 %v7112_v19  ;;  %v2281_v47 = vadd.f32 1.0, %v2280_v49  ;;  %vm2284_vm3 = vcmp.lt.f32.partialorder %v2283_v54, 0.0004427343  ;;  %v3333_v19 = vld [vmem:[#allocation5 + $0x198] sm:$0xff]  ;;  %v7127_v26 = vcombine.low %v2595_v62, %v2597_v2  ;;  %v3338_v54 = vld [vmem:[#allocation5 + $0x1c0] sm:$0xff] }
 0x3fc   :  { %v3384_v32 = vunpack.c.l.s8.bf16 %v3333_v19  ;;  %v3385_v34 = vunpack.c.h.s8.bf16 %v3333_v19  ;;  %v3387_v49 = vunpack.c.h.s8.bf16 %v3334_v35 }
 0x3fd   :  { %v2282_v9 = vmul.f32 %v7824_v22, %v2281_v47 }
 0x3fe   :  { %3153 = vmatpush1.bf16.msra.mxu0 %v7109_v27  ;;  %3235 = vmatpush1.bf16.msra.mxu1 %v7111_v28  ;;  %v7130_v27 = vcombine.high %v2598_v5, %v2600_v7  ;;  %v7132_v28 = vcombine.high %v2599_v11, %v2601_v13  ;;  %v7140_v42 = vcombine.high %v3383_v33, %v3385_v34  ;;  %v3396_v5 = vunpack.c.l.s8.bf16 %v3339_v56 }
 0x3ff   :  { %3154 = vmatprep.subr.bf16.mxu0 %v7114_v29  ;;  %3236 = vmatprep.subr.bf16.mxu1 %v7116_v31  ;;  %v3382_v29 = vunpack.c.l.s8.bf16 %v3332_v16  ;;  %v2437_v31 = vadd.f32 %v8324_v25, %v2330_v63  ;;  %v3336_v25 = vld [vmem:[#allocation5 + $0x1b0] sm:$0xff]  ;;  %v3395_v7 = vunpack.c.h.s8.bf16 %v3338_v54 }
 0x401   :  { %v2445_v40 = vmax.f32 %v2437_v31, 0.0  ;;  %v7138_v41 = vcombine.high %v3382_v29, %v3384_v32  ;;  %v7137_v45 = vcombine.low %v3382_v29, %v3384_v32 }
 0x402   :  { %3155 = vmatpush1.bf16.msra.mxu0 %v7113_v38  ;;  %3237 = vmatpush1.bf16.msra.mxu1 %v7115_v58  ;;  %v7131_v38 = vcombine.low %v2599_v11, %v2601_v13  ;;  %v3386_v58 = vunpack.c.l.s8.bf16 %v3334_v35  ;;  %v3341_v11 = vld [vmem:[#allocation5 + $0x1d8] sm:$0xff] }
 0x403   :  { %3156 = vmatprep.subr.bf16.mxu0 %v7118_v43  ;;  %3238 = vmatprep.subr.bf16.mxu1 %v7120_v44  ;;  %v3389_v43 = vunpack.c.h.s8.bf16 %v3335_v36  ;;  %v3337_v44 = vld [vmem:[#allocation5 + $0x1b8] sm:$0xff]  ;;  %v2449_v51 = vpack.c.bf16 %v2445_v40, %v2445_v40 }
 0x404   :  { %v3392_v47 = vunpack.c.l.s8.bf16 %v3337_v44  ;;  %v7142_v52 = vcombine.high %v3386_v58, %v3388_v39  ;;  %v7141_v62 = vcombine.low %v3386_v58, %v3388_v39 }
 0x405   :  { %v7826_v30 = vpop.eup %7825  ;;  %v7144_v53 = vcombine.high %v3387_v49, %v3389_v43  ;;  %v7143_v2 = vcombine.low %v3387_v49, %v3389_v43 }
 0x406   :  { %v2279_v8 = vmul.f32 0.6931472, %v7826_v30  ;;  %3157 = vmatpush1.bf16.msra.mxu0 %v7117_v46  ;;  %3239 = vmatpush1.bf16.msra.mxu1 %v7119_v60  ;;  %v7139_v46 = vcombine.low %v3383_v33, %v3385_v34  ;;  %v3390_v60 = vunpack.c.l.s8.bf16 %v3336_v25  ;;  %v3344_v34 = vld [vmem:[#allocation5 + $0x1f0] sm:$0xff] }
 0x407   :  { %3158 = vmatprep.subr.bf16.mxu0 %v7122_v55  ;;  %3240 = vmatprep.subr.bf16.mxu1 %v7124_v48  ;;  %v3391_v55 = vunpack.c.h.s8.bf16 %v3336_v25  ;;  %v3393_v48 = vunpack.c.h.s8.bf16 %v3337_v44  ;;  %v3406_v39 = vunpack.c.l.s8.bf16 %v3344_v34  ;;  %v3407_v25 = vunpack.c.h.s8.bf16 %v3344_v34  ;;  %v3346_v44 = vld [vmem:[#allocation5 + $0x200] sm:$0xff] }
 0x408   :  { %v2285_v18 = vsel %vm2284_vm3, %v2282_v9, %v2279_v8  ;;  %v7146_v30 = vcombine.high %v3390_v60, %v3392_v47  ;;  %v3397_v8 = vunpack.c.h.s8.bf16 %v3339_v56  ;;  %v3340_v9 = vld [vmem:[#allocation5 + $0x1d0] sm:$0xff]  ;;  %v7145_v13 = vcombine.low %v3390_v60, %v3392_v47 }
 0x409   :  { %v2286_v22 = vsel %vm2273_vm4, %v8322_v21, %v2285_v18  ;;  %v7147_v63 = vcombine.low %v3391_v55, %v3393_v48  ;;  %v3399_v16 = vunpack.c.h.s8.bf16 %v3340_v9  ;;  %v3401_v18 = vunpack.c.h.s8.bf16 %v3341_v11 }
 0x40a   :  { %v2287_v10 = vsub.f32 %v8310_v15, %v2286_v22  ;;  %3159 = vmatpush1.bf16.msra.mxu0 %v7121_v3  ;;  %3241 = vmatpush1.bf16.msra.mxu1 %v7123_v4  ;;  %v7148_v3 = vcombine.high %v3391_v55, %v3393_v48  ;;  %v3394_v4 = vunpack.c.l.s8.bf16 %v3338_v54  ;;  %v7152_v22 = vcombine.high %v3395_v7, %v3397_v8  ;;  %v3348_v48 = vld [vmem:[#allocation5 + $0x210] sm:$0xff] }
 0x40b   :  { %3160 = vmatprep.subr.bf16.mxu0 %v7126_v1  ;;  %3242 = vmatprep.subr.bf16.mxu1 %v7128_v14  ;;  %v3398_v1 = vunpack.c.l.s8.bf16 %v3340_v9  ;;  %v3400_v14 = vunpack.c.l.s8.bf16 %v3341_v11  ;;  %v7151_v29 = vcombine.low %v3395_v7, %v3397_v8  ;;  %v7156_v32 = vcombine.high %v3399_v16, %v3401_v18 }
 0x40c   :  { %v8342_v21 = vsub.f32 %v2287_v10, %v8336_v20  ;;  %v7150_v19 = vcombine.high %v3394_v4, %v3396_v5  ;;  %v3343_v10 = vld [vmem:[#allocation5 + $0x1e8] sm:$0xff]  ;;  %v7155_v58 = vcombine.low %v3399_v16, %v3401_v18  ;;  %v3410_v55 = vunpack.c.l.s8.bf16 %v3346_v44 }
 0x40d   :  { %v7154_v31 = vcombine.high %v3398_v1, %v3400_v14  ;;  %v3404_v35 = vunpack.c.l.s8.bf16 %v3343_v10  ;;  %v3411_v54 = vunpack.c.h.s8.bf16 %v3346_v44  ;;  %v8351_v7 = vand.u32 127, %v78_v57  ;;  %v3351_v16 = vld [vmem:[#allocation5 + $0x228] sm:$0xff] }
 0x40e   :  { %v2296_v15 = vmin.f32 %v8342_v21, 20.0  ;;  %3161 = vmatpush1.bf16.msra.mxu0 %v7125_v24  ;;  %3243 = vmatpush1.bf16.msra.mxu1 %v7127_v26  ;;  %v3342_v24 = vld [vmem:[#allocation5 + $0x1e0] sm:$0xff]  ;;  %v3415_v8 = vunpack.c.h.s8.bf16 %v3348_v48  ;;  %vm2295_vm6 = vcmp.gt.f32.partialorder %v8342_v21, 20.0 }
 0x40f   :  { %3162 = vmatprep.subr.bf16.mxu0 %v7130_v27  ;;  %3244 = vmatprep.subr.bf16.mxu1 %v7132_v28  ;;  %v7149_v27 = vcombine.low %v3394_v4, %v3396_v5  ;;  %v3402_v33 = vunpack.c.l.s8.bf16 %v3342_v24  ;;  %v3403_v36 = vunpack.c.h.s8.bf16 %v3342_v24  ;;  %v3414_v4 = vunpack.c.l.s8.bf16 %v3348_v48 }
 0x410   :  { %v2297_v50 = vmul.f32 1.442695, %v2296_v15  ;;  %v7153_v15 = vcombine.low %v3398_v1, %v3400_v14  ;;  %v3350_v14 = vld [vmem:[#allocation5 + $0x220] sm:$0xff]  ;;  %vm2310_vm7 = vcmp.ge.s32.totalorder %v8351_v7, 4 }
 0x412   :  { %7827 = vpow2.f32 %v2297_v50  ;;  %3163 = vmatpush1.bf16.msra.mxu0 %v7129_v37  ;;  %3245 = vmatpush1.bf16.msra.mxu1 %v7131_v38  ;;  %v3405_v37 = vunpack.c.h.s8.bf16 %v3343_v10  ;;  %v3345_v38 = vld [vmem:[#allocation5 + $0x1f8] sm:$0xff]  ;;  %v3347_v50 = vld [vmem:[#allocation5 + $0x208] sm:$0xff] }
 0x413   :  { %3985 = vmatprep.subr.bf16.mxu0 %v7138_v41  ;;  %4067 = vmatprep.subr.bf16.mxu1 %v7140_v42  ;;  %v3408_v49 = vunpack.c.l.s8.bf16 %v3345_v38  ;;  %v3409_v40 = vunpack.c.h.s8.bf16 %v3345_v38  ;;  %v7158_v42 = vcombine.high %v3402_v33, %v3404_v35  ;;  %v3413_v56 = vunpack.c.h.s8.bf16 %v3347_v50 }
 0x414   :  { %v7160_v43 = vcombine.high %v3403_v36, %v3405_v37 }
 0x415   :  { %3179 = vmatmul.mubr.bf16.vlgmr.msra.gmra.mrb[16].mxu0 %v2449_v51  ;;  %3261 = vmatmul.mubr.bf16.vlgmr.msra.gmra.mrb[24].mxu1 %v2449_v51  ;;  %v7162_v60 = vcombine.high %v3406_v39, %v3408_v49  ;;  %v7164_v47 = vcombine.high %v3407_v25, %v3409_v40  ;;  %v3349_v51 = vld [vmem:[#allocation5 + $0x218] sm:$0xff]  ;;  %v7168_v1 = vcombine.high %v3411_v54, %v3413_v56 }
 0x416   :  { %3986 = vmatpush1.bf16.msra.mxu0 %v7137_v45  ;;  %4068 = vmatpush1.bf16.msra.mxu1 %v7139_v46  ;;  %v7157_v45 = vcombine.low %v3402_v33, %v3404_v35  ;;  %v7159_v46 = vcombine.low %v3403_v36, %v3405_v37  ;;  %v3416_v5 = vunpack.c.l.s8.bf16 %v3349_v51  ;;  %v3417_v9 = vunpack.c.h.s8.bf16 %v3349_v51  ;;  %v3353_v33 = vld [vmem:[#allocation5 + $0x238] sm:$0xff] }
 0x417   :  { %3987 = vmatprep.subr.bf16.mxu0 %v7142_v52  ;;  %4069 = vmatprep.subr.bf16.mxu1 %v7144_v53  ;;  %v3412_v53 = vunpack.c.l.s8.bf16 %v3347_v50  ;;  %v7167_v57 = vcombine.low %v3411_v54, %v3413_v56  ;;  %v3425_v38 = vunpack.c.h.s8.bf16 %v3353_v33  ;;  %v3358_v56 = vld [vmem:[#allocation5 + $0x260] sm:$0xff] }
 0x418   :  { %v7170_v24 = vcombine.high %v3414_v4, %v3416_v5  ;;  %v7169_v34 = vcombine.low %v3414_v4, %v3416_v5  ;;  %v7171_v35 = vcombine.low %v3415_v8, %v3417_v9  ;;  %v3434_v5 = vunpack.c.l.s8.bf16 %v3358_v56 }
 0x41a   :  { %3988 = vmatpush1.bf16.msra.mxu0 %v7141_v62  ;;  %4070 = vmatpush1.bf16.msra.mxu1 %v7143_v2  ;;  %v7161_v2 = vcombine.low %v3406_v39, %v3408_v49  ;;  %v3354_v39 = vld [vmem:[#allocation5 + $0x240] sm:$0xff]  ;;  %v3355_v49 = vld [vmem:[#allocation5 + $0x248] sm:$0xff] }
 0x41b   :  { %3989 = vmatprep.subr.bf16.mxu0 %v7146_v30  ;;  %4071 = vmatprep.subr.bf16.mxu1 %v7148_v3  ;;  %v7163_v3 = vcombine.low %v3407_v25, %v3409_v40  ;;  %v3427_v44 = vunpack.c.h.s8.bf16 %v3354_v39  ;;  %v3429_v50 = vunpack.c.h.s8.bf16 %v3355_v49 }
 0x41c   :  { %v8345_v26 = vpop.eup %7827 }
 0x41d   :  { %v2299_v28 = vadd.f32 1.0, %v8345_v26  ;;  %v2302_v41 = vmul.f32 -0.5, %v8345_v26  ;;  %v2305_v62 = vand.u32 2147483647, %v8345_v26  ;;  %v7184_v54 = vcombine.high %v3427_v44, %v3429_v50 }
 0x41e   :  { %3990 = vmatpush1.bf16.msra.mxu0 %v7145_v13  ;;  %4072 = vmatpush1.bf16.msra.mxu1 %v7147_v63  ;;  %v7166_v63 = vcombine.high %v3410_v55, %v3412_v53 }
 0x41f   :  { %3991 = vmatprep.subr.bf16.mxu0 %v7150_v19  ;;  %4073 = vmatprep.subr.bf16.mxu1 %v7152_v22  ;;  %7829 = vlog2.f32 %v2299_v28  ;;  %v2303_v52 = vadd.f32 1.0, %v2302_v41  ;;  %vm2306_vm5 = vcmp.lt.f32.partialorder %v2305_v62, 0.0004427343  ;;  %v7165_v19 = vcombine.low %v3410_v55, %v3412_v53  ;;  %v3359_v62 = vld [vmem:[#allocation5 + $0x268] sm:$0xff] }
 0x420   :  { %v3420_v28 = vunpack.c.l.s8.bf16 %v3351_v16 }
 0x421   :  { %v2304_v13 = vmul.f32 %v8345_v26, %v2303_v52  ;;  %v7172_v26 = vcombine.high %v3415_v8, %v3417_v9  ;;  %v3436_v8 = vunpack.c.l.s8.bf16 %v3359_v62  ;;  %v3435_v9 = vunpack.c.h.s8.bf16 %v3358_v56 }
 0x422   :  { %3992 = vmatpush1.bf16.msra.mxu0 %v7149_v27  ;;  %4074 = vmatpush1.bf16.msra.mxu1 %v7151_v29  ;;  %v3418_v27 = vunpack.c.l.s8.bf16 %v3350_v14  ;;  %v3419_v29 = vunpack.c.h.s8.bf16 %v3350_v14 }
 0x423   :  { %3993 = vmatprep.subr.bf16.mxu0 %v7154_v31  ;;  %4075 = vmatprep.subr.bf16.mxu1 %v7156_v32  ;;  %v3421_v31 = vunpack.c.h.s8.bf16 %v3351_v16  ;;  %v3352_v32 = vld [vmem:[#allocation5 + $0x230] sm:$0xff]  ;;  %v7189_v16 = vcombine.low %v3434_v5, %v3436_v8 }
 0x424   :  { %v3422_v36 = vunpack.c.l.s8.bf16 %v3352_v32  ;;  %v3423_v37 = vunpack.c.h.s8.bf16 %v3352_v32  ;;  %v7173_v25 = vcombine.low %v3418_v27, %v3420_v28  ;;  %v3362_v32 = vld [vmem:[#allocation5 + $0x280] sm:$0xff] }
 0x426   :  { %3994 = vmatpush1.bf16.msra.mxu0 %v7153_v15  ;;  %4076 = vmatpush1.bf16.msra.mxu1 %v7155_v58  ;;  %v7174_v15 = vcombine.high %v3418_v27, %v3420_v28  ;;  %v7176_v58 = vcombine.high %v3419_v29, %v3421_v31  ;;  %v7180_v41 = vcombine.high %v3423_v37, %v3425_v38 }
 0x427   :  { %3995 = vmatprep.subr.bf16.mxu0 %v7158_v42  ;;  %4077 = vmatprep.subr.bf16.mxu1 %v7160_v43  ;;  %v3426_v42 = vunpack.c.l.s8.bf16 %v3354_v39  ;;  %v3428_v43 = vunpack.c.l.s8.bf16 %v3355_v49  ;;  %v3365_v39 = vld [vmem:[#allocation5 + $0x298] sm:$0xff] }
 0x429   :  { %v7830_v30 = vpop.eup %7829  ;;  %v7182_v53 = vcombine.high %v3426_v42, %v3428_v43 }
 0x42a   :  { %3996 = vmatpush1.bf16.msra.mxu0 %v7157_v45  ;;  %4078 = vmatpush1.bf16.msra.mxu1 %v7159_v46  ;;  %v2301_v11 = vmul.f32 0.6931472, %v7830_v30  ;;  %v3356_v45 = vld [vmem:[#allocation5 + $0x250] sm:$0xff]  ;;  %v3357_v46 = vld [vmem:[#allocation5 + $0x258] sm:$0xff]  ;;  %v7183_v30 = vcombine.low %v3427_v44, %v3429_v50 }
 0x42b   :  { %3997 = vmatprep.subr.bf16.mxu0 %v7162_v60  ;;  %4079 = vmatprep.subr.bf16.mxu1 %v7164_v47  ;;  %v7179_v47 = vcombine.low %v3423_v37, %v3425_v38  ;;  %v3430_v55 = vunpack.c.l.s8.bf16 %v3356_v45  ;;  %v3432_v48 = vunpack.c.l.s8.bf16 %v3357_v46  ;;  %v3431_v51 = vunpack.c.h.s8.bf16 %v3356_v45  ;;  %v8365_v50 = vld [vmem:[%s8805_s4 + $0x4] sm:$0xf] }
 0x42c   :  { %v2307_v18 = vsel %vm2306_vm5, %v2304_v13, %v2301_v11  ;;  %v3433_v52 = vunpack.c.h.s8.bf16 %v3357_v46  ;;  %v3437_v11 = vunpack.c.h.s8.bf16 %v3359_v62  ;;  %v8370_v45 = vld [vmem:[%s8806_s5 + $0x4] sm:$0xf]  ;;  %v3275_v46 = vrot.slane %v8365_v50, %v8122_v59 }
 0x42d   :  { %v2308_v22 = vsel %vm2295_vm6, %v8342_v21, %v2307_v18  ;;  %v7185_v13 = vcombine.low %v3430_v55, %v3432_v48 }
 0x42e   :  { %3998 = vmatpush1.bf16.msra.mxu0 %v7161_v2  ;;  %4080 = vmatpush1.bf16.msra.mxu1 %v7163_v3  ;;  %v2309_v10 = vadd.f32 %v8336_v20, %v2308_v22  ;;  %v3424_v20 = vunpack.c.l.s8.bf16 %v3353_v33  ;;  %v7181_v2 = vcombine.low %v3426_v42, %v3428_v43  ;;  %v7186_v3 = vcombine.high %v3430_v55, %v3432_v48  ;;  %v3363_v33 = vld [vmem:[#allocation5 + $0x288] sm:$0xff] }
 0x42f   :  { %3999 = vmatprep.subr.bf16.mxu0 %v7166_v63  ;;  %4081 = vmatprep.subr.bf16.mxu1 %v7168_v1  ;;  %v7188_v4 = vcombine.high %v3431_v51, %v3433_v52  ;;  %v7187_v63 = vcombine.low %v3431_v51, %v3433_v52  ;;  %v7190_v1 = vcombine.high %v3434_v5, %v3436_v8  ;;  %v3366_v5 = vld [vmem:[#allocation5 + $0x2a0] sm:$0xff] }
 0x430   :  { %v2311_v21 = vsel %vm2310_vm7, %v2309_v10, %v8314_v17  ;;  %v7175_v17 = vcombine.low %v3419_v29, %v3421_v31  ;;  %v7178_v40 = vcombine.high %v3422_v36, %v3424_v20  ;;  %v7177_v60 = vcombine.low %v3422_v36, %v3424_v20 }
 0x431   :  { %2312 = vst.msk [vmem:[#allocation7] sm:$0xff] %vm114_vm1, %v2311_v21  ;;  %v7192_v14 = vcombine.high %v3435_v9, %v3437_v11  ;;  %v7191_v18 = vcombine.low %v3435_v9, %v3437_v11  ;;  %v3442_v21 = vunpack.c.l.s8.bf16 %v3362_v32  ;;  %v3445_v36 = vunpack.c.h.s8.bf16 %v3363_v33 }
 0x432   :  { %4000 = vmatpush1.bf16.msra.mxu0 %v7165_v19  ;;  %4082 = vmatpush1.bf16.msra.mxu1 %v7167_v57  ;;  %v3360_v19 = vld [vmem:[#allocation5 + $0x270] sm:$0xff]  ;;  %v3361_v57 = vld [vmem:[#allocation5 + $0x278] sm:$0xff]  ;;  %v3302_v55 = vrot.slane %v8370_v45, %v8122_v59  ;;  %v3306_v52 = vrot.slane %v8370_v45, %v8130_v61 }
 0x433   :  { %4001 = vmatprep.subr.bf16.mxu0 %v7170_v24  ;;  %4083 = vmatprep.subr.bf16.mxu1 %v7172_v26  ;;  %v3438_v22 = vunpack.c.l.s8.bf16 %v3360_v19  ;;  %v3440_v24 = vunpack.c.l.s8.bf16 %v3361_v57  ;;  %v3439_v26 = vunpack.c.h.s8.bf16 %v3360_v19  ;;  %v3441_v10 = vunpack.c.h.s8.bf16 %v3361_v57 }
 0x435   :  { %v7194_v27 = vcombine.high %v3438_v22, %v3440_v24  ;;  %v7196_v28 = vcombine.high %v3439_v26, %v3441_v10  ;;  %v7193_v29 = vcombine.low %v3438_v22, %v3440_v24  ;;  %v7195_v31 = vcombine.low %v3439_v26, %v3441_v10  ;;  %v3369_v26 = vld [vmem:[#allocation5 + $0x2b8] sm:$0xff] }
 0x436   :  { %4002 = vmatpush1.bf16.msra.mxu0 %v7169_v34  ;;  %4084 = vmatpush1.bf16.msra.mxu1 %v7171_v35  ;;  %v3444_v34 = vunpack.c.l.s8.bf16 %v3363_v33  ;;  %v3443_v35 = vunpack.c.h.s8.bf16 %v3362_v32  ;;  %v3451_v22 = vunpack.c.h.s8.bf16 %v3366_v5  ;;  %v3457_v33 = vunpack.c.h.s8.bf16 %v3369_v26 }
 0x437   :  { %4003 = vmatprep.subr.bf16.mxu0 %v7174_v15  ;;  %4085 = vmatprep.subr.bf16.mxu1 %v7176_v58  ;;  %v3364_v58 = vld [vmem:[#allocation5 + $0x290] sm:$0xff] }
 0x438   :  { %v7198_v20 = vcombine.high %v3442_v21, %v3444_v34  ;;  %v7200_v37 = vcombine.high %v3443_v35, %v3445_v36  ;;  %v7197_v38 = vcombine.low %v3442_v21, %v3444_v34  ;;  %v7199_v15 = vcombine.low %v3443_v35, %v3445_v36  ;;  %v3370_v21 = vld [vmem:[#allocation5 + $0x2c0] sm:$0xff]  ;;  %v3371_v34 = vld [vmem:[#allocation5 + $0x2c8] sm:$0xff] }
 0x439   :  { %v3446_v49 = vunpack.c.l.s8.bf16 %v3364_v58 }
 0x43a   :  { %4004 = vmatpush1.bf16.msra.mxu0 %v7173_v25  ;;  %4086 = vmatpush1.bf16.msra.mxu1 %v7175_v17  ;;  %v3448_v25 = vunpack.c.l.s8.bf16 %v3365_v39  ;;  %v3447_v17 = vunpack.c.h.s8.bf16 %v3364_v58  ;;  %v3460_v58 = vunpack.c.l.s8.bf16 %v3371_v34 }
 0x43b   :  { %4005 = vmatprep.subr.bf16.mxu0 %v7178_v40  ;;  %4087 = vmatprep.subr.bf16.mxu1 %v7180_v41  ;;  %v3449_v40 = vunpack.c.h.s8.bf16 %v3365_v39  ;;  %v3459_v39 = vunpack.c.h.s8.bf16 %v3370_v21 }
 0x43c   :  { %v7202_v41 = vcombine.high %v3446_v49, %v3448_v25  ;;  %v7201_v43 = vcombine.low %v3446_v49, %v3448_v25  ;;  %v3461_v49 = vunpack.c.h.s8.bf16 %v3371_v34  ;;  %v3381_v34 = vld [vmem:[#allocation5 + $0x318] sm:$0xff] }
 0x43d   :  { %v7204_v42 = vcombine.high %v3447_v17, %v3449_v40  ;;  %v7203_v44 = vcombine.low %v3447_v17, %v3449_v40  ;;  %v3372_v40 = vld [vmem:[#allocation5 + $0x2d0] sm:$0xff] }
 0x43e   :  { %4006 = vmatpush1.bf16.msra.mxu0 %v7177_v60  ;;  %4088 = vmatpush1.bf16.msra.mxu1 %v7179_v47  ;;  %v3279_v60 = vrot.slane %v8365_v50, %v8130_v61  ;;  %v3287_v47 = vrot.slane %v8365_v50, %v8137_v12 }
 0x43f   :  { %4007 = vmatprep.subr.bf16.mxu0 %v7182_v53  ;;  %4089 = vmatprep.subr.bf16.mxu1 %v7184_v54  ;;  %v3314_v53 = vrot.slane %v8370_v45, %v8137_v12 }
 0x442   :  { %4008 = vmatpush1.bf16.msra.mxu0 %v7181_v2  ;;  %4090 = vmatpush1.bf16.msra.mxu1 %v7183_v30 }
 0x443   :  { %4009 = vmatprep.subr.bf16.mxu0 %v7186_v3  ;;  %4091 = vmatprep.subr.bf16.mxu1 %v7188_v4 }
 0x446   :  { %4010 = vmatpush1.bf16.msra.mxu0 %v7185_v13  ;;  %4092 = vmatpush1.bf16.msra.mxu1 %v7187_v63  ;;  %v3367_v13 = vld [vmem:[#allocation5 + $0x2a8] sm:$0xff] }
 0x447   :  { %4011 = vmatprep.subr.bf16.mxu0 %v7190_v1  ;;  %4093 = vmatprep.subr.bf16.mxu1 %v7192_v14  ;;  %v3452_v57 = vunpack.c.l.s8.bf16 %v3367_v13  ;;  %v3453_v24 = vunpack.c.h.s8.bf16 %v3367_v13 }
 0x449   :  { %v7208_v36 = vcombine.high %v3451_v22, %v3453_v24 }
 0x44a   :  { %4012 = vmatpush1.bf16.msra.mxu0 %v7189_v16  ;;  %4094 = vmatpush1.bf16.msra.mxu1 %v7191_v18  ;;  %v3450_v16 = vunpack.c.l.s8.bf16 %v3366_v5  ;;  %v3368_v18 = vld [vmem:[#allocation5 + $0x2b0] sm:$0xff] }
 0x44b   :  { %4013 = vmatprep.subr.bf16.mxu0 %v7194_v27  ;;  %4095 = vmatprep.subr.bf16.mxu1 %v7196_v28  ;;  %v3454_v28 = vunpack.c.l.s8.bf16 %v3368_v18  ;;  %v3455_v32 = vunpack.c.h.s8.bf16 %v3368_v18 }
 0x44c   :  { %v7206_v35 = vcombine.high %v3450_v16, %v3452_v57 }
 0x44d   :  { %v7212_v17 = vcombine.high %v3455_v32, %v3457_v33 }
 0x44e   :  { %4014 = vmatpush1.bf16.msra.mxu0 %v7193_v29  ;;  %4096 = vmatpush1.bf16.msra.mxu1 %v7195_v31  ;;  %v3456_v31 = vunpack.c.l.s8.bf16 %v3369_v26 }
 0x44f   :  { %4015 = vmatprep.subr.bf16.mxu0 %v7198_v20  ;;  %4097 = vmatprep.subr.bf16.mxu1 %v7200_v37  ;;  %v7205_v37 = vcombine.low %v3450_v16, %v3452_v57  ;;  %v3378_v57 = vld [vmem:[#allocation5 + $0x300] sm:$0xff] }
 0x450   :  { %v7210_v25 = vcombine.high %v3454_v28, %v3456_v31 }
 0x452   :  { %4016 = vmatpush1.bf16.msra.mxu0 %v7197_v38  ;;  %4098 = vmatpush1.bf16.msra.mxu1 %v7199_v15  ;;  %v7207_v38 = vcombine.low %v3451_v22, %v3453_v24  ;;  %v3458_v15 = vunpack.c.l.s8.bf16 %v3370_v21  ;;  %v3379_v22 = vld [vmem:[#allocation5 + $0x308] sm:$0xff]  ;;  %v3380_v21 = vld [vmem:[#allocation5 + $0x310] sm:$0xff] }
 0x453   :  { %4026 = vmatprep.subr.bf16.mxu0 %v7202_v41  ;;  %4108 = vmatprep.subr.bf16.mxu1 %v7204_v42  ;;  %v3373_v41 = vld [vmem:[#allocation5 + $0x2d8] sm:$0xff]  ;;  %v7209_v42 = vcombine.low %v3454_v28, %v3456_v31  ;;  %v3475_v28 = vunpack.c.h.s8.bf16 %v3378_v57  ;;  %v3283_v31 = vrot.slane %v8365_v50, %v8146_v23  ;;  %v3480_v50 = vunpack.c.l.s8.bf16 %v3381_v34 }
 0x4e8   :  { %v3180_v48 = vpop.f32.mrb[16].mxu0  ;;  %v8380_v51 = vpop.f32.mrb[24].mxu1 }
 0x4e9   :  { %v3292_v54 = vmul.f32 %v3275_v46, %v3180_v48  ;;  %v3182_v56 = vpop.f32.mrb[17].mxu0  ;;  %v3264_v62 = vpop.f32.mrb[25].mxu1  ;;  %v7211_v46 = vcombine.low %v3455_v32, %v3457_v33  ;;  %v3465_v48 = vunpack.c.h.s8.bf16 %v3373_v41 }
 0x4ea   :  { %v3293_v2 = vmul.f32 %v3279_v60, %v3182_v56  ;;  %v3295_v30 = vmul.f32 %v3287_v47, %v3264_v62  ;;  %v3184_v3 = vpop.f32.mrb[18].mxu0  ;;  %v3266_v4 = vpop.f32.mrb[26].mxu1  ;;  %v3462_v60 = vunpack.c.l.s8.bf16 %v3372_v40  ;;  %v3464_v47 = vunpack.c.l.s8.bf16 %v3373_v41 }
 0x4eb   :  { %v3319_v8 = vadd.f32 %v3302_v55, %v3292_v54  ;;  %v3185_v9 = vpop.f32.mrb[19].mxu0  ;;  %v3267_v11 = vpop.f32.mrb[27].mxu1  ;;  %v3463_v55 = vunpack.c.h.s8.bf16 %v3372_v40  ;;  %v7213_v54 = vcombine.low %v3458_v15, %v3460_v58  ;;  %v7215_v56 = vcombine.low %v3459_v39, %v3461_v49 }
 0x4ec   :  { %v3320_v63 = vadd.f32 %v3306_v52, %v3293_v2  ;;  %v3322_v1 = vadd.f32 %v3314_v53, %v3295_v30  ;;  %v3374_v52 = vld [vmem:[#allocation5 + $0x2e0] sm:$0xff]  ;;  %v3375_v53 = vld [vmem:[#allocation5 + $0x2e8] sm:$0xff]  ;;  %v7218_v4 = vcombine.high %v3462_v60, %v3464_v47  ;;  %v3377_v9 = vld [vmem:[#allocation5 + $0x2f8] sm:$0xff]  ;;  %v7217_v11 = vcombine.low %v3462_v60, %v3464_v47 }
 0x4ed   :  { %v3323_v14 = vmax.f32 %v3319_v8, 0.0  ;;  %v3466_v62 = vunpack.c.l.s8.bf16 %v3374_v52  ;;  %v3468_v2 = vunpack.c.l.s8.bf16 %v3375_v53  ;;  %v3467_v30 = vunpack.c.h.s8.bf16 %v3374_v52  ;;  %v3376_v8 = vld [vmem:[#allocation5 + $0x2f0] sm:$0xff]  ;;  %v7771_v60 = vld [vmem:[%s8810_s9 + $0xc8] sm:$0xff]   ;;  %v7774_v52 = vld [vmem:[%s8810_s9 + $0xd0] sm:$0xff]  }
 0x4ee   :  { %v3324_v19 = vmax.f32 %v3320_v63, 0.0  ;;  %v3326_v10 = vmax.f32 %v3322_v1, 0.0  ;;  %v3469_v3 = vunpack.c.h.s8.bf16 %v3375_v53  ;;  %v7220_v5 = vcombine.high %v3463_v55, %v3465_v48  ;;  %v7776_v53 = vld [vmem:[%s8810_s9 + $0x118] sm:$0xff]  }
 0x4ef   :  { %v3327_v29 = vpack.c.bf16 %v3323_v14, %v3323_v14  ;;  %v7219_v13 = vcombine.low %v3463_v55, %v3465_v48  ;;  %v7222_v63 = vcombine.high %v3466_v62, %v3468_v2  ;;  %v3470_v14 = vunpack.c.l.s8.bf16 %v3376_v8  ;;  %v7773_v55 = vld [vmem:[%s8810_s9 + $0x110] sm:$0xff]  }
 0x4f0   :  { %v3328_v27 = vpack.c.bf16 %v3324_v19, %v3324_v19  ;;  %v3330_v20 = vpack.c.bf16 %v3326_v10, %v3326_v10  ;;  %v7224_v1 = vcombine.high %v3467_v30, %v3469_v3  ;;  %v3472_v16 = vunpack.c.l.s8.bf16 %v3377_v9  ;;  %v7772_v48 = vld [vmem:[%s8810_s9 + $0x150] sm:$0xff]  }
 0x4f1   :  { %v3471_v18 = vunpack.c.h.s8.bf16 %v3376_v8  ;;  %v3473_v19 = vunpack.c.h.s8.bf16 %v3377_v9  ;;  %v7221_v24 = vcombine.low %v3466_v62, %v3468_v2  ;;  %v7223_v26 = vcombine.low %v3467_v30, %v3469_v3  ;;  %v7779_v62 = vld [vmem:[%s8810_s9 + $0x120] sm:$0xff]   ;;  %v7782_v3 = vld [vmem:[%s8810_s9 + $0x128] sm:$0xff]   ;;  %v7785_v8 = vld [vmem:[%s8810_s9 + $0x130] sm:$0xff]  }
 0x4f2   :  { %4017 = vmatprep.mubr.bf16.mxu0 %v3328_v27  ;;  %4099 = vmatprep.mubr.bf16.mxu1 %v3328_v27  ;;  %v3474_v10 = vunpack.c.l.s8.bf16 %v3378_v57  ;;  %v3476_v27 = vunpack.c.l.s8.bf16 %v3379_v22  ;;  %v7226_v32 = vcombine.high %v3470_v14, %v3472_v16  ;;  %v7778_v2 = vld [vmem:[%s8810_s9 + $0x160] sm:$0xff]   ;;  %v7784_v9 = vld [vmem:[%s8810_s9 + $0x170] sm:$0xff]  }
 0x4f3   :  { %4018 = vmatmul.mubr.bf16.vlgmr.msra.gmra.mrb[20].mxu0 %v3327_v29  ;;  %4100 = vmatmul.mubr.bf16.vlgmr.msra.gmra.mrb[28].mxu1 %v3327_v29  ;;  %v3477_v29 = vunpack.c.h.s8.bf16 %v3379_v22  ;;  %v7228_v33 = vcombine.high %v3471_v18, %v3473_v19  ;;  %v7780_v30 = vld [vmem:[%s8810_s9 + $0xe0] sm:$0xff]  }
 0x4f4   :  { %4027 = vmatpush1.bf16.msra.mxu0 %v7201_v43  ;;  %4109 = vmatpush1.bf16.msra.mxu1 %v7203_v44  ;;  %v7214_v43 = vcombine.high %v3458_v15, %v3460_v58  ;;  %v7216_v44 = vcombine.high %v3459_v39, %v3461_v49  ;;  %v3478_v15 = vunpack.c.l.s8.bf16 %v3380_v21  ;;  %v3294_v58 = vmul.f32 %v3283_v31, %v8380_v51  ;;  %v7770_v51 = vld [vmem:[%s8810_s9 + $0x108] sm:$0xff]   ;;  %v7319_v57 = vld [vmem:[%s8802_s1 + $0x20] sm:$0xff] }
 0x4f5   :  { %7237 = vmatprep.mubr.msk.bf16.mxu0 %vm871_vm2, %v3330_v20  ;;  %7238 = vmatprep.mubr.msk.bf16.mxu1 %vm871_vm2, %v3330_v20  ;;  %v7227_v20 = vcombine.low %v3471_v18, %v3473_v19  ;;  %v3479_v39 = vunpack.c.h.s8.bf16 %v3380_v21  ;;  %v3481_v49 = vunpack.c.h.s8.bf16 %v3381_v34  ;;  %v7792_v18 = vld [vmem:[%s8810_s9 + $0x100] sm:$0xff]   ;;  %v7793_v19 = vld [vmem:[%s8810_s9 + $0x188] sm:$0xff]   ;;  %v7323_v22 = vcombine.high %v7319_v57, %v7319_v57 }
 0x4f6   :  { %4028 = vmatprep.subr.bf16.mxu0 %v7206_v35  ;;  %4110 = vmatprep.subr.bf16.mxu1 %v7208_v36  ;;  %v3310_v35 = vrot.slane %v8370_v45, %v8146_v23  ;;  %v7225_v36 = vcombine.low %v3470_v14, %v3472_v16  ;;  %v7234_v45 = vcombine.high %v3478_v15, %v3480_v50  ;;  %v7790_v14 = vld [vmem:[%s8810_s9 + $0x180] sm:$0xff]  }
 0x4f7   :  { %v7236_v41 = vcombine.high %v3479_v39, %v3481_v49  ;;  %v7791_v16 = vld [vmem:[%s8810_s9 + $0x140] sm:$0xff]  }
 0x4f8   :  { %4029 = vmatpush1.bf16.msra.mxu0 %v7205_v37  ;;  %4111 = vmatpush1.bf16.msra.mxu1 %v7207_v38  ;;  %v7230_v37 = vcombine.high %v3474_v10, %v3476_v27  ;;  %v7232_v38 = vcombine.high %v3475_v28, %v3477_v29  ;;  %v3321_v40 = vadd.f32 %v3310_v35, %v3294_v58  ;;  %v7239_v34 = vld [vmem:[%s8808_s7 + $0x4] sm:$0xf] }
 0x4f9   :  { %4030 = vmatprep.subr.bf16.mxu0 %v7210_v25  ;;  %4112 = vmatprep.subr.bf16.mxu1 %v7212_v17  ;;  %v7229_v25 = vcombine.low %v3474_v10, %v3476_v27  ;;  %v7231_v17 = vcombine.low %v3475_v28, %v3477_v29  ;;  %v7240_v35 = vld [vmem:[%s8809_s8 + $0x4] sm:$0xf] }
 0x4fa   :  { %v4190_v58 = vrot.slane %v7240_v35, %v8146_v23 }
 0x4fc   :  { %4031 = vmatpush1.bf16.msra.mxu0 %v7209_v42  ;;  %4113 = vmatpush1.bf16.msra.mxu1 %v7211_v46  ;;  %v7233_v42 = vcombine.low %v3478_v15, %v3480_v50  ;;  %v7235_v46 = vcombine.low %v3479_v39, %v3481_v49  ;;  %v4182_v15 = vrot.slane %v7240_v35, %v8122_v59 }
 0x4fd   :  { %4032 = vmatprep.subr.bf16.mxu0 %v7214_v43  ;;  %4114 = vmatprep.subr.bf16.mxu1 %v7216_v44  ;;  %v3325_v43 = vmax.f32 %v3321_v40, 0.0  ;;  %v7769_v44 = vld [vmem:[%s8810_s9 + $0x148] sm:$0xff]   ;;  %v4186_v49 = vrot.slane %v7240_v35, %v8130_v61 }
 0x4ff   :  { %v3329_v47 = vpack.c.bf16 %v3325_v43, %v3325_v43 }
 0x500   :  { %4033 = vmatpush1.bf16.msra.mxu0 %v7213_v54  ;;  %4115 = vmatpush1.bf16.msra.mxu1 %v7215_v56  ;;  %v7775_v54 = vld [vmem:[%s8810_s9 + $0x158] sm:$0xff]  }
 0x501   :  { %4034 = vmatprep.subr.bf16.mxu0 %v7218_v4  ;;  %4116 = vmatprep.subr.bf16.mxu1 %v7220_v5  ;;  %v7777_v56 = vld [vmem:[%s8810_s9 + $0xd8] sm:$0xff]   ;;  %v7781_v4 = vld [vmem:[%s8810_s9 + $0x168] sm:$0xff]  }
 0x502   :  { %v7783_v5 = vld [vmem:[%s8810_s9 + $0xe8] sm:$0xff]  }
 0x504   :  { %4035 = vmatpush1.bf16.msra.mxu0 %v7217_v11  ;;  %4117 = vmatpush1.bf16.msra.mxu1 %v7219_v13  ;;  %v7786_v11 = vld [vmem:[%s8810_s9 + $0xf0] sm:$0xff]   ;;  %v7787_v13 = vld [vmem:[%s8810_s9 + $0x178] sm:$0xff]  }
 0x505   :  { %4036 = vmatprep.subr.bf16.mxu0 %v7222_v63  ;;  %4118 = vmatprep.subr.bf16.mxu1 %v7224_v1  ;;  %v7788_v63 = vld [vmem:[%s8810_s9 + $0x138] sm:$0xff]  }
 0x506   :  { %v7789_v1 = vld [vmem:[%s8810_s9 + $0xf8] sm:$0xff]  }
 0x508   :  { %4037 = vmatpush1.bf16.msra.mxu0 %v7221_v24  ;;  %4119 = vmatpush1.bf16.msra.mxu1 %v7223_v26  ;;  %v4677_v24 = vld [vmem:[#allocation2 + $0x320] sm:$0xff]  ;;  %v4678_v26 = vld [vmem:[#allocation2 + $0x328] sm:$0xff] }
 0x509   :  { %4038 = vmatprep.subr.bf16.mxu0 %v7226_v32  ;;  %4120 = vmatprep.subr.bf16.mxu1 %v7228_v33  ;;  %v4727_v10 = vunpack.c.l.s8.bf16 %v4677_v24  ;;  %v4729_v27 = vunpack.c.l.s8.bf16 %v4678_v26  ;;  %v4728_v28 = vunpack.c.h.s8.bf16 %v4677_v24  ;;  %v4730_v29 = vunpack.c.h.s8.bf16 %v4678_v26  ;;  %v8516_v24 = vld [vmem:[#allocation2 + $0x350] sm:$0xff]  ;;  %v8518_v26 = vld [vmem:[#allocation2 + $0x358] sm:$0xff] }
 0x50b   :  { %v7331_v31 = vcombine.high %v4727_v10, %v4729_v27  ;;  %v8481_v32 = vcombine.high %v4728_v28, %v4730_v29  ;;  %v7330_v33 = vcombine.low %v4727_v10, %v4729_v27  ;;  %v8483_v21 = vcombine.low %v4728_v28, %v4730_v29 }
 0x50c   :  { %4039 = vmatpush1.bf16.msra.mxu0 %v7225_v36  ;;  %4121 = vmatpush1.bf16.msra.mxu1 %v7227_v20  ;;  %v4155_v36 = vrot.slane %v7239_v34, %v8122_v59  ;;  %v4163_v20 = vrot.slane %v7239_v34, %v8146_v23  ;;  %v4739_v29 = vunpack.c.l.s8.bf16 %v8516_v24 }
 0x50d   :  { %4040 = vmatprep.subr.bf16.mxu0 %v7230_v37  ;;  %4122 = vmatprep.subr.bf16.mxu1 %v7232_v38  ;;  %v4159_v37 = vrot.slane %v7239_v34, %v8130_v61  ;;  %v4167_v38 = vrot.slane %v7239_v34, %v8137_v12  ;;  %v8524_v34 = vld [vmem:[#allocation2 + $0x360] sm:$0xff] }
 0x510   :  { %4041 = vmatpush1.bf16.msra.mxu0 %v7229_v25  ;;  %4123 = vmatpush1.bf16.msra.mxu1 %v7231_v17  ;;  %v4194_v25 = vrot.slane %v7240_v35, %v8137_v12  ;;  %v8526_v35 = vld [vmem:[#allocation2 + $0x368] sm:$0xff] }
 0x511   :  { %4042 = vmatprep.subr.bf16.mxu0 %v7234_v45  ;;  %4124 = vmatprep.subr.bf16.mxu1 %v7236_v41 }
 0x514   :  { %4043 = vmatpush1.bf16.msra.mxu0 %v7233_v42  ;;  %4125 = vmatpush1.bf16.msra.mxu1 %v7235_v46 }
 0x515   :  { %4463 = vmatprep.subr.bf16.mxu1 %v7927_v0  ;;  %7638 = vmatprep.subr.bf16.mxu0 %v7770_v51 }
 0x517   :  { %4059 = vmatmul.mubr.bf16.vlgmr.msra.gmra.mrb[20].mxu0 %v3329_v47  ;;  %4141 = vmatmul.mubr.bf16.vlgmr.msra.gmra.mrb[28].mxu1 %v3329_v47 }
 0x518   :  { %4464 = vmatpush1.bf16.msra.mxu1 %v7769_v44  ;;  %7639 = vmatpush3.bf16.msra.mxu0 %v7771_v60 }
 0x519   :  { %4465 = vmatprep.subr.bf16.mxu1 %v7927_v0  ;;  %7640 = vmatprep.subr.bf16.mxu0 %v7773_v55 }
 0x51c   :  { %4466 = vmatpush1.bf16.msra.mxu1 %v7772_v48  ;;  %7641 = vmatpush3.bf16.msra.mxu0 %v7774_v52  ;;  %v8499_v48 = vld [vmem:[#allocation2 + $0x330] sm:$0xff]  ;;  %v8501_v52 = vld [vmem:[#allocation2 + $0x338] sm:$0xff] }
 0x51d   :  { %4467 = vmatprep.subr.bf16.mxu1 %v7927_v0  ;;  %7642 = vmatprep.subr.bf16.mxu0 %v7776_v53 }
 0x520   :  { %4468 = vmatpush1.bf16.msra.mxu1 %v7775_v54  ;;  %7643 = vmatpush3.bf16.msra.mxu0 %v7777_v56 }
 0x521   :  { %4469 = vmatprep.subr.bf16.mxu1 %v7927_v0  ;;  %7644 = vmatprep.subr.bf16.mxu0 %v7779_v62 }
 0x524   :  { %4470 = vmatpush1.bf16.msra.mxu1 %v7778_v2  ;;  %7645 = vmatpush3.bf16.msra.mxu0 %v7780_v30  ;;  %v7322_v2 = vcombine.low %v7319_v57, %v7319_v57 }
 0x525   :  { %4471 = vmatprep.subr.bf16.mxu1 %v7927_v0  ;;  %7646 = vmatprep.subr.bf16.mxu0 %v7782_v3 }
 0x528   :  { %4472 = vmatpush1.bf16.msra.mxu1 %v7781_v4  ;;  %7647 = vmatpush3.bf16.msra.mxu0 %v7783_v5  ;;  %v7320_v4 = vld [vmem:[%s8802_s1 + $0x28] sm:$0xff]  ;;  %v4731_v5 = vunpack.c.l.s8.bf16 %v8499_v48 }
 0x529   :  { %4473 = vmatprep.subr.bf16.mxu1 %v7927_v0  ;;  %7648 = vmatprep.subr.bf16.mxu0 %v7785_v8  ;;  %v4733_v8 = vunpack.c.l.s8.bf16 %v8501_v52  ;;  %v7324_v10 = vcombine.low %v7320_v4, %v7320_v4 }
 0x52b   :  { %v7334_v27 = vcombine.low %v4731_v5, %v4733_v8 }
 0x52c   :  { %4474 = vmatpush1.bf16.msra.mxu1 %v7784_v9  ;;  %7649 = vmatpush3.bf16.msra.mxu0 %v7786_v11  ;;  %v8508_v9 = vld [vmem:[#allocation2 + $0x340] sm:$0xff]  ;;  %v8510_v11 = vld [vmem:[#allocation2 + $0x348] sm:$0xff] }
 0x52d   :  { %4475 = vmatprep.subr.bf16.mxu1 %v7927_v0  ;;  %7650 = vmatprep.subr.bf16.mxu0 %v7788_v63  ;;  %v4735_v57 = vunpack.c.l.s8.bf16 %v8508_v9 }
 0x530   :  { %4476 = vmatpush1.bf16.msra.mxu1 %v7787_v13  ;;  %7651 = vmatpush3.bf16.msra.mxu0 %v7789_v1 }
 0x531   :  { %4477 = vmatprep.subr.bf16.mxu1 %v7927_v0  ;;  %7652 = vmatprep.subr.bf16.mxu0 %v7791_v16  ;;  %v4575_v16 = vsel %vm118_vm0, %v7322_v2, 0 }
 0x534   :  { %4478 = vmatpush1.bf16.msra.mxu1 %v7790_v14  ;;  %7653 = vmatpush3.bf16.msra.mxu0 %v7792_v18  ;;  %v7325_v18 = vcombine.high %v7320_v4, %v7320_v4 }
 0x535   :  { %4479 = vmatprep.subr.bf16.mxu1 %v7927_v0  ;;  %7326 = vmatprep.subr.msk.bf16.mxu0 %vm118_vm0, %v7323_v22  ;;  %v4737_v22 = vunpack.c.l.s8.bf16 %v8510_v11 }
 0x537   :  { %v7339_v28 = vcombine.high %v4735_v57, %v4737_v22 }
 0x538   :  { %4480 = vmatpush1.bf16.msra.mxu1 %v7793_v19  ;;  %v7335_v19 = vcombine.high %v4731_v5, %v4733_v8  ;;  %v4744_v5 = vunpack.c.h.s8.bf16 %v8524_v34  ;;  %v4746_v8 = vunpack.c.h.s8.bf16 %v8526_v35 }
 0x539   :  { %5330 = vmatprep.subr.bf16.mxu1 %v7331_v31  ;;  %v4741_v31 = vunpack.c.l.s8.bf16 %v8518_v26 }
 0x5ea   :  { %v4060_v50 = vpop.f32.mrb[20].mxu0  ;;  %v4142_v39 = vpop.f32.mrb[28].mxu1 }
 0x5eb   :  { %v4172_v17 = vmul.f32 %v4155_v36, %v4060_v50  ;;  %v4174_v40 = vmul.f32 %v4163_v20, %v4142_v39  ;;  %v4062_v45 = vpop.f32.mrb[21].mxu0  ;;  %v4144_v41 = vpop.f32.mrb[29].mxu1  ;;  %v4581_v36 = vsel %vm118_vm0, %v7324_v10, 0  ;;  %v7338_v20 = vcombine.low %v4735_v57, %v4737_v22 }
 0x5ec   :  { %v4173_v42 = vmul.f32 %v4159_v37, %v4062_v45  ;;  %v4175_v46 = vmul.f32 %v4167_v38, %v4144_v41  ;;  %v4064_v43 = vpop.f32.mrb[22].mxu0  ;;  %v4146_v51 = vpop.f32.mrb[30].mxu1  ;;  %v7343_v37 = vcombine.high %v4739_v29, %v4741_v31  ;;  %v4743_v38 = vunpack.c.l.s8.bf16 %v8524_v34  ;;  %v8543_v45 = vld [vmem:[#allocation2 + $0x380] sm:$0xff]  ;;  %v8545_v41 = vld [vmem:[#allocation2 + $0x388] sm:$0xff] }
 0x5ed   :  { %v4199_v44 = vadd.f32 %v4182_v15, %v4172_v17  ;;  %v4201_v60 = vadd.f32 %v4190_v58, %v4174_v40  ;;  %v4065_v47 = vpop.f32.mrb[23].mxu0  ;;  %v4147_v55 = vpop.f32.mrb[31].mxu1  ;;  %v8533_v15 = vld [vmem:[#allocation2 + $0x370] sm:$0xff]  ;;  %v8535_v58 = vld [vmem:[#allocation2 + $0x378] sm:$0xff]  ;;  %v4732_v50 = vunpack.c.h.s8.bf16 %v8499_v48  ;;  %v4734_v39 = vunpack.c.h.s8.bf16 %v8501_v52 }
 0x5ee   :  { %v4200_v53 = vadd.f32 %v4186_v49, %v4173_v42  ;;  %v4202_v54 = vadd.f32 %v4194_v25, %v4175_v46  ;;  %v7342_v49 = vcombine.low %v4739_v29, %v4741_v31  ;;  %v4747_v17 = vunpack.c.l.s8.bf16 %v8533_v15  ;;  %v8553_v47 = vld [vmem:[#allocation2 + $0x390] sm:$0xff]  ;;  %v8555_v55 = vld [vmem:[#allocation2 + $0x398] sm:$0xff] }
 0x5ef   :  { %v4203_v56 = vmax.f32 %v4199_v44, 0.0  ;;  %v4205_v62 = vmax.f32 %v4201_v60, 0.0  ;;  %v4749_v40 = vunpack.c.l.s8.bf16 %v8535_v58  ;;  %v7337_v42 = vcombine.high %v4732_v50, %v4734_v39 }
 0x5f0   :  { %v4204_v30 = vmax.f32 %v4200_v53, 0.0  ;;  %v4206_v3 = vmax.f32 %v4202_v54, 0.0  ;;  %v4736_v46 = vunpack.c.h.s8.bf16 %v8508_v9  ;;  %v4751_v44 = vunpack.c.l.s8.bf16 %v8543_v45 }
 0x5f1   :  { %v4207_v1 = vpack.c.bf16 %v4203_v56, %v4203_v56  ;;  %v4209_v14 = vpack.c.bf16 %v4205_v62, %v4205_v62  ;;  %v7351_v51 = vcombine.high %v4747_v17, %v4749_v40  ;;  %v4753_v60 = vunpack.c.l.s8.bf16 %v8545_v41 }
 0x5f2   :  { %v4208_v13 = vpack.c.bf16 %v4204_v30, %v4204_v30  ;;  %v4210_v63 = vpack.c.bf16 %v4206_v3, %v4206_v3  ;;  %v7336_v48 = vcombine.low %v4732_v50, %v4734_v39  ;;  %v4740_v53 = vunpack.c.h.s8.bf16 %v8516_v24  ;;  %v8562_v30 = vld [vmem:[#allocation2 + $0x3a0] sm:$0xff]  ;;  %v8564_v3 = vld [vmem:[#allocation2 + $0x3a8] sm:$0xff] }
 0x5f3   :  { %v4742_v54 = vunpack.c.h.s8.bf16 %v8518_v26  ;;  %v7350_v56 = vcombine.low %v4747_v17, %v4749_v40  ;;  %v7355_v62 = vcombine.high %v4751_v44, %v4753_v60  ;;  %v4755_v2 = vunpack.c.l.s8.bf16 %v8553_v47 }
 0x5f4   :  { %4455 = vmatprep.mubr.bf16.mxu0 %v4208_v13  ;;  %7318 = vmatprep.mubr.msk.bf16.mxu1 %vm871_vm2, %v4210_v63  ;;  %v7354_v9 = vcombine.low %v4751_v44, %v4753_v60  ;;  %v4759_v13 = vunpack.c.l.s8.bf16 %v8562_v30  ;;  %v4761_v63 = vunpack.c.l.s8.bf16 %v8564_v3  ;;  %v4750_v57 = vunpack.c.h.s8.bf16 %v8535_v58 }
 0x5f5   :  { %4456 = vmatmul.mubr.bf16.vlgmr.msra.gmra.mrb[24].mxu0 %v4207_v1  ;;  %4496 = vmatmul.mubr.bf16.vlgmr.msra.gmra.mrb[32].mxu1 %v4209_v14  ;;  %v7345_v4 = vcombine.high %v4740_v53, %v4742_v54  ;;  %v8570_v1 = vld [vmem:[#allocation2 + $0x3b0] sm:$0xff]  ;;  %v8572_v14 = vld [vmem:[#allocation2 + $0x3b8] sm:$0xff]  ;;  %v7348_v29 = vcombine.low %v4744_v5, %v4746_v8  ;;  %v4752_v34 = vunpack.c.h.s8.bf16 %v8543_v45  ;;  %v4756_v39 = vunpack.c.h.s8.bf16 %v8553_v47 }
 0x5f6   :  { %4587 = vmatpush1.bf16.msra.mxu0 %v4575_v16  ;;  %4618 = vmatprep.mubr.bf16.mxu0 %v7927_v0  ;;  %v7344_v16 = vcombine.low %v4740_v53, %v4742_v54  ;;  %v7363_v24 = vcombine.high %v4759_v13, %v4761_v63  ;;  %v4763_v26 = vunpack.c.l.s8.bf16 %v8570_v1  ;;  %v4765_v10 = vunpack.c.l.s8.bf16 %v8572_v14 }
 0x5f7   :  { %7328 = vmatprep.subr.msk.bf16.mxu0 %vm118_vm0, %v7325_v18  ;;  %5331 = vmatpush1.bf16.msra.mxu1 %v7330_v33  ;;  %v4745_v33 = vunpack.c.l.s8.bf16 %v8526_v35  ;;  %v7349_v18 = vcombine.high %v4744_v5, %v4746_v8  ;;  %v4754_v35 = vunpack.c.h.s8.bf16 %v8545_v41  ;;  %v4764_v47 = vunpack.c.h.s8.bf16 %v8570_v1  ;;  %v4701_v5 = vld [vmem:[#allocation2 + $0x3e0] sm:$0xff]  ;;  %v4702_v8 = vld [vmem:[#allocation2 + $0x3e8] sm:$0xff] }
 0x5f8   :  { %5332 = vmatprep.subr.bf16.mxu1 %v7335_v19  ;;  %v4748_v19 = vunpack.c.h.s8.bf16 %v8533_v15  ;;  %v4700_v15 = vld [vmem:[#allocation2 + $0x3d8] sm:$0xff] }
 0x5f9   :  { %v7347_v25 = vcombine.high %v4743_v38, %v4745_v33  ;;  %v7346_v43 = vcombine.low %v4743_v38, %v4745_v33  ;;  %v4699_v33 = vld [vmem:[#allocation2 + $0x3d0] sm:$0xff]  ;;  %v7357_v50 = vcombine.high %v4752_v34, %v4754_v35  ;;  %v4773_v45 = vunpack.c.l.s8.bf16 %v4700_v15 }
 0x5fa   :  { %v7353_v31 = vcombine.high %v4748_v19, %v4750_v57  ;;  %v7352_v58 = vcombine.low %v4748_v19, %v4750_v57  ;;  %v4771_v40 = vunpack.c.l.s8.bf16 %v4699_v33  ;;  %v7356_v41 = vcombine.low %v4752_v34, %v4754_v35  ;;  %v4703_v19 = vld [vmem:[#allocation2 + $0x3f0] sm:$0xff]  ;;  %v4704_v57 = vld [vmem:[#allocation2 + $0x3f8] sm:$0xff]  ;;  %v4705_v34 = vld [vmem:[#allocation2 + $0x400] sm:$0xff] }
 0x5fb   :  { %5333 = vmatpush1.bf16.msra.mxu1 %v7334_v27  ;;  %v4697_v27 = vld [vmem:[#allocation2 + $0x3c0] sm:$0xff]  ;;  %v4706_v35 = vld [vmem:[#allocation2 + $0x408] sm:$0xff] }
 0x5fc   :  { %5334 = vmatprep.subr.bf16.mxu1 %v7339_v28  ;;  %v4698_v28 = vld [vmem:[#allocation2 + $0x3c8] sm:$0xff]  ;;  %v4768_v54 = vunpack.c.h.s8.bf16 %v4697_v27 }
 0x5fd   :  { %7327 = vmatmul.mubr.msk.bf16.vlgmr.msra.gmra.mrb[28].mxu0 %vm114_vm1, %v8039_v6  ;;  %v4769_v38 = vunpack.c.l.s8.bf16 %v4698_v28 }
 0x5fe   :  { %4628 = vmatpush1.bf16.msra.mxu0 %v4581_v36  ;;  %4659 = vmatprep.mubr.bf16.mxu0 %v7927_v0  ;;  %v7362_v36 = vcombine.low %v4759_v13, %v4761_v63  ;;  %v4776_v13 = vunpack.c.h.s8.bf16 %v4701_v5  ;;  %v4778_v63 = vunpack.c.h.s8.bf16 %v4702_v8 }
 0x5ff   :  { %5412 = vmatprep.subr.bf16.mxu0 %v8481_v32  ;;  %5335 = vmatpush1.bf16.msra.mxu1 %v7338_v20  ;;  %v4738_v32 = vunpack.c.h.s8.bf16 %v8510_v11  ;;  %v7367_v20 = vcombine.high %v4763_v26, %v4765_v10 }
 0x600   :  { %5336 = vmatprep.subr.bf16.mxu1 %v7343_v37  ;;  %v4767_v37 = vunpack.c.l.s8.bf16 %v4697_v27 }
 0x601   :  { %v7341_v52 = vcombine.high %v4736_v46, %v4738_v32 }
 0x602   :  { %v7371_v17 = vcombine.high %v4767_v37, %v4769_v38 }
 0x603   :  { %5337 = vmatpush1.bf16.msra.mxu1 %v7342_v49  ;;  %v4758_v49 = vunpack.c.h.s8.bf16 %v8555_v55 }
 0x604   :  { %5338 = vmatprep.subr.bf16.mxu1 %v7347_v25  ;;  %v7366_v25 = vcombine.low %v4763_v26, %v4765_v10  ;;  %v4780_v26 = vunpack.c.h.s8.bf16 %v4703_v19  ;;  %v4782_v10 = vunpack.c.h.s8.bf16 %v4704_v57 }
 0x605   :  { %7329 = vmatmul.mubr.msk.bf16.vlgmr.msra.gmra.mrb[32].mxu0 %vm114_vm1, %v8039_v6  ;;  %v4757_v6 = vunpack.c.l.s8.bf16 %v8555_v55  ;;  %v7360_v44 = vcombine.low %v4756_v39, %v4758_v49  ;;  %v4766_v55 = vunpack.c.h.s8.bf16 %v8572_v14  ;;  %v7381_v14 = vcombine.high %v4776_v13, %v4778_v63 }
 0x606   :  { %5413 = vmatpush1.bf16.msra.mxu0 %v8483_v21  ;;  %v7340_v21 = vcombine.low %v4736_v46, %v4738_v32  ;;  %v4760_v46 = vunpack.c.h.s8.bf16 %v8562_v30  ;;  %v4762_v32 = vunpack.c.h.s8.bf16 %v8564_v3  ;;  %v4774_v30 = vunpack.c.h.s8.bf16 %v4700_v15 }
 0x607   :  { %5414 = vmatprep.subr.bf16.mxu0 %v7337_v42  ;;  %5339 = vmatpush1.bf16.msra.mxu1 %v7346_v43  ;;  %v7359_v11 = vcombine.high %v4755_v2, %v4757_v6  ;;  %v7358_v22 = vcombine.low %v4755_v2, %v4757_v6  ;;  %v7361_v42 = vcombine.high %v4756_v39, %v4758_v49  ;;  %v4772_v6 = vunpack.c.h.s8.bf16 %v4699_v33  ;;  %v4707_v39 = vld [vmem:[#allocation2 + $0x410] sm:$0xff]  ;;  %v4708_v49 = vld [vmem:[#allocation2 + $0x418] sm:$0xff] }
 0x608   :  { %5340 = vmatprep.subr.bf16.mxu1 %v7351_v51  ;;  %v7370_v43 = vcombine.low %v4767_v37, %v4769_v38  ;;  %v7375_v51 = vcombine.high %v4771_v40, %v4773_v45  ;;  %v7365_v60 = vcombine.high %v4760_v46, %v4762_v32  ;;  %v7369_v53 = vcombine.high %v4764_v47, %v4766_v55 }
 0x609   :  { %v4784_v37 = vunpack.c.h.s8.bf16 %v4705_v34  ;;  %v4786_v38 = vunpack.c.h.s8.bf16 %v4706_v35 }
 0x60a   :  { %5415 = vmatpush1.bf16.msra.mxu0 %v7336_v48  ;;  %v7374_v48 = vcombine.low %v4771_v40, %v4773_v45  ;;  %v4788_v40 = vunpack.c.h.s8.bf16 %v4707_v39  ;;  %v4790_v45 = vunpack.c.h.s8.bf16 %v4708_v49 }
 0x60b   :  { %5416 = vmatprep.subr.bf16.mxu0 %v7341_v52  ;;  %5341 = vmatpush1.bf16.msra.mxu1 %v7350_v56  ;;  %v7364_v52 = vcombine.low %v4760_v46, %v4762_v32  ;;  %v4770_v56 = vunpack.c.h.s8.bf16 %v4698_v28  ;;  %v7385_v28 = vcombine.high %v4780_v26, %v4782_v10  ;;  %v7389_v15 = vcombine.high %v4784_v37, %v4786_v38 }
 0x60c   :  { %5342 = vmatprep.subr.bf16.mxu1 %v7355_v62  ;;  %v7368_v62 = vcombine.low %v4764_v47, %v4766_v55  ;;  %v7392_v32 = vcombine.low %v4788_v40, %v4790_v45 }
 0x60d   :  { %v7373_v2 = vcombine.high %v4768_v54, %v4770_v56  ;;  %v7372_v3 = vcombine.low %v4768_v54, %v4770_v56 }
 0x60e   :  { %5417 = vmatpush1.bf16.msra.mxu0 %v7340_v21  ;;  %v7377_v21 = vcombine.high %v4772_v6, %v4774_v30 }
 0x60f   :  { %5418 = vmatprep.subr.bf16.mxu0 %v7345_v4  ;;  %5343 = vmatpush1.bf16.msra.mxu1 %v7354_v9  ;;  %v7376_v4 = vcombine.low %v4772_v6, %v4774_v30  ;;  %v4775_v9 = vunpack.c.l.s8.bf16 %v4701_v5  ;;  %v8592_v5 = vld [vmem:[%s8803_s2 + $0x8] sm:$0xf] }
 0x610   :  { %5344 = vmatprep.subr.bf16.mxu1 %v7359_v11  ;;  %v4777_v11 = vunpack.c.l.s8.bf16 %v4702_v8 }
 0x612   :  { %5419 = vmatpush1.bf16.msra.mxu0 %v7344_v16  ;;  %v7379_v1 = vcombine.high %v4775_v9, %v4777_v11  ;;  %v7378_v16 = vcombine.low %v4775_v9, %v4777_v11 }
 0x613   :  { %5420 = vmatprep.subr.bf16.mxu0 %v7349_v18  ;;  %5345 = vmatpush1.bf16.msra.mxu1 %v7358_v22  ;;  %v7380_v18 = vcombine.low %v4776_v13, %v4778_v63  ;;  %v4779_v22 = vunpack.c.l.s8.bf16 %v4703_v19  ;;  %v4547_v13 = vrot.slane %v8592_v5, %v8122_v59 }
 0x614   :  { %5346 = vmatprep.subr.bf16.mxu1 %v7363_v24  ;;  %v4781_v24 = vunpack.c.l.s8.bf16 %v4704_v57  ;;  %v4712_v57 = vld [vmem:[#allocation2 + $0x438] sm:$0xff] }
 0x616   :  { %5421 = vmatpush1.bf16.msra.mxu0 %v7348_v29  ;;  %v7383_v27 = vcombine.high %v4779_v22, %v4781_v24  ;;  %v7382_v29 = vcombine.low %v4779_v22, %v4781_v24 }
 0x617   :  { %5422 = vmatprep.subr.bf16.mxu0 %v7353_v31  ;;  %5347 = vmatpush1.bf16.msra.mxu1 %v7362_v36  ;;  %v7384_v31 = vcombine.low %v4780_v26, %v4782_v10  ;;  %v4783_v36 = vunpack.c.l.s8.bf16 %v4705_v34 }
 0x618   :  { %5348 = vmatprep.subr.bf16.mxu1 %v7367_v20  ;;  %v4785_v20 = vunpack.c.l.s8.bf16 %v4706_v35 }
 0x61a   :  { %5423 = vmatpush1.bf16.msra.mxu0 %v7352_v58  ;;  %v7387_v33 = vcombine.high %v4783_v36, %v4785_v20  ;;  %v7386_v58 = vcombine.low %v4783_v36, %v4785_v20  ;;  %v4797_v36 = vunpack.c.l.s8.bf16 %v4712_v57 }
 0x61b   :  { %5424 = vmatprep.subr.bf16.mxu0 %v7357_v50  ;;  %5349 = vmatpush1.bf16.msra.mxu1 %v7366_v25  ;;  %v7388_v50 = vcombine.low %v4784_v37, %v4786_v38  ;;  %v4787_v25 = vunpack.c.l.s8.bf16 %v4707_v39  ;;  %v4798_v37 = vunpack.c.h.s8.bf16 %v4712_v57  ;;  %v4720_v57 = vld [vmem:[#allocation2 + $0x478] sm:$0xff] }
 0x61c   :  { %5350 = vmatprep.subr.bf16.mxu1 %v7371_v17  ;;  %v4789_v17 = vunpack.c.l.s8.bf16 %v4708_v49 }
 0x61e   :  { %5425 = vmatpush1.bf16.msra.mxu0 %v7356_v41  ;;  %v7391_v41 = vcombine.high %v4787_v25, %v4789_v17  ;;  %v7390_v46 = vcombine.low %v4787_v25, %v4789_v17  ;;  %v4559_v25 = vrot.slane %v8592_v5, %v8137_v12 }
 0x61f   :  { %5426 = vmatprep.subr.bf16.mxu0 %v7361_v42  ;;  %5351 = vmatpush1.bf16.msra.mxu1 %v7370_v43  ;;  %v7393_v42 = vcombine.high %v4788_v40, %v4790_v45  ;;  %v4709_v43 = vld [vmem:[#allocation2 + $0x420] sm:$0xff] }
 0x620   :  { %5352 = vmatprep.subr.bf16.mxu1 %v7375_v51  ;;  %v4710_v51 = vld [vmem:[#allocation2 + $0x428] sm:$0xff]  ;;  %v4792_v47 = vunpack.c.h.s8.bf16 %v4709_v43 }
 0x621   :  { %v4794_v55 = vunpack.c.h.s8.bf16 %v4710_v51 }
 0x622   :  { %5427 = vmatpush1.bf16.msra.mxu0 %v7360_v44  ;;  %v4791_v44 = vunpack.c.l.s8.bf16 %v4709_v43 }
 0x623   :  { %5428 = vmatprep.subr.bf16.mxu0 %v7365_v60  ;;  %5353 = vmatpush1.bf16.msra.mxu1 %v7374_v48  ;;  %v4793_v60 = vunpack.c.l.s8.bf16 %v4710_v51  ;;  %v7396_v54 = vcombine.low %v4792_v47, %v4794_v55 }
 0x624   :  { %5354 = vmatprep.subr.bf16.mxu1 %v7379_v1  ;;  %v4551_v1 = vrot.slane %v8592_v5, %v8130_v61 }
 0x625   :  { %v7395_v48 = vcombine.high %v4791_v44, %v4793_v60 }
 0x626   :  { %5429 = vmatpush1.bf16.msra.mxu0 %v7364_v52  ;;  %v7397_v52 = vcombine.high %v4792_v47, %v4794_v55  ;;  %v4717_v47 = vld [vmem:[#allocation2 + $0x460] sm:$0xff] }
 0x627   :  { %5430 = vmatprep.subr.bf16.mxu0 %v7369_v53  ;;  %5355 = vmatpush1.bf16.msra.mxu1 %v7378_v16  ;;  %v7394_v53 = vcombine.low %v4791_v44, %v4793_v60  ;;  %v8603_v16 = vld [vmem:[%s8812_s11] ss:$0 sm:$0xff] }
 0x628   :  { %5356 = vmatprep.subr.bf16.mxu1 %v7383_v27 }
 0x62a   :  { %5431 = vmatpush1.bf16.msra.mxu0 %v7368_v62 }
 0x62b   :  { %5432 = vmatprep.subr.bf16.mxu0 %v7373_v2  ;;  %5357 = vmatpush1.bf16.msra.mxu1 %v7382_v29  ;;  %v7292_v2 = vld [vmem:[%s8811_s10 + $0x1] ss:$0 sm:$0xff] }
 0x62c   :  { %5358 = vmatprep.subr.bf16.mxu1 %v7387_v33  ;;  %v4713_v29 = vld [vmem:[#allocation2 + $0x440] sm:$0xff] }
 0x62e   :  { %5433 = vmatpush1.bf16.msra.mxu0 %v7372_v3 }
 0x62f   :  { %5434 = vmatprep.subr.bf16.mxu0 %v7377_v21  ;;  %5359 = vmatpush1.bf16.msra.mxu1 %v7386_v58 }
 0x630   :  { %5360 = vmatprep.subr.bf16.mxu1 %v7391_v41  ;;  %v4715_v41 = vld [vmem:[#allocation2 + $0x450] sm:$0xff] }
 0x632   :  { %5435 = vmatpush1.bf16.msra.mxu0 %v7376_v4 }
 0x633   :  { %5436 = vmatprep.subr.bf16.mxu0 %v7381_v14  ;;  %5361 = vmatpush1.bf16.msra.mxu1 %v7390_v46  ;;  %v4711_v14 = vld [vmem:[#allocation2 + $0x430] sm:$0xff] }
 0x634   :  { %5371 = vmatprep.subr.bf16.mxu1 %v7395_v48  ;;  %v4796_v20 = vunpack.c.h.s8.bf16 %v4711_v14 }
 0x636   :  { %5437 = vmatpush1.bf16.msra.mxu0 %v7380_v18  ;;  %v7401_v45 = vcombine.high %v4796_v20, %v4798_v37  ;;  %v7400_v43 = vcombine.low %v4796_v20, %v4798_v37 }
 0x637   :  { %5438 = vmatprep.subr.bf16.mxu0 %v7385_v28  ;;  %v4795_v28 = vunpack.c.l.s8.bf16 %v4711_v14  ;;  %v4719_v14 = vld [vmem:[#allocation2 + $0x470] sm:$0xff] }
 0x639   :  { %v7399_v40 = vcombine.high %v4795_v28, %v4797_v36 }
 0x63a   :  { %5439 = vmatpush1.bf16.msra.mxu0 %v7384_v31  ;;  %v4714_v31 = vld [vmem:[#allocation2 + $0x448] sm:$0xff] }
 0x63b   :  { %5440 = vmatprep.subr.bf16.mxu0 %v7389_v15  ;;  %v4799_v15 = vunpack.c.l.s8.bf16 %v4713_v29  ;;  %v4801_v58 = vunpack.c.l.s8.bf16 %v4714_v31  ;;  %v4802_v49 = vunpack.c.h.s8.bf16 %v4714_v31  ;;  %v4813_v31 = vunpack.c.l.s8.bf16 %v4720_v57 }
 0x63d   :  { %v7403_v44 = vcombine.high %v4799_v15, %v4801_v58 }
 0x63e   :  { %5441 = vmatpush1.bf16.msra.mxu0 %v7388_v50  ;;  %v4800_v50 = vunpack.c.h.s8.bf16 %v4713_v29  ;;  %v4721_v29 = vld [vmem:[#allocation2 + $0x480] sm:$0xff] }
 0x63f   :  { %5442 = vmatprep.subr.bf16.mxu0 %v7393_v42  ;;  %v4716_v42 = vld [vmem:[#allocation2 + $0x458] sm:$0xff] }
 0x640   :  { %v7405_v60 = vcombine.high %v4800_v50, %v4802_v49 }
 0x642   :  { %5443 = vmatpush1.bf16.msra.mxu0 %v7392_v32  ;;  %v7398_v32 = vcombine.low %v4795_v28, %v4797_v36  ;;  %v4811_v28 = vunpack.c.l.s8.bf16 %v4719_v14  ;;  %v4722_v36 = vld [vmem:[#allocation2 + $0x488] sm:$0xff] }
 0x643   :  { %5453 = vmatprep.subr.bf16.mxu0 %v7397_v52  ;;  %v4803_v52 = vunpack.c.l.s8.bf16 %v4715_v41 }
 0x6c8   :  { %v7654_v56 = vpop.f32.mrb[24].mxu0  ;;  %v4497_v62 = vpop.f32.mrb[32].mxu1 }
 0x6c9   :  { %v7655_v6 = vpop.f32.mrb[25].mxu0  ;;  %v4499_v30 = vpop.f32.mrb[33].mxu1 }
 0x6ca   :  { %v7656_v3 = vadd.f32 %v7655_v6, %v7654_v56  ;;  %v7657_v21 = vpop.f32.mrb[26].mxu0  ;;  %v4500_v4 = vpop.f32.mrb[34].mxu1  ;;  %v4805_v56 = vunpack.c.l.s8.bf16 %v4716_v42  ;;  %v4718_v6 = vld [vmem:[#allocation2 + $0x468] sm:$0xff] }
 0x6cb   :  { %v7658_v8 = vpop.f32.mrb[27].mxu0  ;;  %v4501_v9 = vpop.f32.mrb[35].mxu1  ;;  %v7402_v21 = vcombine.low %v4799_v15, %v4801_v58  ;;  %v7404_v4 = vcombine.low %v4800_v50, %v4802_v49  ;;  %v4817_v15 = vunpack.c.l.s8.bf16 %v4722_v36  ;;  %v4816_v58 = vunpack.c.h.s8.bf16 %v4721_v29 }
 0x6cc   :  { %v4458_v11 = vadd.f32 %v7656_v3, %v7292_v2  ;;  %v4806_v2 = vunpack.c.h.s8.bf16 %v4716_v42  ;;  %v4807_v8 = vunpack.c.l.s8.bf16 %v4717_v47  ;;  %v4810_v9 = vunpack.c.h.s8.bf16 %v4718_v6 }
 0x6cd   :  { %v4818_v50 = vunpack.c.h.s8.bf16 %v4722_v36 }
 0x6ce   :  { %v8596_v63 = vadd.f32 %v4497_v62, %v4458_v11  ;;  %v4804_v62 = vunpack.c.h.s8.bf16 %v4715_v41 }
 0x6d0   :  { %v8607_v18 = vsub.f32 %v8603_v16, %v8596_v63  ;;  %v4620_v19 = vpop.f32.mrb[28].mxu0 }
 0x6d1   :  { %v4621_v22 = vadd.f32 %v4620_v19, %v4547_v13  ;;  %v4622_v24 = vpop.f32.mrb[29].mxu0  ;;  %v7407_v13 = vcombine.high %v4803_v52, %v4805_v56 }
 0x6d2   :  { %v4505_v26 = vmin.f32 %v8607_v18, 20.0  ;;  %v4623_v10 = vadd.f32 %v4622_v24, %v4551_v1  ;;  %v4624_v27 = vpop.f32.mrb[30].mxu0  ;;  %v7409_v1 = vcombine.high %v4804_v62, %v4806_v2  ;;  %v7406_v24 = vcombine.low %v4803_v52, %v4805_v56 }
 0x6d3   :  { %v4668_v34 = vmax.f32 %v4621_v22, 0.0  ;;  %v4625_v35 = vpop.f32.mrb[31].mxu0  ;;  %vm4504_vm9 = vcmp.gt.f32.partialorder %v8607_v18, 20.0 }
 0x6d4   :  { %v4506_v38 = vmul.f32 1.442695, %v4505_v26  ;;  %v4669_v33 = vmax.f32 %v4623_v10, 0.0  ;;  %v7408_v26 = vcombine.low %v4804_v62, %v4806_v2  ;;  %v4814_v35 = vunpack.c.h.s8.bf16 %v4720_v57 }
 0x6d5   :  { %v4672_v17 = vpack.c.bf16 %v4668_v34, %v4668_v34  ;;  %v4812_v34 = vunpack.c.h.s8.bf16 %v4719_v14  ;;  %v7420_v62 = vcombine.low %v4816_v58, %v4818_v50 }
 0x6d6   :  { %7831 = vpow2.f32 %v4506_v38  ;;  %v4673_v39 = vpack.c.bf16 %v4669_v33, %v4669_v33  ;;  %v4815_v38 = vunpack.c.l.s8.bf16 %v4721_v29  ;;  %v5559_v29 = vld [vmem:[#allocation5 + $0x330] sm:$0xff] }
 0x6d7   :  { %v7417_v49 = vcombine.high %v4812_v34, %v4814_v35 }
 0x6d8   :  { %5362 = vmatprep.mubr.bf16.mxu1 %v4673_v39  ;;  %5444 = vmatprep.mubr.bf16.mxu0 %v4673_v39  ;;  %v8612_v46 = vpop.f32.mrb[32].mxu0  ;;  %v7415_v39 = vcombine.high %v4811_v28, %v4813_v31  ;;  %v7419_v42 = vcombine.high %v4815_v38, %v4817_v15  ;;  %v7418_v56 = vcombine.low %v4815_v38, %v4817_v15  ;;  %v5561_v38 = vld [vmem:[#allocation5 + $0x340] sm:$0xff] }
 0x6d9   :  { %5363 = vmatmul.mubr.bf16.vlgmr.msra.gmra.mrb[36].mxu1 %v4672_v17  ;;  %5445 = vmatmul.mubr.bf16.vlgmr.msra.gmra.mrb[36].mxu0 %v4672_v17  ;;  %v4663_v51 = vpop.f32.mrb[33].mxu0  ;;  %v4724_v17 = vld [vmem:[#allocation2 + $0x498] sm:$0xff] }
 0x6da   :  { %5372 = vmatpush1.bf16.msra.mxu1 %v7394_v53  ;;  %5454 = vmatpush1.bf16.msra.mxu0 %v7396_v54  ;;  %v4664_v55 = vadd.f32 %v4663_v51, %v4559_v25  ;;  %v4665_v48 = vpop.f32.mrb[34].mxu0  ;;  %v4809_v53 = vunpack.c.l.s8.bf16 %v4718_v6  ;;  %v4808_v54 = vunpack.c.h.s8.bf16 %v4717_v47  ;;  %v4723_v25 = vld [vmem:[#allocation2 + $0x490] sm:$0xff]  ;;  %v4725_v51 = vld [vmem:[#allocation2 + $0x4a0] sm:$0xff]  ;;  %v4821_v47 = vunpack.c.l.s8.bf16 %v4724_v17 }
 0x6db   :  { %5373 = vmatprep.subr.bf16.mxu1 %v7399_v40  ;;  %5455 = vmatprep.subr.bf16.mxu0 %v7401_v45  ;;  %v4666_v30 = vpop.f32.mrb[35].mxu0  ;;  %v7414_v40 = vcombine.low %v4811_v28, %v4813_v31  ;;  %v7416_v45 = vcombine.low %v4812_v34, %v4814_v35  ;;  %v4822_v48 = vunpack.c.h.s8.bf16 %v4724_v17  ;;  %v4823_v2 = vunpack.c.l.s8.bf16 %v4725_v51  ;;  %v5560_v31 = vld [vmem:[#allocation5 + $0x338] sm:$0xff] }
 0x6dc   :  { %v4671_v3 = vmax.f32 %v4664_v55, 0.0  ;;  %v7411_v10 = vcombine.high %v4807_v8, %v4809_v53  ;;  %v7413_v27 = vcombine.high %v4808_v54, %v4810_v9  ;;  %v7410_v20 = vcombine.low %v4807_v8, %v4809_v53 }
 0x6dd   :  { %v7412_v37 = vcombine.low %v4808_v54, %v4810_v9  ;;  %v4820_v55 = vunpack.c.h.s8.bf16 %v4723_v25  ;;  %v4555_v8 = vrot.slane %v8592_v5, %v8146_v23  ;;  %v5557_v9 = vld [vmem:[#allocation5 + $0x320] sm:$0xff] }
 0x6de   :  { %5374 = vmatpush1.bf16.msra.mxu1 %v7398_v32  ;;  %5456 = vmatpush1.bf16.msra.mxu0 %v7400_v43  ;;  %v4675_v11 = vpack.c.bf16 %v4671_v3, %v4671_v3  ;;  %v7421_v32 = vcombine.high %v4816_v58, %v4818_v50  ;;  %v4819_v43 = vunpack.c.l.s8.bf16 %v4723_v25  ;;  %v5607_v5 = vunpack.c.l.s8.bf16 %v5557_v9 }
 0x6df   :  { %5375 = vmatprep.subr.bf16.mxu1 %v7403_v44  ;;  %5457 = vmatprep.subr.bf16.mxu0 %v7405_v60  ;;  %v4726_v44 = vld [vmem:[#allocation2 + $0x4a8] sm:$0xff]  ;;  %v7425_v54 = vcombine.high %v4820_v55, %v4822_v48  ;;  %v5614_v50 = vunpack.c.h.s8.bf16 %v5560_v31 }
 0x6e0   :  { %v7832_v19 = vpop.eup %7831  ;;  %7430 = vmatprep.mubr.msk.bf16.mxu1 %vm871_vm2, %v4675_v11  ;;  %7431 = vmatprep.mubr.msk.bf16.mxu0 %vm871_vm2, %v4675_v11  ;;  %v4825_v6 = vunpack.c.l.s8.bf16 %v4726_v44  ;;  %v7423_v53 = vcombine.high %v4819_v43, %v4821_v47  ;;  %v7422_v14 = vcombine.low %v4819_v43, %v4821_v47 }
 0x6e1   :  { %v4508_v22 = vadd.f32 1.0, %v7832_v19  ;;  %v4511_v33 = vmul.f32 -0.5, %v7832_v19  ;;  %v4514_v60 = vand.u32 2147483647, %v7832_v19 }
 0x6e2   :  { %5376 = vmatpush1.bf16.msra.mxu1 %v7402_v21  ;;  %5458 = vmatpush1.bf16.msra.mxu0 %v7404_v4  ;;  %v4824_v21 = vunpack.c.h.s8.bf16 %v4725_v51  ;;  %v4826_v4 = vunpack.c.h.s8.bf16 %v4726_v44  ;;  %v7426_v34 = vcombine.low %v4823_v2, %v4825_v6  ;;  %v5563_v44 = vld [vmem:[#allocation5 + $0x350] sm:$0xff] }
 0x6e3   :  { %7833 = vlog2.f32 %v4508_v22  ;;  %5377 = vmatprep.subr.bf16.mxu1 %v7407_v13  ;;  %5459 = vmatprep.subr.bf16.mxu0 %v7409_v1  ;;  %v4512_v41 = vadd.f32 1.0, %v4511_v33  ;;  %vm4515_vm8 = vcmp.lt.f32.partialorder %v4514_v60, 0.0004427343  ;;  %v5558_v13 = vld [vmem:[#allocation5 + $0x328] sm:$0xff]  ;;  %v7427_v22 = vcombine.high %v4823_v2, %v4825_v6  ;;  %v5564_v60 = vld [vmem:[#allocation5 + $0x358] sm:$0xff] }
 0x6e4   :  { %v5610_v28 = vunpack.c.h.s8.bf16 %v5558_v13  ;;  %v7428_v35 = vcombine.low %v4824_v21, %v4826_v4  ;;  %v5620_v2 = vunpack.c.h.s8.bf16 %v5563_v44  ;;  %v5622_v6 = vunpack.c.h.s8.bf16 %v5564_v60 }
 0x6e5   :  { %v4513_v3 = vmul.f32 %v7832_v19, %v4512_v41  ;;  %v7424_v19 = vcombine.low %v4820_v55, %v4822_v48  ;;  %v5616_v41 = vunpack.c.h.s8.bf16 %v5561_v38 }
 0x6e6   :  { %5378 = vmatpush1.bf16.msra.mxu1 %v7406_v24  ;;  %5460 = vmatpush1.bf16.msra.mxu0 %v7408_v26  ;;  %v7429_v24 = vcombine.high %v4824_v21, %v4826_v4  ;;  %v4662_v26 = vadd.f32 %v8612_v46, %v4555_v8  ;;  %v5611_v46 = vunpack.c.l.s8.bf16 %v5559_v29 }
 0x6e7   :  { %5379 = vmatprep.subr.bf16.mxu1 %v7411_v10  ;;  %5461 = vmatprep.subr.bf16.mxu0 %v7413_v27  ;;  %v5609_v10 = vunpack.c.l.s8.bf16 %v5558_v13  ;;  %v5608_v27 = vunpack.c.h.s8.bf16 %v5557_v9  ;;  %v7449_v13 = vcombine.high %v5620_v2, %v5622_v6 }
 0x6e8   :  { %v4670_v33 = vmax.f32 %v4662_v26, 0.0 }
 0x6e9   :  { %v7435_v15 = vcombine.high %v5607_v5, %v5609_v10  ;;  %v7437_v58 = vcombine.high %v5608_v27, %v5610_v28  ;;  %v7434_v25 = vcombine.low %v5607_v5, %v5609_v10  ;;  %v7436_v17 = vcombine.low %v5608_v27, %v5610_v28  ;;  %v5569_v27 = vld [vmem:[#allocation5 + $0x380] sm:$0xff] }
 0x6ea   :  { %5380 = vmatpush1.bf16.msra.mxu1 %v7410_v20  ;;  %5462 = vmatpush1.bf16.msra.mxu0 %v7412_v37  ;;  %v5613_v20 = vunpack.c.l.s8.bf16 %v5560_v31  ;;  %v5612_v37 = vunpack.c.h.s8.bf16 %v5559_v29 }
 0x6eb   :  { %5381 = vmatprep.subr.bf16.mxu1 %v7415_v39  ;;  %5463 = vmatprep.subr.bf16.mxu0 %v7417_v49  ;;  %v5562_v39 = vld [vmem:[#allocation5 + $0x348] sm:$0xff] }
 0x6ec   :  { %v7439_v43 = vcombine.high %v5611_v46, %v5613_v20  ;;  %v7441_v51 = vcombine.high %v5612_v37, %v5614_v50  ;;  %v7438_v47 = vcombine.low %v5611_v46, %v5613_v20  ;;  %v7440_v55 = vcombine.low %v5612_v37, %v5614_v50  ;;  %v5571_v50 = vld [vmem:[#allocation5 + $0x390] sm:$0xff] }
 0x6ed   :  { %v7834_v52 = vpop.eup %7833  ;;  %v5631_v46 = vunpack.c.l.s8.bf16 %v5569_v27  ;;  %v5632_v37 = vunpack.c.h.s8.bf16 %v5569_v27 }
 0x6ee   :  { %v4510_v30 = vmul.f32 0.6931472, %v7834_v52  ;;  %5382 = vmatpush1.bf16.msra.mxu1 %v7414_v40  ;;  %5464 = vmatpush1.bf16.msra.mxu0 %v7416_v45  ;;  %v5615_v40 = vunpack.c.l.s8.bf16 %v5561_v38  ;;  %v5617_v45 = vunpack.c.l.s8.bf16 %v5562_v39 }
 0x6ef   :  { %5383 = vmatprep.subr.bf16.mxu1 %v7419_v42  ;;  %5465 = vmatprep.subr.bf16.mxu0 %v7421_v32  ;;  %v5618_v42 = vunpack.c.h.s8.bf16 %v5562_v39  ;;  %v4674_v32 = vpack.c.bf16 %v4670_v33, %v4670_v33  ;;  %v5572_v39 = vld [vmem:[#allocation5 + $0x398] sm:$0xff] }
 0x6f0   :  { %v4516_v11 = vsel %vm4515_vm8, %v4513_v3, %v4510_v30  ;;  %v7443_v48 = vcombine.high %v5615_v40, %v5617_v45  ;;  %v5565_v30 = vld [vmem:[#allocation5 + $0x360] sm:$0xff]  ;;  %v5566_v3 = vld [vmem:[#allocation5 + $0x368] sm:$0xff]  ;;  %v7442_v21 = vcombine.low %v5615_v40, %v5617_v45  ;;  %v5635_v45 = vunpack.c.l.s8.bf16 %v5571_v50 }
 0x6f1   :  { %v4517_v1 = vsel %vm4504_vm9, %v8607_v18, %v4516_v11  ;;  %v8625_v18 = vld [vmem:[%s8813_s12] ss:$0 sm:$0xff]  ;;  %v7445_v52 = vcombine.high %v5616_v41, %v5618_v42  ;;  %v7444_v4 = vcombine.low %v5616_v41, %v5618_v42  ;;  %v5623_v8 = vunpack.c.l.s8.bf16 %v5565_v30  ;;  %v5573_v41 = vld [vmem:[#allocation5 + $0x3a0] sm:$0xff]  ;;  %v5574_v42 = vld [vmem:[#allocation5 + $0x3a8] sm:$0xff] }
 0x6f2   :  { %v4518_v57 = vsub.f32 %v8603_v16, %v4517_v1  ;;  %5384 = vmatpush1.bf16.msra.mxu1 %v7418_v56  ;;  %5466 = vmatpush1.bf16.msra.mxu0 %v7420_v62  ;;  %v5619_v56 = vunpack.c.l.s8.bf16 %v5563_v44  ;;  %v5621_v62 = vunpack.c.l.s8.bf16 %v5564_v60  ;;  %v5626_v9 = vunpack.c.h.s8.bf16 %v5566_v3  ;;  %v5567_v1 = vld [vmem:[#allocation5 + $0x370] sm:$0xff] }
 0x6f3   :  { %5385 = vmatprep.subr.bf16.mxu1 %v7423_v53  ;;  %5467 = vmatprep.subr.bf16.mxu0 %v7425_v54  ;;  %v5625_v53 = vunpack.c.l.s8.bf16 %v5566_v3  ;;  %v5624_v54 = vunpack.c.h.s8.bf16 %v5565_v30  ;;  %v5627_v10 = vunpack.c.l.s8.bf16 %v5567_v1  ;;  %v5628_v29 = vunpack.c.h.s8.bf16 %v5567_v1 }
 0x6f4   :  { %v8628_v16 = vsub.f32 %v4518_v57, %v8625_v18  ;;  %v7447_v11 = vcombine.high %v5619_v56, %v5621_v62  ;;  %v7446_v57 = vcombine.low %v5619_v56, %v5621_v62  ;;  %v5638_v44 = vunpack.c.h.s8.bf16 %v5572_v39 }
 0x6f5   :  { %v7451_v5 = vcombine.high %v5623_v8, %v5625_v53  ;;  %v7453_v26 = vcombine.high %v5624_v54, %v5626_v9  ;;  %v5641_v56 = vunpack.c.l.s8.bf16 %v5574_v42  ;;  %v5640_v62 = vunpack.c.h.s8.bf16 %v5573_v41 }
 0x6f6   :  { %v4521_v36 = vmin.f32 %v8628_v16, 20.0  ;;  %5386 = vmatpush1.bf16.msra.mxu1 %v7422_v14  ;;  %5468 = vmatpush1.bf16.msra.mxu0 %v7424_v19  ;;  %v5568_v19 = vld [vmem:[#allocation5 + $0x378] sm:$0xff]  ;;  %vm4520_vm11 = vcmp.gt.f32.partialorder %v8628_v16, 20.0 }
 0x6f7   :  { %5387 = vmatprep.subr.bf16.mxu1 %v7427_v22  ;;  %5469 = vmatprep.subr.bf16.mxu0 %v7429_v24  ;;  %v7448_v24 = vcombine.low %v5620_v2, %v5622_v6  ;;  %v5629_v28 = vunpack.c.l.s8.bf16 %v5568_v19  ;;  %v5630_v31 = vunpack.c.h.s8.bf16 %v5568_v19  ;;  %v5642_v2 = vunpack.c.h.s8.bf16 %v5574_v42 }
 0x6f8   :  { %v4522_v49 = vmul.f32 1.442695, %v4521_v36  ;;  %v7452_v36 = vcombine.low %v5624_v54, %v5626_v9 }
 0x6f9   :  { %v7469_v1 = vcombine.high %v5640_v62, %v5642_v2 }
 0x6fa   :  { %7835 = vpow2.f32 %v4522_v49  ;;  %5388 = vmatpush1.bf16.msra.mxu1 %v7426_v34  ;;  %5470 = vmatpush1.bf16.msra.mxu0 %v7428_v35  ;;  %v5570_v34 = vld [vmem:[#allocation5 + $0x388] sm:$0xff]  ;;  %v7450_v35 = vcombine.low %v5623_v8, %v5625_v53  ;;  %v7454_v49 = vcombine.low %v5627_v10, %v5629_v28  ;;  %v5576_v8 = vld [vmem:[#allocation5 + $0x3b8] sm:$0xff] }
 0x6fb   :  { %6210 = vmatprep.subr.bf16.mxu1 %v7435_v15  ;;  %6292 = vmatprep.subr.bf16.mxu0 %v7437_v58  ;;  %v5633_v20 = vunpack.c.l.s8.bf16 %v5570_v34  ;;  %v5634_v38 = vunpack.c.h.s8.bf16 %v5570_v34  ;;  %v7455_v15 = vcombine.high %v5627_v10, %v5629_v28  ;;  %v7457_v58 = vcombine.high %v5628_v29, %v5630_v31 }
 0x6fd   :  { %5404 = vmatmul.mubr.bf16.vlgmr.msra.gmra.mrb[36].mxu1 %v4674_v32  ;;  %5486 = vmatmul.mubr.bf16.vlgmr.msra.gmra.mrb[36].mxu0 %v4674_v32  ;;  %v7461_v40 = vcombine.high %v5632_v37, %v5634_v38 }
 0x6fe   :  { %6211 = vmatpush1.bf16.msra.mxu1 %v7434_v25  ;;  %6293 = vmatpush1.bf16.msra.mxu0 %v7436_v17  ;;  %v7456_v25 = vcombine.low %v5628_v29, %v5630_v31  ;;  %v7459_v17 = vcombine.high %v5631_v46, %v5633_v20 }
 0x6ff   :  { %6212 = vmatprep.subr.bf16.mxu1 %v7439_v43  ;;  %6294 = vmatprep.subr.bf16.mxu0 %v7441_v51  ;;  %v5637_v43 = vunpack.c.l.s8.bf16 %v5572_v39  ;;  %v5636_v51 = vunpack.c.h.s8.bf16 %v5571_v50  ;;  %v5581_v39 = vld [vmem:[#allocation5 + $0x3e0] sm:$0xff] }
 0x701   :  { %v7463_v3 = vcombine.high %v5635_v45, %v5637_v43  ;;  %v7462_v54 = vcombine.low %v5635_v45, %v5637_v43  ;;  %v7464_v9 = vcombine.low %v5636_v51, %v5638_v44 }
 0x702   :  { %6213 = vmatpush1.bf16.msra.mxu1 %v7438_v47  ;;  %6295 = vmatpush1.bf16.msra.mxu0 %v7440_v55  ;;  %v7458_v55 = vcombine.low %v5631_v46, %v5633_v20  ;;  %v5580_v46 = vld [vmem:[#allocation5 + $0x3d8] sm:$0xff] }
 0x703   :  { %6214 = vmatprep.subr.bf16.mxu1 %v7443_v48  ;;  %6296 = vmatprep.subr.bf16.mxu0 %v7445_v52  ;;  %v7460_v48 = vcombine.low %v5632_v37, %v5634_v38  ;;  %v5639_v52 = vunpack.c.l.s8.bf16 %v5573_v41  ;;  %v5654_v50 = vunpack.c.h.s8.bf16 %v5580_v46  ;;  %v5656_v41 = vunpack.c.h.s8.bf16 %v5581_v39 }
 0x704   :  { %v8631_v14 = vpop.eup %7835 }
 0x705   :  { %v4524_v22 = vadd.f32 1.0, %v8631_v14  ;;  %v4527_v33 = vmul.f32 -0.5, %v8631_v14  ;;  %v4530_v60 = vand.u32 2147483647, %v8631_v14  ;;  %v7466_v27 = vcombine.low %v5639_v52, %v5641_v56 }
 0x706   :  { %6215 = vmatpush1.bf16.msra.mxu1 %v7442_v21  ;;  %6297 = vmatpush1.bf16.msra.mxu0 %v7444_v4  ;;  %v7465_v21 = vcombine.high %v5636_v51, %v5638_v44  ;;  %v5575_v4 = vld [vmem:[#allocation5 + $0x3b0] sm:$0xff]  ;;  %v5584_v44 = vld [vmem:[#allocation5 + $0x3f8] sm:$0xff] }
 0x707   :  { %6216 = vmatprep.subr.bf16.mxu1 %v7447_v11  ;;  %6298 = vmatprep.subr.bf16.mxu0 %v7449_v13  ;;  %7837 = vlog2.f32 %v4524_v22  ;;  %v4528_v32 = vadd.f32 1.0, %v4527_v33  ;;  %vm4531_vm10 = vcmp.lt.f32.partialorder %v4530_v60, 0.0004427343  ;;  %v7467_v13 = vcombine.high %v5639_v52, %v5641_v56  ;;  %v5583_v51 = vld [vmem:[#allocation5 + $0x3f0] sm:$0xff] }
 0x708   :  { %v5643_v19 = vunpack.c.l.s8.bf16 %v5575_v4  ;;  %v5644_v22 = vunpack.c.h.s8.bf16 %v5575_v4  ;;  %v5659_v52 = vunpack.c.l.s8.bf16 %v5583_v51  ;;  %v5661_v56 = vunpack.c.l.s8.bf16 %v5584_v44 }
 0x709   :  { %v4529_v30 = vmul.f32 %v8631_v14, %v4528_v32 }
 0x70a   :  { %6217 = vmatpush1.bf16.msra.mxu1 %v7446_v57  ;;  %6299 = vmatpush1.bf16.msra.mxu0 %v7448_v24  ;;  %v5645_v57 = vunpack.c.l.s8.bf16 %v5576_v8  ;;  %v5646_v24 = vunpack.c.h.s8.bf16 %v5576_v8  ;;  %v7486_v4 = vcombine.low %v5659_v52, %v5661_v56 }
 0x70b   :  { %6218 = vmatprep.subr.bf16.mxu1 %v7451_v5  ;;  %6300 = vmatprep.subr.bf16.mxu0 %v7453_v26  ;;  %v5577_v5 = vld [vmem:[#allocation5 + $0x3c0] sm:$0xff]  ;;  %v5578_v26 = vld [vmem:[#allocation5 + $0x3c8] sm:$0xff] }
 0x70c   :  { %v5647_v28 = vunpack.c.l.s8.bf16 %v5577_v5  ;;  %v5648_v29 = vunpack.c.h.s8.bf16 %v5577_v5  ;;  %v5650_v31 = vunpack.c.h.s8.bf16 %v5578_v26  ;;  %v7471_v34 = vcombine.high %v5643_v19, %v5645_v57  ;;  %v5588_v5 = vld [vmem:[#allocation5 + $0x418] sm:$0xff] }
 0x70d   :  { %v7470_v20 = vcombine.low %v5643_v19, %v5645_v57 }
 0x70e   :  { %6219 = vmatpush1.bf16.msra.mxu1 %v7450_v35  ;;  %6301 = vmatpush1.bf16.msra.mxu0 %v7452_v36  ;;  %v7473_v35 = vcombine.high %v5644_v22, %v5646_v24  ;;  %v5579_v36 = vld [vmem:[#allocation5 + $0x3d0] sm:$0xff]  ;;  %v7477_v38 = vcombine.high %v5648_v29, %v5650_v31 }
 0x70f   :  { %6220 = vmatprep.subr.bf16.mxu1 %v7455_v15  ;;  %6302 = vmatprep.subr.bf16.mxu0 %v7457_v58  ;;  %v5651_v33 = vunpack.c.l.s8.bf16 %v5579_v36  ;;  %v5653_v15 = vunpack.c.l.s8.bf16 %v5580_v46  ;;  %v5652_v58 = vunpack.c.h.s8.bf16 %v5579_v36 }
 0x711   :  { %v7838_v47 = vpop.eup %7837  ;;  %v7479_v32 = vcombine.high %v5651_v33, %v5653_v15  ;;  %v7481_v43 = vcombine.high %v5652_v58, %v5654_v50  ;;  %v7478_v60 = vcombine.low %v5651_v33, %v5653_v15 }
 0x712   :  { %6221 = vmatpush1.bf16.msra.mxu1 %v7454_v49  ;;  %6303 = vmatpush1.bf16.msra.mxu0 %v7456_v25  ;;  %v4526_v6 = vmul.f32 0.6931472, %v7838_v47  ;;  %v5582_v49 = vld [vmem:[#allocation5 + $0x3e8] sm:$0xff]  ;;  %v7480_v47 = vcombine.low %v5652_v58, %v5654_v50  ;;  %v8647_v58 = vld [vmem:[%s8805_s4 + $0x8] sm:$0xf] }
 0x713   :  { %6222 = vmatprep.subr.bf16.mxu1 %v7459_v17  ;;  %6304 = vmatprep.subr.bf16.mxu0 %v7461_v40  ;;  %v7476_v17 = vcombine.low %v5648_v29, %v5650_v31  ;;  %v5655_v40 = vunpack.c.l.s8.bf16 %v5581_v39  ;;  %v5657_v45 = vunpack.c.l.s8.bf16 %v5582_v49  ;;  %v5658_v42 = vunpack.c.h.s8.bf16 %v5582_v49  ;;  %v8652_v50 = vld [vmem:[%s8806_s5 + $0x8] sm:$0xf] }
 0x714   :  { %v4532_v53 = vsel %vm4531_vm10, %v4529_v30, %v4526_v6  ;;  %v5500_v39 = vrot.slane %v8647_v58, %v8122_v59  ;;  %v5504_v49 = vrot.slane %v8647_v58, %v8130_v61 }
 0x715   :  { %v4533_v11 = vsel %vm4520_vm11, %v8628_v16, %v4532_v53  ;;  %v7468_v16 = vcombine.low %v5640_v62, %v5642_v2  ;;  %v5660_v62 = vunpack.c.h.s8.bf16 %v5583_v51  ;;  %v5662_v2 = vunpack.c.h.s8.bf16 %v5584_v44  ;;  %v5585_v53 = vld [vmem:[#allocation5 + $0x400] sm:$0xff] }
 0x716   :  { %6223 = vmatpush1.bf16.msra.mxu1 %v7458_v55  ;;  %6305 = vmatpush1.bf16.msra.mxu0 %v7460_v48  ;;  %v4534_v14 = vadd.f32 %v8625_v18, %v4533_v11  ;;  %v5649_v18 = vunpack.c.l.s8.bf16 %v5578_v26  ;;  %v7483_v55 = vcombine.high %v5655_v40, %v5657_v45  ;;  %v7485_v48 = vcombine.high %v5656_v41, %v5658_v42 }
 0x717   :  { %6224 = vmatprep.subr.bf16.mxu1 %v7463_v3  ;;  %6306 = vmatprep.subr.bf16.mxu0 %v7465_v21  ;;  %v7482_v6 = vcombine.low %v5655_v40, %v5657_v45  ;;  %v7484_v30 = vcombine.low %v5656_v41, %v5658_v42  ;;  %v7487_v3 = vcombine.high %v5659_v52, %v5661_v56 }
 0x718   :  { %v4535_v10 = vsel %vm2310_vm7, %v4534_v14, %v8596_v63  ;;  %v7472_v63 = vcombine.low %v5644_v22, %v5646_v24  ;;  %v7475_v37 = vcombine.high %v5647_v28, %v5649_v18  ;;  %v7474_v25 = vcombine.low %v5647_v28, %v5649_v18  ;;  %v5587_v24 = vld [vmem:[#allocation5 + $0x410] sm:$0xff] }
 0x719   :  { %4537 = vst.msk [vmem:[#allocation7 + $0x8] sm:$0xff] %vm114_vm1, %v4535_v10  ;;  %v7489_v21 = vcombine.high %v5660_v62, %v5662_v2  ;;  %v7488_v8 = vcombine.low %v5660_v62, %v5662_v2  ;;  %v5667_v26 = vunpack.c.l.s8.bf16 %v5587_v24  ;;  %v5669_v10 = vunpack.c.l.s8.bf16 %v5588_v5  ;;  %v5592_v2 = vld [vmem:[#allocation5 + $0x438] sm:$0xff] }
 0x71a   :  { %6225 = vmatpush1.bf16.msra.mxu1 %v7462_v54  ;;  %6307 = vmatpush1.bf16.msra.mxu0 %v7464_v9  ;;  %v5586_v54 = vld [vmem:[#allocation5 + $0x408] sm:$0xff]  ;;  %v5663_v9 = vunpack.c.l.s8.bf16 %v5585_v53  ;;  %v5531_v41 = vrot.slane %v8652_v50, %v8130_v61  ;;  %v5539_v42 = vrot.slane %v8652_v50, %v8137_v12 }
 0x71b   :  { %6226 = vmatprep.subr.bf16.mxu1 %v7467_v13  ;;  %6308 = vmatprep.subr.bf16.mxu0 %v7469_v1  ;;  %v5665_v11 = vunpack.c.l.s8.bf16 %v5586_v54  ;;  %v5664_v13 = vunpack.c.h.s8.bf16 %v5585_v53  ;;  %v5666_v1 = vunpack.c.h.s8.bf16 %v5586_v54  ;;  %v7495_v28 = vcombine.high %v5667_v26, %v5669_v10 }
 0x71c   :  { %v7494_v29 = vcombine.low %v5667_v26, %v5669_v10  ;;  %v5677_v53 = vunpack.c.l.s8.bf16 %v5592_v2  ;;  %v5596_v26 = vld [vmem:[#allocation5 + $0x458] sm:$0xff] }
 0x71d   :  { %v7491_v14 = vcombine.high %v5663_v9, %v5665_v11  ;;  %v7493_v19 = vcombine.high %v5664_v13, %v5666_v1  ;;  %v7490_v57 = vcombine.low %v5663_v9, %v5665_v11  ;;  %v7492_v22 = vcombine.low %v5664_v13, %v5666_v1  ;;  %v5594_v11 = vld [vmem:[#allocation5 + $0x448] sm:$0xff] }
 0x71e   :  { %6227 = vmatpush1.bf16.msra.mxu1 %v7466_v27  ;;  %6309 = vmatpush1.bf16.msra.mxu0 %v7468_v16  ;;  %v5668_v27 = vunpack.c.h.s8.bf16 %v5587_v24  ;;  %v5670_v16 = vunpack.c.h.s8.bf16 %v5588_v5  ;;  %v5678_v9 = vunpack.c.h.s8.bf16 %v5592_v2  ;;  %v5682_v24 = vunpack.c.h.s8.bf16 %v5594_v11  ;;  %v5595_v5 = vld [vmem:[#allocation5 + $0x450] sm:$0xff] }
 0x71f   :  { %6228 = vmatprep.subr.bf16.mxu1 %v7471_v34  ;;  %6310 = vmatprep.subr.bf16.mxu0 %v7473_v35  ;;  %v5589_v34 = vld [vmem:[#allocation5 + $0x420] sm:$0xff]  ;;  %v5590_v35 = vld [vmem:[#allocation5 + $0x428] sm:$0xff] }
 0x720   :  { %v7497_v18 = vcombine.high %v5668_v27, %v5670_v16  ;;  %v7496_v31 = vcombine.low %v5668_v27, %v5670_v16  ;;  %v5671_v36 = vunpack.c.l.s8.bf16 %v5589_v34  ;;  %v5673_v46 = vunpack.c.l.s8.bf16 %v5590_v35 }
 0x722   :  { %6229 = vmatpush1.bf16.msra.mxu1 %v7470_v20  ;;  %6311 = vmatpush1.bf16.msra.mxu0 %v7472_v63  ;;  %v5672_v20 = vunpack.c.h.s8.bf16 %v5589_v34  ;;  %v5674_v63 = vunpack.c.h.s8.bf16 %v5590_v35  ;;  %v7498_v33 = vcombine.low %v5671_v36, %v5673_v46  ;;  %v5684_v34 = vunpack.c.h.s8.bf16 %v5595_v5 }
 0x723   :  { %6230 = vmatprep.subr.bf16.mxu1 %v7475_v37  ;;  %6312 = vmatprep.subr.bf16.mxu0 %v7477_v38  ;;  %v7499_v37 = vcombine.high %v5671_v36, %v5673_v46  ;;  %v5686_v35 = vunpack.c.h.s8.bf16 %v5596_v26 }
 0x724   :  { %v7501_v38 = vcombine.high %v5672_v20, %v5674_v63  ;;  %v7500_v15 = vcombine.low %v5672_v20, %v5674_v63  ;;  %v5597_v20 = vld [vmem:[#allocation5 + $0x460] sm:$0xff]  ;;  %v5598_v63 = vld [vmem:[#allocation5 + $0x468] sm:$0xff] }
 0x726   :  { %6231 = vmatpush1.bf16.msra.mxu1 %v7474_v25  ;;  %6313 = vmatpush1.bf16.msra.mxu0 %v7476_v17  ;;  %v5512_v25 = vrot.slane %v8647_v58, %v8137_v12  ;;  %v5527_v17 = vrot.slane %v8652_v50, %v8122_v59 }
 0x727   :  { %6232 = vmatprep.subr.bf16.mxu1 %v7479_v32  ;;  %6314 = vmatprep.subr.bf16.mxu0 %v7481_v43 }
 0x72a   :  { %6233 = vmatpush1.bf16.msra.mxu1 %v7478_v60  ;;  %6315 = vmatpush1.bf16.msra.mxu0 %v7480_v47 }
 0x72b   :  { %6234 = vmatprep.subr.bf16.mxu1 %v7483_v55  ;;  %6316 = vmatprep.subr.bf16.mxu0 %v7485_v48  ;;  %v5591_v48 = vld [vmem:[#allocation5 + $0x430] sm:$0xff] }
 0x72c   :  { %v5676_v54 = vunpack.c.h.s8.bf16 %v5591_v48 }
 0x72e   :  { %6235 = vmatpush1.bf16.msra.mxu1 %v7482_v6  ;;  %6317 = vmatpush1.bf16.msra.mxu0 %v7484_v30  ;;  %v7505_v27 = vcombine.high %v5676_v54, %v5678_v9 }
 0x72f   :  { %6236 = vmatprep.subr.bf16.mxu1 %v7487_v3  ;;  %6318 = vmatprep.subr.bf16.mxu0 %v7489_v21  ;;  %v5675_v21 = vunpack.c.l.s8.bf16 %v5591_v48  ;;  %v5601_v48 = vld [vmem:[#allocation5 + $0x480] sm:$0xff] }
 0x731   :  { %v7503_v10 = vcombine.high %v5675_v21, %v5677_v53 }
 0x732   :  { %6237 = vmatpush1.bf16.msra.mxu1 %v7486_v4  ;;  %6319 = vmatpush1.bf16.msra.mxu0 %v7488_v8  ;;  %v5593_v4 = vld [vmem:[#allocation5 + $0x440] sm:$0xff] }
 0x733   :  { %6238 = vmatprep.subr.bf16.mxu1 %v7491_v14  ;;  %6320 = vmatprep.subr.bf16.mxu0 %v7493_v19  ;;  %v5679_v14 = vunpack.c.l.s8.bf16 %v5593_v4 }
 0x736   :  { %6239 = vmatpush1.bf16.msra.mxu1 %v7490_v57  ;;  %6321 = vmatpush1.bf16.msra.mxu0 %v7492_v22  ;;  %v5681_v57 = vunpack.c.l.s8.bf16 %v5594_v11  ;;  %v5680_v22 = vunpack.c.h.s8.bf16 %v5593_v4 }
 0x737   :  { %6240 = vmatprep.subr.bf16.mxu1 %v7495_v28  ;;  %6322 = vmatprep.subr.bf16.mxu0 %v7497_v18  ;;  %v7502_v28 = vcombine.low %v5675_v21, %v5677_v53  ;;  %v7504_v18 = vcombine.low %v5676_v54, %v5678_v9  ;;  %v5696_v21 = vunpack.c.h.s8.bf16 %v5601_v48  ;;  %v5604_v53 = vld [vmem:[#allocation5 + $0x498] sm:$0xff] }
 0x738   :  { %v7507_v36 = vcombine.high %v5679_v14, %v5681_v57  ;;  %v7509_v46 = vcombine.high %v5680_v22, %v5682_v24 }
 0x73a   :  { %6241 = vmatpush1.bf16.msra.mxu1 %v7494_v29  ;;  %6323 = vmatpush1.bf16.msra.mxu0 %v7496_v31  ;;  %v5683_v29 = vunpack.c.l.s8.bf16 %v5595_v5  ;;  %v5685_v31 = vunpack.c.l.s8.bf16 %v5596_v26  ;;  %v5606_v5 = vld [vmem:[#allocation5 + $0x4a8] sm:$0xff]  ;;  %v5535_v26 = vrot.slane %v8652_v50, %v8146_v23 }
 0x73b   :  { %6251 = vmatprep.subr.bf16.mxu1 %v7499_v37  ;;  %6333 = vmatprep.subr.bf16.mxu0 %v7501_v38  ;;  %v7506_v37 = vcombine.low %v5679_v14, %v5681_v57  ;;  %v7508_v38 = vcombine.low %v5680_v22, %v5682_v24  ;;  %v5702_v14 = vunpack.c.h.s8.bf16 %v5604_v53  ;;  %v5605_v24 = vld [vmem:[#allocation5 + $0x4a0] sm:$0xff] }
 0x7d0   :  { %v5405_v40 = vpop.f32.mrb[36].mxu1  ;;  %v8662_v45 = vpop.f32.mrb[36].mxu0 }
 0x7d1   :  { %v5517_v32 = vmul.f32 %v5500_v39, %v5405_v40  ;;  %v5407_v43 = vpop.f32.mrb[37].mxu1  ;;  %v5489_v51 = vpop.f32.mrb[37].mxu0  ;;  %v5687_v39 = vunpack.c.l.s8.bf16 %v5597_v20  ;;  %v5599_v40 = vld [vmem:[#allocation5 + $0x470] sm:$0xff] }
 0x7d2   :  { %v5518_v44 = vmul.f32 %v5504_v49, %v5407_v43  ;;  %v5520_v60 = vmul.f32 %v5512_v25, %v5489_v51  ;;  %v5409_v47 = vpop.f32.mrb[38].mxu1  ;;  %v5491_v55 = vpop.f32.mrb[38].mxu0  ;;  %v5689_v49 = vunpack.c.l.s8.bf16 %v5598_v63  ;;  %v5688_v25 = vunpack.c.h.s8.bf16 %v5597_v20 }
 0x7d3   :  { %v5544_v52 = vadd.f32 %v5527_v17, %v5517_v32  ;;  %v5410_v56 = vpop.f32.mrb[39].mxu1  ;;  %v5492_v62 = vpop.f32.mrb[39].mxu0  ;;  %v5690_v17 = vunpack.c.h.s8.bf16 %v5598_v63  ;;  %v7512_v32 = vcombine.low %v5684_v34, %v5686_v35  ;;  %v5691_v43 = vunpack.c.l.s8.bf16 %v5599_v40 }
 0x7d4   :  { %v5545_v6 = vadd.f32 %v5531_v41, %v5518_v44  ;;  %v5547_v30 = vadd.f32 %v5539_v42, %v5520_v60  ;;  %v5600_v41 = vld [vmem:[#allocation5 + $0x478] sm:$0xff]  ;;  %v7510_v42 = vcombine.low %v5683_v29, %v5685_v31  ;;  %v5692_v44 = vunpack.c.h.s8.bf16 %v5599_v40  ;;  %v7805_v40 = vld [vmem:[%s8810_s9 + $0x1e0] sm:$0xff]  }
 0x7d5   :  { %v5548_v3 = vmax.f32 %v5544_v52, 0.0  ;;  %v5693_v51 = vunpack.c.l.s8.bf16 %v5600_v41  ;;  %v5694_v60 = vunpack.c.h.s8.bf16 %v5600_v41  ;;  %v7515_v47 = vcombine.high %v5687_v39, %v5689_v49  ;;  %v5602_v52 = vld [vmem:[#allocation5 + $0x488] sm:$0xff]  ;;  %v7804_v41 = vld [vmem:[%s8810_s9 + $0x220] sm:$0xff]  }
 0x7d6   :  { %v5549_v8 = vmax.f32 %v5545_v6, 0.0  ;;  %v5551_v13 = vmax.f32 %v5547_v30, 0.0  ;;  %v7517_v55 = vcombine.high %v5688_v25, %v5690_v17  ;;  %v7514_v56 = vcombine.low %v5687_v39, %v5689_v49  ;;  %v7802_v49 = vld [vmem:[%s8810_s9 + $0x1d8] sm:$0xff]  }
 0x7d7   :  { %v5552_v19 = vpack.c.bf16 %v5548_v3, %v5548_v3  ;;  %v7516_v62 = vcombine.low %v5688_v25, %v5690_v17  ;;  %v7519_v2 = vcombine.high %v5691_v43, %v5693_v51  ;;  %v7521_v6 = vcombine.high %v5692_v44, %v5694_v60  ;;  %v7801_v25 = vld [vmem:[%s8810_s9 + $0x218] sm:$0xff]  }
 0x7d8   :  { %v5553_v1 = vpack.c.bf16 %v5549_v8, %v5549_v8  ;;  %v5555_v16 = vpack.c.bf16 %v5551_v13, %v5551_v13  ;;  %v5695_v30 = vunpack.c.l.s8.bf16 %v5601_v48  ;;  %v5697_v3 = vunpack.c.l.s8.bf16 %v5602_v52  ;;  %v5603_v8 = vld [vmem:[#allocation5 + $0x490] sm:$0xff]  ;;  %v7803_v17 = vld [vmem:[%s8810_s9 + $0x198] sm:$0xff]  }
 0x7d9   :  { %v5698_v4 = vunpack.c.h.s8.bf16 %v5602_v52  ;;  %v7518_v54 = vcombine.low %v5691_v43, %v5693_v51  ;;  %v7520_v9 = vcombine.low %v5692_v44, %v5694_v60  ;;  %v5699_v11 = vunpack.c.l.s8.bf16 %v5603_v8  ;;  %v7807_v43 = vld [vmem:[%s8810_s9 + $0x228] sm:$0xff]   ;;  %v7811_v44 = vld [vmem:[%s8810_s9 + $0x1f0] sm:$0xff]   ;;  %v7813_v48 = vld [vmem:[%s8810_s9 + $0x238] sm:$0xff]  }
 0x7da   :  { %6242 = vmatprep.mubr.bf16.mxu1 %v5553_v1  ;;  %6324 = vmatprep.mubr.bf16.mxu0 %v5553_v1  ;;  %v5701_v13 = vunpack.c.l.s8.bf16 %v5604_v53  ;;  %v5700_v1 = vunpack.c.h.s8.bf16 %v5603_v8  ;;  %v7523_v57 = vcombine.high %v5695_v30, %v5697_v3  ;;  %v7809_v51 = vld [vmem:[%s8810_s9 + $0x1a8] sm:$0xff]   ;;  %v7810_v60 = vld [vmem:[%s8810_s9 + $0x230] sm:$0xff]   ;;  %v7815_v52 = vld [vmem:[%s8810_s9 + $0x1b8] sm:$0xff]  }
 0x7db   :  { %6243 = vmatmul.mubr.bf16.vlgmr.msra.gmra.mrb[40].mxu1 %v5552_v19  ;;  %6325 = vmatmul.mubr.bf16.vlgmr.msra.gmra.mrb[40].mxu0 %v5552_v19  ;;  %v5508_v19 = vrot.slane %v8647_v58, %v8146_v23  ;;  %v7525_v22 = vcombine.high %v5696_v21, %v5698_v4  ;;  %v5705_v58 = vunpack.c.l.s8.bf16 %v5606_v5  ;;  %v7537_v8 = vld [vmem:[%s8809_s8 + $0x8] sm:$0xf] }
 0x7dc   :  { %6252 = vmatpush1.bf16.msra.mxu1 %v7498_v33  ;;  %6334 = vmatpush1.bf16.msra.mxu0 %v7500_v15  ;;  %v7511_v33 = vcombine.high %v5683_v29, %v5685_v31  ;;  %v7513_v15 = vcombine.high %v5684_v34, %v5686_v35  ;;  %v5704_v31 = vunpack.c.h.s8.bf16 %v5605_v24  ;;  %v5706_v34 = vunpack.c.h.s8.bf16 %v5606_v5 }
 0x7dd   :  { %7534 = vmatprep.mubr.msk.bf16.mxu1 %vm871_vm2, %v5555_v16  ;;  %7535 = vmatprep.mubr.msk.bf16.mxu0 %vm871_vm2, %v5555_v16  ;;  %v7527_v16 = vcombine.high %v5699_v11, %v5701_v13  ;;  %v5519_v29 = vmul.f32 %v5508_v19, %v8662_v45  ;;  %v7526_v35 = vcombine.low %v5699_v11, %v5701_v13  ;;  %v7799_v45 = vld [vmem:[%s8810_s9 + $0x1d0] sm:$0xff]  }
 0x7de   :  { %6253 = vmatprep.subr.bf16.mxu1 %v7503_v10  ;;  %6335 = vmatprep.subr.bf16.mxu0 %v7505_v27  ;;  %v7522_v10 = vcombine.low %v5695_v30, %v5697_v3  ;;  %v7524_v27 = vcombine.low %v5696_v21, %v5698_v4  ;;  %v7533_v20 = vcombine.high %v5704_v31, %v5706_v34  ;;  %v7820_v30 = vld [vmem:[%s8810_s9 + $0x208] sm:$0xff]   ;;  %v7822_v21 = vld [vmem:[%s8810_s9 + $0x250] sm:$0xff]  }
 0x7df   :  { %v7821_v3 = vld [vmem:[%s8810_s9 + $0x1c8] sm:$0xff]   ;;  %v6407_v11 = vrot.slane %v7537_v8, %v8122_v59  ;;  %v6415_v13 = vrot.slane %v7537_v8, %v8146_v23  ;;  %v6411_v19 = vrot.slane %v7537_v8, %v8130_v61 }
 0x7e0   :  { %6254 = vmatpush1.bf16.msra.mxu1 %v7502_v28  ;;  %6336 = vmatpush1.bf16.msra.mxu0 %v7504_v18  ;;  %v7529_v28 = vcombine.high %v5700_v1, %v5702_v14  ;;  %v5703_v18 = vunpack.c.l.s8.bf16 %v5605_v24  ;;  %v7536_v4 = vld [vmem:[%s8808_s7 + $0x8] sm:$0xf] }
 0x7e1   :  { %6255 = vmatprep.subr.bf16.mxu1 %v7507_v36  ;;  %6337 = vmatprep.subr.bf16.mxu0 %v7509_v46  ;;  %v7528_v36 = vcombine.low %v5700_v1, %v5702_v14  ;;  %v5546_v46 = vadd.f32 %v5535_v26, %v5519_v29  ;;  %v6388_v53 = vrot.slane %v7536_v4, %v8146_v23 }
 0x7e2   :  { %v7531_v50 = vcombine.high %v5703_v18, %v5705_v58  ;;  %v7530_v63 = vcombine.low %v5703_v18, %v5705_v58 }
 0x7e4   :  { %6256 = vmatpush1.bf16.msra.mxu1 %v7506_v37  ;;  %6338 = vmatpush1.bf16.msra.mxu0 %v7508_v38  ;;  %v7532_v37 = vcombine.low %v5704_v31, %v5706_v34  ;;  %v5550_v38 = vmax.f32 %v5546_v46, 0.0 }
 0x7e5   :  { %6257 = vmatprep.subr.bf16.mxu1 %v7511_v33  ;;  %6339 = vmatprep.subr.bf16.mxu0 %v7513_v15  ;;  %v7798_v33 = vld [vmem:[%s8810_s9 + $0x210] sm:$0xff]  }
 0x7e6   :  { %v7800_v15 = vld [vmem:[%s8810_s9 + $0x190] sm:$0xff]   ;;  %v5554_v39 = vpack.c.bf16 %v5550_v38, %v5550_v38  ;;  %v7589_v38 = vld [vmem:[%s8811_s10 + $0x2] ss:$0 sm:$0xff] }
 0x7e8   :  { %6258 = vmatpush1.bf16.msra.mxu1 %v7510_v42  ;;  %6340 = vmatpush1.bf16.msra.mxu0 %v7512_v32  ;;  %v7806_v42 = vld [vmem:[%s8810_s9 + $0x1a0] sm:$0xff]   ;;  %v7808_v32 = vld [vmem:[%s8810_s9 + $0x1e8] sm:$0xff]  }
 0x7e9   :  { %6259 = vmatprep.subr.bf16.mxu1 %v7515_v47  ;;  %6341 = vmatprep.subr.bf16.mxu0 %v7517_v55  ;;  %v7812_v47 = vld [vmem:[%s8810_s9 + $0x1b0] sm:$0xff]   ;;  %v7814_v55 = vld [vmem:[%s8810_s9 + $0x1f8] sm:$0xff]  }
 0x7ec   :  { %6260 = vmatpush1.bf16.msra.mxu1 %v7514_v56  ;;  %6342 = vmatpush1.bf16.msra.mxu0 %v7516_v62  ;;  %v7816_v56 = vld [vmem:[%s8810_s9 + $0x240] sm:$0xff]  }
 0x7ed   :  { %6261 = vmatprep.subr.bf16.mxu1 %v7519_v2  ;;  %6343 = vmatprep.subr.bf16.mxu0 %v7521_v6  ;;  %v7817_v62 = vld [vmem:[%s8810_s9 + $0x200] sm:$0xff]   ;;  %v7819_v6 = vld [vmem:[%s8810_s9 + $0x248] sm:$0xff]  }
 0x7ee   :  { %v7818_v2 = vld [vmem:[%s8810_s9 + $0x1c0] sm:$0xff]  }
 0x7f0   :  { %6262 = vmatpush1.bf16.msra.mxu1 %v7518_v54  ;;  %6344 = vmatpush1.bf16.msra.mxu0 %v7520_v9  ;;  %v6384_v54 = vrot.slane %v7536_v4, %v8130_v61  ;;  %v6392_v9 = vrot.slane %v7536_v4, %v8137_v12 }
 0x7f1   :  { %6263 = vmatprep.subr.bf16.mxu1 %v7523_v57  ;;  %6345 = vmatprep.subr.bf16.mxu0 %v7525_v22  ;;  %v6419_v57 = vrot.slane %v7537_v8, %v8137_v12 }
 0x7f4   :  { %6264 = vmatpush1.bf16.msra.mxu1 %v7522_v10  ;;  %6346 = vmatpush1.bf16.msra.mxu0 %v7524_v27 }
 0x7f5   :  { %6265 = vmatprep.subr.bf16.mxu1 %v7527_v16  ;;  %6347 = vmatprep.subr.bf16.mxu0 %v7529_v28 }
 0x7f8   :  { %6266 = vmatpush1.bf16.msra.mxu1 %v7526_v35  ;;  %6348 = vmatpush1.bf16.msra.mxu0 %v7528_v36 }
 0x7f9   :  { %6267 = vmatprep.subr.bf16.mxu1 %v7531_v50  ;;  %6349 = vmatprep.subr.bf16.mxu0 %v7533_v20 }
 0x7fc   :  { %6268 = vmatpush1.bf16.msra.mxu1 %v7530_v63  ;;  %6350 = vmatpush1.bf16.msra.mxu0 %v7532_v37 }
 0x7fd   :  { %6688 = vmatprep.subr.bf16.mxu0 %v7927_v0  ;;  %7660 = vmatprep.subr.bf16.mxu1 %v7799_v45 }
 0x7ff   :  { %6284 = vmatmul.mubr.bf16.vlgmr.msra.gmra.mrb[40].mxu1 %v5554_v39  ;;  %6366 = vmatmul.mubr.bf16.vlgmr.msra.gmra.mrb[40].mxu0 %v5554_v39 }
 0x800   :  { %6689 = vmatpush1.bf16.msra.mxu0 %v7798_v33  ;;  %7661 = vmatpush3.bf16.msra.mxu1 %v7800_v15 }
 0x801   :  { %6690 = vmatprep.subr.bf16.mxu0 %v7927_v0  ;;  %7662 = vmatprep.subr.bf16.mxu1 %v7802_v49 }
 0x804   :  { %6691 = vmatpush1.bf16.msra.mxu0 %v7801_v25  ;;  %7663 = vmatpush3.bf16.msra.mxu1 %v7803_v17 }
 0x805   :  { %6692 = vmatprep.subr.bf16.mxu0 %v7927_v0  ;;  %7664 = vmatprep.subr.bf16.mxu1 %v7805_v40 }
 0x808   :  { %6693 = vmatpush1.bf16.msra.mxu0 %v7804_v41  ;;  %7665 = vmatpush3.bf16.msra.mxu1 %v7806_v42  ;;  %v7849_v42 = vld [vmem:[%s8812_s11] ss:$0 sm:$0xff] }
 0x809   :  { %6694 = vmatprep.subr.bf16.mxu0 %v7927_v0  ;;  %7666 = vmatprep.subr.bf16.mxu1 %v7808_v32 }
 0x80c   :  { %6695 = vmatpush1.bf16.msra.mxu0 %v7807_v43  ;;  %7667 = vmatpush3.bf16.msra.mxu1 %v7809_v51 }
 0x80d   :  { %6696 = vmatprep.subr.bf16.mxu0 %v7927_v0  ;;  %7668 = vmatprep.subr.bf16.mxu1 %v7811_v44 }
 0x810   :  { %6697 = vmatpush1.bf16.msra.mxu0 %v7810_v60  ;;  %7669 = vmatpush3.bf16.msra.mxu1 %v7812_v47 }
 0x811   :  { %6698 = vmatprep.subr.bf16.mxu0 %v7927_v0  ;;  %7670 = vmatprep.subr.bf16.mxu1 %v7814_v55 }
 0x814   :  { %6699 = vmatpush1.bf16.msra.mxu0 %v7813_v48  ;;  %7671 = vmatpush3.bf16.msra.mxu1 %v7815_v52 }
 0x815   :  { %6700 = vmatprep.subr.bf16.mxu0 %v7927_v0  ;;  %7672 = vmatprep.subr.bf16.mxu1 %v7817_v62 }
 0x818   :  { %6701 = vmatpush1.bf16.msra.mxu0 %v7816_v56  ;;  %7673 = vmatpush3.bf16.msra.mxu1 %v7818_v2 }
 0x819   :  { %6702 = vmatprep.subr.bf16.mxu0 %v7927_v0  ;;  %7674 = vmatprep.subr.bf16.mxu1 %v7820_v30 }
 0x81c   :  { %6703 = vmatpush1.bf16.msra.mxu0 %v7819_v6  ;;  %7675 = vmatpush3.bf16.msra.mxu1 %v7821_v3  ;;  %v7850_v3 = vld [vmem:[%s8813_s12] ss:$0 sm:$0xff]  ;;  %s7895_s12 = scalar_lea.vmem %s6769_s15, 384 }
 0x81d   :  { %6704 = vmatprep.subr.bf16.mxu0 %v7927_v0  ;;  %v6380_v0 = vrot.slane %v7536_v4, %v8122_v59  ;;  %p7896_p2 = scmp.ne.s32.totalorder %s6769_s15, %s7895_s12  ;;  %p7901_p4 = scmp.lt.s32.totalorder %s7895_s12, %s7895_s12 }
 0x81f   :  { %p7902_p5 = por %p7901_p4, %p7900_p3 }
 0x820   :  { %6705 = vmatpush1.bf16.msra.mxu0 %v7822_v21 }
 0x821   :  { %p7903_p6 = pnand %p7902_p5, %p7896_p2 }
 0x8d2   :  { %v6285_v1 = vpop.f32.mrb[40].mxu1  ;;  %v6367_v14 = vpop.f32.mrb[40].mxu0 }
 0x8d3   :  { %v6397_v22 = vmul.f32 %v6380_v0, %v6285_v1  ;;  %v6399_v24 = vmul.f32 %v6388_v53, %v6367_v14  ;;  %v6287_v5 = vpop.f32.mrb[41].mxu1  ;;  %v6369_v26 = vpop.f32.mrb[41].mxu0 }
 0x8d4   :  { %v6398_v10 = vmul.f32 %v6384_v54, %v6287_v5  ;;  %v6400_v27 = vmul.f32 %v6392_v9, %v6369_v26  ;;  %v6289_v16 = vpop.f32.mrb[42].mxu1  ;;  %v6371_v28 = vpop.f32.mrb[42].mxu0 }
 0x8d5   :  { %v6424_v18 = vadd.f32 %v6407_v11, %v6397_v22  ;;  %v6426_v29 = vadd.f32 %v6415_v13, %v6399_v24  ;;  %v6290_v58 = vpop.f32.mrb[43].mxu1  ;;  %v6372_v59 = vpop.f32.mrb[43].mxu0 }
 0x8d6   :  { %v6425_v31 = vadd.f32 %v6411_v19, %v6398_v10  ;;  %v6427_v23 = vadd.f32 %v6419_v57, %v6400_v27 }
 0x8d7   :  { %v6428_v34 = vmax.f32 %v6424_v18, 0.0  ;;  %v6430_v35 = vmax.f32 %v6426_v29, 0.0 }
 0x8d8   :  { %v6429_v36 = vmax.f32 %v6425_v31, 0.0  ;;  %v6431_v61 = vmax.f32 %v6427_v23, 0.0 }
 0x8d9   :  { %v6432_v50 = vpack.c.bf16 %v6428_v34, %v6428_v34  ;;  %v6434_v20 = vpack.c.bf16 %v6430_v35, %v6430_v35 }
 0x8da   :  { %v6433_v46 = vpack.c.bf16 %v6429_v36, %v6429_v36  ;;  %v6435_v12 = vpack.c.bf16 %v6431_v61, %v6431_v61 }
 0x8dc   :  { %6680 = vmatprep.mubr.bf16.mxu1 %v6433_v46  ;;  %7615 = vmatprep.mubr.msk.bf16.mxu0 %vm871_vm2, %v6435_v12 }
 0x8dd   :  { %6681 = vmatmul.mubr.bf16.vlgmr.msra.gmra.mrb[44].mxu1 %v6432_v50  ;;  %6721 = vmatmul.mubr.bf16.vlgmr.msra.gmra.mrb[44].mxu0 %v6434_v20 }
 0x9b0   :  { %v7676_v63 = vpop.f32.mrb[44].mxu1  ;;  %v6722_v37 = vpop.f32.mrb[44].mxu0 }
 0x9b1   :  { %v7677_v45 = vpop.f32.mrb[45].mxu1  ;;  %v6724_v33 = vpop.f32.mrb[45].mxu0 }
 0x9b2   :  { %v7678_v15 = vadd.f32 %v7677_v45, %v7676_v63  ;;  %v7679_v39 = vpop.f32.mrb[46].mxu1  ;;  %v6725_v49 = vpop.f32.mrb[46].mxu0 }
 0x9b3   :  { %v7680_v25 = vpop.f32.mrb[47].mxu1  ;;  %v6726_v17 = vpop.f32.mrb[47].mxu0 }
 0x9b4   :  { %v6683_v40 = vadd.f32 %v7678_v15, %v7589_v38 }
 0x9b6   :  { %v6723_v41 = vadd.f32 %v6722_v37, %v6683_v40 }
 0x9b8   :  { %v6728_v32 = vsub.f32 %v7849_v42, %v6723_v41 }
 0x9ba   :  { %v6730_v43 = vmin.f32 %v6728_v32, 20.0  ;;  %vm6729_vm13 = vcmp.gt.f32.partialorder %v6728_v32, 20.0 }
 0x9bc   :  { %v6731_v51 = vmul.f32 1.442695, %v6730_v43 }
 0x9be   :  { %7839 = vpow2.f32 %v6731_v51 }
 0x9c8   :  { %v7840_v44 = vpop.eup %7839 }
 0x9c9   :  { %v6733_v60 = vadd.f32 1.0, %v7840_v44  ;;  %v6736_v47 = vmul.f32 -0.5, %v7840_v44  ;;  %v6739_v48 = vand.u32 2147483647, %v7840_v44 }
 0x9cb   :  { %7841 = vlog2.f32 %v6733_v60  ;;  %v6737_v55 = vadd.f32 1.0, %v6736_v47  ;;  %vm6740_vm12 = vcmp.lt.f32.partialorder %v6739_v48, 0.0004427343 }
 0x9cd   :  { %v6738_v62 = vmul.f32 %v7840_v44, %v6737_v55 }
 0x9d5   :  { %v7842_v52 = vpop.eup %7841 }
 0x9d6   :  { %v6735_v56 = vmul.f32 0.6931472, %v7842_v52 }
 0x9d8   :  { %v6741_v2 = vsel %vm6740_vm12, %v6738_v62, %v6735_v56 }
 0x9d9   :  { %v6742_v6 = vsel %vm6729_vm13, %v6728_v32, %v6741_v2 }
 0x9da   :  { %v6743_v30 = vsub.f32 %v7849_v42, %v6742_v6 }
 0x9dc   :  { %v6744_v21 = vsub.f32 %v6743_v30, %v7850_v3 }
 0x9de   :  { %v6746_v4 = vmin.f32 %v6744_v21, 20.0  ;;  %vm6745_vm15 = vcmp.gt.f32.partialorder %v6744_v21, 20.0 }
 0x9e0   :  { %v6747_v8 = vmul.f32 1.442695, %v6746_v4 }
 0x9e2   :  { %7843 = vpow2.f32 %v6747_v8 }
 0x9ec   :  { %v7844_v0 = vpop.eup %7843 }
 0x9ed   :  { %v6749_v53 = vadd.f32 1.0, %v7844_v0  ;;  %v6752_v54 = vmul.f32 -0.5, %v7844_v0  ;;  %v6755_v11 = vand.u32 2147483647, %v7844_v0 }
 0x9ef   :  { %7845 = vlog2.f32 %v6749_v53  ;;  %v6753_v9 = vadd.f32 1.0, %v6752_v54  ;;  %vm6756_vm14 = vcmp.lt.f32.partialorder %v6755_v11, 0.0004427343 }
 0x9f1   :  { %v6754_v14 = vmul.f32 %v7844_v0, %v6753_v9 }
 0x9f9   :  { %v7846_v13 = vpop.eup %7845 }
 0x9fa   :  { %v6751_v1 = vmul.f32 0.6931472, %v7846_v13 }
 0x9fc   :  { %v6757_v19 = vsel %vm6756_vm14, %v6754_v14, %v6751_v1 }
 0x9fd   :  { %v6758_v57 = vsel %vm6745_vm15, %v6744_v21, %v6757_v19 }
 0x9fe   :  { %v6759_v22 = vadd.f32 %v7850_v3, %v6758_v57 }
 0xa00   :  { %v6760_v24 = vsel %vm2310_vm7, %v6759_v22, %v6723_v41 }
 0xa01   :  { %6762 = vst.msk [vmem:[#allocation7 + $0x10] sm:$0xff] %vm114_vm1, %v6760_v24 }
 0xa02   :  { %7906 = shalt.err (!%p7903_p6)
}
 0xa03   :  { %s7907_s16 = scalar_lea.hbm %s8814_s13, 384 }
 0xa04   :  { %p7908_p7 = scmp.ne.s32.totalorder %s8814_s13, %s7907_s16  ;;  %p7911_p8 = scmp.lt.u32.totalorder %s7907_s16, %s8814_s13 }
 0xa06   :  { %p7913_p9 = pnand %p7911_p8, %p7908_p7 }
 0xa08   :  { %7916 = shalt.err (!%p7913_p9)
}
 0xa09   :  { %6774 = dma.vmem_to_hbm [thread:$0]  %s6769_s15, 384, %s8814_s13, [#allocation4], %s7924_s18, %s7924_s18, %s7925_s19  }
 0xa0a   :  { %7921 = dma.done.wait [#allocation4], 384  }
 0xa0b   :  { %7922 = vsyncadd [#allocation4], 4294966912 }
 0xa0c   :  { %6778 = vsyncpa [#allocation3], 1 }
 0xa0d   :  { %6779 = vsyncpa [#allocation6], 1 }
 0xa0e   :  { %6780 = vsyncpa [#allocation4], 1 }

</bundles_post_ra>
